<compile_context>
chip_gen: v6e
topology: v6e:2x2x1
jax: 0.10.0
libtpu: 0.0.40
codegen_flags: <defaults>
</compile_context>

<pallas_src>
import math

import jax
import jax.numpy as jnp
from jax.experimental import pallas as pl
from jax.experimental.pallas import tpu as pltpu

_LANE = 128  # classifier output padded to full lane width


def _layer_norm(x, g, b, eps=1e-5):
    mu = jnp.mean(x, axis=-1, keepdims=True)
    xc = x - mu
    var = jnp.mean(xc * xc, axis=-1, keepdims=True)
    return xc * jax.lax.rsqrt(var + eps) * g + b


def transformer_kernel(h0_ref, wattn_ref, w1_ref, w2_ref, vec_ref,
                       wfc_ref, bfc_ref, out_ref, h_ref):
    l = pl.program_id(0)
    d = wattn_ref.shape[0]
    ff = w1_ref.shape[1]

    # ---- layer 0: seed the activation carry with the input projection ----
    @pl.when(l == 0)
    def _():
        h_ref[...] = h0_ref[...]

    h = h_ref[...]

    # ---- packed per-layer f32 vectors (single DMA, 128-aligned offsets) ----
    b_attn = vec_ref[:, 0 * d:1 * d]
    ln1g = vec_ref[:, 1 * d:2 * d]
    ln1b = vec_ref[:, 2 * d:3 * d]
    b1 = vec_ref[:, 3 * d:3 * d + ff]
    b2 = vec_ref[:, 3 * d + ff:4 * d + ff]
    ln2g = vec_ref[:, 4 * d + ff:5 * d + ff]
    ln2b = vec_ref[:, 5 * d + ff:6 * d + ff]

    # ---- self attention (seq_len == 1, softmax == 1): fused Wv@Wo ----
    attn = jnp.dot(h.astype(jnp.bfloat16), wattn_ref[...],
                   preferred_element_type=jnp.float32) + b_attn
    # dropout is identity in eval mode
    h = _layer_norm(h + attn, ln1g, ln1b)

    # ---- feed forward: Linear -> ReLU -> Linear (bf16 x bf16, f32 acc) ----
    f = jnp.dot(h.astype(jnp.bfloat16), w1_ref[...],
                preferred_element_type=jnp.float32) + b1
    f = jnp.maximum(f, 0.0)
    f = jnp.dot(f.astype(jnp.bfloat16), w2_ref[...],
                preferred_element_type=jnp.float32) + b2
    h = _layer_norm(h + f, ln2g, ln2b)

    h_ref[...] = h

    # ---- final classifier (lane-padded), written on the last layer only ----
    @pl.when(l == pl.num_programs(0) - 1)
    def _():
        out_ref[...] = (jnp.dot(h.astype(jnp.bfloat16), wfc_ref[...],
                                preferred_element_type=jnp.float32)
                        + bfc_ref[...])


def transformer_forward(x, kp, num_classes):
    """x: (B, C, H, W) float32, flattened like torch flatten(1)."""
    B = x.shape[0]
    x_flat = x.reshape(B, -1).astype(jnp.float32)

    # Input projection + PE(position 0) outside the grid (tiny XLA matmul):
    # keeps the pipeline prologue to layer-0 weights only and frees ~0.5 MiB
    # of VMEM that win/x would otherwise hold for the whole grid.
    h0 = x_flat @ kp["win"] + kp["binpe"]

    L, d, _ = kp["wattn"].shape
    ff = kp["w1"].shape[-1]
    pvec = 6 * d + ff

    const = lambda l: (0, 0)          # resident across the layer grid
    per3 = lambda l: (l, 0, 0)        # per-layer block (leading axis squeezed)

    in_specs = [
        pl.BlockSpec((B, d), const),             # h0 (f32)
        pl.BlockSpec((None, d, d), per3),        # fused Wv@Wo (bf16)
        pl.BlockSpec((None, d, ff), per3),       # w1 (bf16)
        pl.BlockSpec((None, ff, d), per3),       # w2 (bf16)
        pl.BlockSpec((None, 1, pvec), per3),     # packed biases/LN (f32)
        pl.BlockSpec((d, _LANE), const),         # wfc padded (bf16)
        pl.BlockSpec((1, _LANE), const),         # bfc padded (f32)
    ]

    out_padded = pl.pallas_call(
        transformer_kernel,
        out_shape=jax.ShapeDtypeStruct((B, _LANE), jnp.float32),
        grid=(L,),
        in_specs=in_specs,
        out_specs=pl.BlockSpec((B, _LANE), const),
        scratch_shapes=[pltpu.VMEM((B, d), jnp.float32)],  # activation carry
        compiler_params=pltpu.CompilerParams(
            dimension_semantics=("arbitrary",)),           # sequential carry axis
    )(h0, kp["wattn"], kp["w1"], kp["w2"], kp["vec"], kp["wfc"], kp["bfc"])
    return out_padded[:, :num_classes]


def prepare_params(p):
    """One-time host-side preprocessing of PyTorch-equivalent params into the
    kernel layout:
      * Wv@Wo fused in f32, rounded once to bf16 (exact at seq_len==1);
      * bf16 weight matrices (approximation of the f32 PyTorch model);
      * all per-layer f32 vectors packed into a single (L, 1, 6d+ff) array;
      * PE row 0 folded into the input-projection bias;
      * classifier padded to 128 lanes."""
    L, _, d = p["wo"].shape
    ff = p["w1"].shape[-1]
    nc = p["wfc"].shape[-1]

    wv = p["wqkv"][:, 2].astype(jnp.float32)          # V slice only (L, d, d)
    bv = p["bqkv"][:, 2].astype(jnp.float32)          # (L, d)
    wo = p["wo"].astype(jnp.float32)
    bo = p["bo"].astype(jnp.float32)

    wattn = jnp.einsum("lij,ljk->lik", wv, wo)        # f32 product
    battn = jnp.einsum("lj,ljk->lk", bv, wo) + bo     # (L, d)

    vec = jnp.concatenate(
        [battn, p["ln1g"], p["ln1b"], p["b1"], p["b2"], p["ln2g"], p["ln2b"]],
        axis=-1).astype(jnp.float32).reshape(L, 1, 6 * d + ff)

    wfc_p = jnp.zeros((d, _LANE), jnp.float32).at[:, :nc].set(p["wfc"])
    bfc_p = jnp.zeros((1, _LANE), jnp.float32).at[0, :nc].set(p["bfc"])

    return {
        "win":   p["win"].astype(jnp.float32),                     # (input_dim, d)
        "binpe": (p["bin"] + p["pe"][0]).reshape(1, d).astype(jnp.float32),
        "wattn": wattn.astype(jnp.bfloat16),
        "w1":    p["w1"].astype(jnp.bfloat16),
        "w2":    p["w2"].astype(jnp.bfloat16),
        "vec":   vec,
        "wfc":   wfc_p.astype(jnp.bfloat16),
        "bfc":   bfc_p,
    }


def init_params(key, input_dim, d_model, num_layers, num_classes,
                dim_feedforward=2048):
    """Deterministic synthetic parameters (shapes match the PyTorch module,
    nn.Linear weights pre-transposed to (d_in, d_out))."""
    ks = jax.random.split(key, 16)

    def nrm(k, shape, scale=0.02):
        return (scale * jax.random.normal(k, shape)).astype(jnp.float32)

    # Positional encoding row for position 0 (only row used since seq_len==1).
    div_term = jnp.exp(jnp.arange(0, d_model, 2, dtype=jnp.float32)
                       * (-math.log(10000.0) / d_model))
    pe = jnp.zeros((1, d_model), jnp.float32)
    pe = pe.at[0, 0::2].set(jnp.sin(0.0 * div_term))
    pe = pe.at[0, 1::2].set(jnp.cos(0.0 * div_term))

    L, d, ff = num_layers, d_model, dim_feedforward
    return {
        "win":  nrm(ks[0], (input_dim, d)),
        "bin":  nrm(ks[1], (d,)),
        "pe":   pe,
        # MHA in_proj (q, k, v stacked) and out_proj, per layer.  Q/K never
        # influence the output at seq_len == 1 and are dropped by prepare_params.
        "wqkv": nrm(ks[2], (L, 3, d, d)),
        "bqkv": nrm(ks[3], (L, 3, d)),
        "wo":   nrm(ks[4], (L, d, d)),
        "bo":   nrm(ks[5], (L, d)),
        "ln1g": jnp.ones((L, d), jnp.float32),
        "ln1b": jnp.zeros((L, d), jnp.float32),
        "w1":   nrm(ks[6], (L, d, ff)),
        "b1":   nrm(ks[7], (L, ff)),
        "w2":   nrm(ks[8], (L, ff, d)),
        "b2":   nrm(ks[9], (L, d)),
        "ln2g": jnp.ones((L, d), jnp.float32),
        "ln2b": jnp.zeros((L, d), jnp.float32),
        "wfc":  nrm(ks[10], (d, num_classes)),
        "bfc":  nrm(ks[11], (num_classes,)),
    }


def reference_forward(x, kp, num_classes):
    """Pure-JAX reference using the same prepared (bf16-rounded) weights but
    full-f32 activation math.  Note: bf16 weight storage and in-kernel bf16
    activation casts are an approximation of the f32 PyTorch model."""
    B = x.shape[0]
    h = x.reshape(B, -1).astype(jnp.float32) @ kp["win"] + kp["binpe"][0]
    L, d, _ = kp["wattn"].shape
    ff = kp["w1"].shape[-1]
    for l in range(L):
        v = kp["vec"][l, 0]
        battn, ln1g, ln1b = v[:d], v[d:2 * d], v[2 * d:3 * d]
        b1 = v[3 * d:3 * d + ff]
        b2 = v[3 * d + ff:4 * d + ff]
        ln2g = v[4 * d + ff:5 * d + ff]
        ln2b = v[5 * d + ff:6 * d + ff]

        attn = h @ kp["wattn"][l].astype(jnp.float32) + battn
        h = _layer_norm(h + attn, ln1g, ln1b)
        f = jnp.maximum(h @ kp["w1"][l].astype(jnp.float32) + b1, 0.0)
        f = f @ kp["w2"][l].astype(jnp.float32) + b2
        h = _layer_norm(h + f, ln2g, ln2b)
    out = h @ kp["wfc"].astype(jnp.float32) + kp["bfc"][0]
    return out[:, :num_classes]


if __name__ == "__main__":
    key = jax.random.PRNGKey(0)
    kx, kw = jax.random.split(key)

    # TransformerModel(input_dim=1024, num_heads=4, num_layers=2,
    #                  num_classes=10, d_model=256) — eval mode, seq_len == 1.
    B, C, H, W = 2, 4, 16, 16
    input_dim = C * H * W
    d_model, num_heads, num_layers, num_classes = 256, 4, 2, 10
    # num_heads does not influence the output at seq_len == 1 (see kernel note).

    x = jax.random.normal(kx, (B, C, H, W), jnp.float32)
    params = init_params(kw, input_dim, d_model, num_layers, num_classes)
    kp = prepare_params(params)

    out = transformer_forward(x, kp, num_classes)
    jax.block_until_ready(out)
    assert out.shape == (B, num_classes) and out.dtype == jnp.float32

    ref = reference_forward(x, kp, num_classes)
    assert jnp.allclose(out, ref, atol=2e-2, rtol=2e-2), "mismatch vs JAX reference"

    print("KERNEL_OK")
</pallas_src>

<mosaic_0001>
module attributes {stable_mosaic.version = 11 : i64} {
  func.func @transformer_kernel(%arg0: i32, %arg1: memref<2x256xf32, #tpu.memory_space<vmem>>, %arg2: memref<1x256x256xbf16, #tpu.memory_space<vmem>>, %arg3: memref<1x256x2048xbf16, #tpu.memory_space<vmem>>, %arg4: memref<1x2048x256xbf16, #tpu.memory_space<vmem>>, %arg5: memref<1x1x3584xf32, #tpu.memory_space<vmem>>, %arg6: memref<256x128xbf16, #tpu.memory_space<vmem>>, %arg7: memref<1x128xf32, #tpu.memory_space<vmem>>, %arg8: memref<2x128xf32, #tpu.memory_space<vmem>>, %arg9: memref<2x256xf32, #tpu.memory_space<vmem>>) attributes {dimension_semantics = [#tpu.dimension_semantics<arbitrary>], iteration_bounds = array<i64: 2>, scalar_prefetch = 0 : i64, scratch_operands = 1 : i64, tpu.core_type = #tpu.core_type<tc>, window_params = [{pipeline_mode = #tpu.pipeline_mode<synchronous>, transform_indices = @transform_0, window_bounds = array<i64: 2, 256>}, {transform_indices = @transform_1, window_bounds = array<i64: 1, 256, 256>}, {transform_indices = @transform_2, window_bounds = array<i64: 1, 256, 2048>}, {transform_indices = @transform_3, window_bounds = array<i64: 1, 2048, 256>}, {transform_indices = @transform_4, window_bounds = array<i64: 1, 1, 3584>}, {pipeline_mode = #tpu.pipeline_mode<synchronous>, transform_indices = @transform_5, window_bounds = array<i64: 256, 128>}, {pipeline_mode = #tpu.pipeline_mode<synchronous>, transform_indices = @transform_6, window_bounds = array<i64: 1, 128>}, {pipeline_mode = #tpu.pipeline_mode<synchronous>, transform_indices = @transform_7, window_bounds = array<i64: 2, 128>}]} {
    %c0_i32 = arith.constant 0 : i32
    %0 = arith.cmpi eq, %arg0, %c0_i32 : i32
    %1 = arith.extui %0 : i1 to i32
    %c0_i32_0 = arith.constant 0 : i32
    %2 = arith.cmpi ne, %1, %c0_i32_0 : i32
    scf.if %2 {
      %c0_42 = arith.constant 0 : index
      %c0_43 = arith.constant 0 : index
      %84 = vector.load %arg1[%c0_42, %c0_43] : memref<2x256xf32, #tpu.memory_space<vmem>>, vector<2x256xf32>
      %c0_44 = arith.constant 0 : index
      %c0_45 = arith.constant 0 : index
      %85 = vector.load %arg9[%c0_44, %c0_45] : memref<2x256xf32, #tpu.memory_space<vmem>>, vector<2x256xf32>
      tpu.vector_store %arg9[%c0_44, %c0_45], %84 {strides = array<i32>} : memref<2x256xf32, #tpu.memory_space<vmem>>, vector<2x256xf32>,
    } else {
    }
    %c0 = arith.constant 0 : index
    %c0_1 = arith.constant 0 : index
    %3 = vector.load %arg9[%c0, %c0_1] : memref<2x256xf32, #tpu.memory_space<vmem>>, vector<2x256xf32>
    %c0_2 = arith.constant 0 : index
    %c0_3 = arith.constant 0 : index
    %c0_4 = arith.constant 0 : index
    %4 = vector.load %arg5[%c0_2, %c0_3, %c0_4] : memref<1x1x3584xf32, #tpu.memory_space<vmem>>, vector<1x1x256xf32>
    %5 = vector.shape_cast %4 : vector<1x1x256xf32> to vector<1x256xf32>
    %c0_5 = arith.constant 0 : index
    %c0_6 = arith.constant 0 : index
    %c256 = arith.constant 256 : index
    %6 = vector.load %arg5[%c0_5, %c0_6, %c256] : memref<1x1x3584xf32, #tpu.memory_space<vmem>>, vector<1x1x256xf32>
    %7 = vector.shape_cast %6 : vector<1x1x256xf32> to vector<1x256xf32>
    %c0_7 = arith.constant 0 : index
    %c0_8 = arith.constant 0 : index
    %c512 = arith.constant 512 : index
    %8 = vector.load %arg5[%c0_7, %c0_8, %c512] : memref<1x1x3584xf32, #tpu.memory_space<vmem>>, vector<1x1x256xf32>
    %9 = vector.shape_cast %8 : vector<1x1x256xf32> to vector<1x256xf32>
    %c0_9 = arith.constant 0 : index
    %c0_10 = arith.constant 0 : index
    %c768 = arith.constant 768 : index
    %10 = vector.load %arg5[%c0_9, %c0_10, %c768] : memref<1x1x3584xf32, #tpu.memory_space<vmem>>, vector<1x1x2048xf32>
    %11 = vector.shape_cast %10 : vector<1x1x2048xf32> to vector<1x2048xf32>
    %c0_11 = arith.constant 0 : index
    %c0_12 = arith.constant 0 : index
    %c2816 = arith.constant 2816 : index
    %12 = vector.load %arg5[%c0_11, %c0_12, %c2816] : memref<1x1x3584xf32, #tpu.memory_space<vmem>>, vector<1x1x256xf32>
    %13 = vector.shape_cast %12 : vector<1x1x256xf32> to vector<1x256xf32>
    %c0_13 = arith.constant 0 : index
    %c0_14 = arith.constant 0 : index
    %c3072 = arith.constant 3072 : index
    %14 = vector.load %arg5[%c0_13, %c0_14, %c3072] : memref<1x1x3584xf32, #tpu.memory_space<vmem>>, vector<1x1x256xf32>
    %15 = vector.shape_cast %14 : vector<1x1x256xf32> to vector<1x256xf32>
    %c0_15 = arith.constant 0 : index
    %c0_16 = arith.constant 0 : index
    %c3328 = arith.constant 3328 : index
    %16 = vector.load %arg5[%c0_15, %c0_16, %c3328] : memref<1x1x3584xf32, #tpu.memory_space<vmem>>, vector<1x1x256xf32>
    %17 = vector.shape_cast %16 : vector<1x1x256xf32> to vector<1x256xf32>
    %18 = arith.truncf %3 : vector<2x256xf32> to vector<2x256xbf16>
    %c0_17 = arith.constant 0 : index
    %c0_18 = arith.constant 0 : index
    %c0_19 = arith.constant 0 : index
    %19 = vector.load %arg2[%c0_17, %c0_18, %c0_19] : memref<1x256x256xbf16, #tpu.memory_space<vmem>>, vector<1x256x256xbf16>
    %20 = vector.shape_cast %19 : vector<1x256x256xbf16> to vector<256x256xbf16>
    %cst = arith.constant dense<0.000000e+00> : vector<2x256xf32>
    %21 = tpu.matmul %18, %20, %cst {dimension_numbers = #tpu.dot_dimension_numbers<[1], [0], [0], [1], [0, 0, 1, 1], [], []>} : vector<2x256xbf16>, vector<256x256xbf16>, vector<2x256xf32> -> vector<2x256xf32>
    %22 = vector.broadcast %5 : vector<1x256xf32> to vector<2x256xf32>
    %23 = arith.addf %21, %22 : vector<2x256xf32>
    %24 = arith.addf %3, %23 : vector<2x256xf32>
    %cst_20 = arith.constant dense<0.000000e+00> : vector<2xf32>
    %25 = vector.multi_reduction <add>, %24, %cst_20 [1] : vector<2x256xf32> to vector<2xf32>
    %26 = vector.shape_cast %25 : vector<2xf32> to vector<2x1xf32>
    %cst_21 = arith.constant 2.560000e+02 : f32
    %27 = vector.broadcast %cst_21 : f32 to vector<2x1xf32>
    %28 = arith.divf %26, %27 : vector<2x1xf32>
    %29 = vector.broadcast %28 : vector<2x1xf32> to vector<2x256xf32>
    %30 = arith.subf %24, %29 : vector<2x256xf32>
    %31 = arith.mulf %30, %30 : vector<2x256xf32>
    %cst_22 = arith.constant dense<0.000000e+00> : vector<2xf32>
    %32 = vector.multi_reduction <add>, %31, %cst_22 [1] : vector<2x256xf32> to vector<2xf32>
    %33 = vector.shape_cast %32 : vector<2xf32> to vector<2x1xf32>
    %cst_23 = arith.constant 2.560000e+02 : f32
    %34 = vector.broadcast %cst_23 : f32 to vector<2x1xf32>
    %35 = arith.divf %33, %34 : vector<2x1xf32>
    %cst_24 = arith.constant 9.99999974E-6 : f32
    %36 = vector.broadcast %cst_24 : f32 to vector<2x1xf32>
    %37 = arith.addf %35, %36 : vector<2x1xf32>
    %38 = math.rsqrt %37 : vector<2x1xf32>
    %39 = vector.broadcast %38 : vector<2x1xf32> to vector<2x256xf32>
    %40 = arith.mulf %30, %39 : vector<2x256xf32>
    %41 = vector.broadcast %7 : vector<1x256xf32> to vector<2x256xf32>
    %42 = arith.mulf %40, %41 : vector<2x256xf32>
    %43 = vector.broadcast %9 : vector<1x256xf32> to vector<2x256xf32>
    %44 = arith.addf %42, %43 : vector<2x256xf32>
    %45 = arith.truncf %44 : vector<2x256xf32> to vector<2x256xbf16>
    %c0_25 = arith.constant 0 : index
    %c0_26 = arith.constant 0 : index
    %c0_27 = arith.constant 0 : index
    %46 = vector.load %arg3[%c0_25, %c0_26, %c0_27] : memref<1x256x2048xbf16, #tpu.memory_space<vmem>>, vector<1x256x2048xbf16>
    %47 = vector.shape_cast %46 : vector<1x256x2048xbf16> to vector<256x2048xbf16>
    %cst_28 = arith.constant dense<0.000000e+00> : vector<2x2048xf32>
    %48 = tpu.matmul %45, %47, %cst_28 {dimension_numbers = #tpu.dot_dimension_numbers<[1], [0], [0], [1], [0, 0, 1, 1], [], []>} : vector<2x256xbf16>, vector<256x2048xbf16>, vector<2x2048xf32> -> vector<2x2048xf32>
    %49 = vector.broadcast %11 : vector<1x2048xf32> to vector<2x2048xf32>
    %50 = arith.addf %48, %49 : vector<2x2048xf32>
    %cst_29 = arith.constant 0.000000e+00 : f32
    %51 = vector.broadcast %cst_29 : f32 to vector<2x2048xf32>
    %52 = arith.maximumf %50, %51 : vector<2x2048xf32>
    %53 = arith.truncf %52 : vector<2x2048xf32> to vector<2x2048xbf16>
    %c0_30 = arith.constant 0 : index
    %c0_31 = arith.constant 0 : index
    %c0_32 = arith.constant 0 : index
    %54 = vector.load %arg4[%c0_30, %c0_31, %c0_32] : memref<1x2048x256xbf16, #tpu.memory_space<vmem>>, vector<1x2048x256xbf16>
    %55 = vector.shape_cast %54 : vector<1x2048x256xbf16> to vector<2048x256xbf16>
    %cst_33 = arith.constant dense<0.000000e+00> : vector<2x256xf32>
    %56 = tpu.matmul %53, %55, %cst_33 {dimension_numbers = #tpu.dot_dimension_numbers<[1], [0], [0], [1], [0, 0, 1, 1], [], []>} : vector<2x2048xbf16>, vector<2048x256xbf16>, vector<2x256xf32> -> vector<2x256xf32>
    %57 = vector.broadcast %13 : vector<1x256xf32> to vector<2x256xf32>
    %58 = arith.addf %56, %57 : vector<2x256xf32>
    %59 = arith.addf %44, %58 : vector<2x256xf32>
    %cst_34 = arith.constant dense<0.000000e+00> : vector<2xf32>
    %60 = vector.multi_reduction <add>, %59, %cst_34 [1] : vector<2x256xf32> to vector<2xf32>
    %61 = vector.shape_cast %60 : vector<2xf32> to vector<2x1xf32>
    %cst_35 = arith.constant 2.560000e+02 : f32
    %62 = vector.broadcast %cst_35 : f32 to vector<2x1xf32>
    %63 = arith.divf %61, %62 : vector<2x1xf32>
    %64 = vector.broadcast %63 : vector<2x1xf32> to vector<2x256xf32>
    %65 = arith.subf %59, %64 : vector<2x256xf32>
    %66 = arith.mulf %65, %65 : vector<2x256xf32>
    %cst_36 = arith.constant dense<0.000000e+00> : vector<2xf32>
    %67 = vector.multi_reduction <add>, %66, %cst_36 [1] : vector<2x256xf32> to vector<2xf32>
    %68 = vector.shape_cast %67 : vector<2xf32> to vector<2x1xf32>
    %cst_37 = arith.constant 2.560000e+02 : f32
    %69 = vector.broadcast %cst_37 : f32 to vector<2x1xf32>
    %70 = arith.divf %68, %69 : vector<2x1xf32>
    %cst_38 = arith.constant 9.99999974E-6 : f32
    %71 = vector.broadcast %cst_38 : f32 to vector<2x1xf32>
    %72 = arith.addf %70, %71 : vector<2x1xf32>
    %73 = math.rsqrt %72 : vector<2x1xf32>
    %74 = vector.broadcast %73 : vector<2x1xf32> to vector<2x256xf32>
    %75 = arith.mulf %65, %74 : vector<2x256xf32>
    %76 = vector.broadcast %15 : vector<1x256xf32> to vector<2x256xf32>
    %77 = arith.mulf %75, %76 : vector<2x256xf32>
    %78 = vector.broadcast %17 : vector<1x256xf32> to vector<2x256xf32>
    %79 = arith.addf %77, %78 : vector<2x256xf32>
    %c0_39 = arith.constant 0 : index
    %c0_40 = arith.constant 0 : index
    %80 = vector.load %arg9[%c0_39, %c0_40] : memref<2x256xf32, #tpu.memory_space<vmem>>, vector<2x256xf32>
    tpu.vector_store %arg9[%c0_39, %c0_40], %79 {strides = array<i32>} : memref<2x256xf32, #tpu.memory_space<vmem>>, vector<2x256xf32>,
    %c1_i32 = arith.constant 1 : i32
    %81 = arith.cmpi eq, %arg0, %c1_i32 : i32
    %82 = arith.extui %81 : i1 to i32
    %c0_i32_41 = arith.constant 0 : i32
    %83 = arith.cmpi ne, %82, %c0_i32_41 : i32
    scf.if %83 {
      %84 = arith.truncf %79 : vector<2x256xf32> to vector<2x256xbf16>
      %c0_42 = arith.constant 0 : index
      %c0_43 = arith.constant 0 : index
      %85 = vector.load %arg6[%c0_42, %c0_43] : memref<256x128xbf16, #tpu.memory_space<vmem>>, vector<256x128xbf16>
      %cst_44 = arith.constant dense<0.000000e+00> : vector<2x128xf32>
      %86 = tpu.matmul %84, %85, %cst_44 {dimension_numbers = #tpu.dot_dimension_numbers<[1], [0], [0], [1], [0, 0, 1, 1], [], []>} : vector<2x256xbf16>, vector<256x128xbf16>, vector<2x128xf32> -> vector<2x128xf32>
      %c0_45 = arith.constant 0 : index
      %c0_46 = arith.constant 0 : index
      %87 = vector.load %arg7[%c0_45, %c0_46] : memref<1x128xf32, #tpu.memory_space<vmem>>, vector<1x128xf32>
      %88 = vector.broadcast %87 : vector<1x128xf32> to vector<2x128xf32>
      %89 = arith.addf %86, %88 : vector<2x128xf32>
      %c0_47 = arith.constant 0 : index
      %c0_48 = arith.constant 0 : index
      %90 = vector.load %arg8[%c0_47, %c0_48] : memref<2x128xf32, #tpu.memory_space<vmem>>, vector<2x128xf32>
      tpu.vector_store %arg8[%c0_47, %c0_48], %89 {strides = array<i32>} : memref<2x128xf32, #tpu.memory_space<vmem>>, vector<2x128xf32>,
    } else {
    }
    return
  }
  func.func @transform_0(%arg0: i32) -> (i32, i32) {
    %c0_i32 = arith.constant 0 : i32
    %c0_i32_0 = arith.constant 0 : i32
    %c0_i32_1 = arith.constant 0 : i32
    return %c0_i32, %c0_i32_0 : i32, i32
  }
  func.func @transform_1(%arg0: i32) -> (i32, i32, i32) {
    %c0_i32 = arith.constant 0 : i32
    %c0_i32_0 = arith.constant 0 : i32
    %c0_i32_1 = arith.constant 0 : i32
    return %arg0, %c0_i32, %c0_i32_0 : i32, i32, i32
  }
  func.func @transform_2(%arg0: i32) -> (i32, i32, i32) {
    %c0_i32 = arith.constant 0 : i32
    %c0_i32_0 = arith.constant 0 : i32
    %c0_i32_1 = arith.constant 0 : i32
    return %arg0, %c0_i32, %c0_i32_0 : i32, i32, i32
  }
  func.func @transform_3(%arg0: i32) -> (i32, i32, i32) {
    %c0_i32 = arith.constant 0 : i32
    %c0_i32_0 = arith.constant 0 : i32
    %c0_i32_1 = arith.constant 0 : i32
    return %arg0, %c0_i32, %c0_i32_0 : i32, i32, i32
  }
  func.func @transform_4(%arg0: i32) -> (i32, i32, i32) {
    %c0_i32 = arith.constant 0 : i32
    %c0_i32_0 = arith.constant 0 : i32
    %c0_i32_1 = arith.constant 0 : i32
    return %arg0, %c0_i32, %c0_i32_0 : i32, i32, i32
  }
  func.func @transform_5(%arg0: i32) -> (i32, i32) {
    %c0_i32 = arith.constant 0 : i32
    %c0_i32_0 = arith.constant 0 : i32
    %c0_i32_1 = arith.constant 0 : i32
    return %c0_i32, %c0_i32_0 : i32, i32
  }
  func.func @transform_6(%arg0: i32) -> (i32, i32) {
    %c0_i32 = arith.constant 0 : i32
    %c0_i32_0 = arith.constant 0 : i32
    %c0_i32_1 = arith.constant 0 : i32
    return %c0_i32, %c0_i32_0 : i32, i32
  }
  func.func @transform_7(%arg0: i32) -> (i32, i32) {
    %c0_i32 = arith.constant 0 : i32
    %c0_i32_0 = arith.constant 0 : i32
    %c0_i32_1 = arith.constant 0 : i32
    return %c0_i32, %c0_i32_0 : i32, i32
  }
}

</mosaic_0001>

<bundles_post_ra>
// kernel: tpu_custom_call.1
= control target key start
LH: loop header
LB: loop body
LE: loop exit
PB: predicated region body
PF: predicated region fallthrough
CT: control target
= control target key end

     0   :  { %s7625_s0 = inlined_call_operand.hbm [shape: f32[2,256], index: 0, kind: input, shape index: {}]   ;;  %s7626_s1 = inlined_call_operand.hbm [shape: bf16[2,256,256], index: 1, kind: input, shape index: {}]   ;;  %s7627_s2 = inlined_call_operand.hbm [shape: bf16[2,256,2048], index: 2, kind: input, shape index: {}]   ;;  %s7628_s3 = inlined_call_operand.hbm [shape: bf16[2,2048,256], index: 3, kind: input, shape index: {}]   ;;  %s7629_s4 = inlined_call_operand.hbm [shape: f32[2,1,3584], index: 4, kind: input, shape index: {}]   ;;  %s7630_s5 = inlined_call_operand.hbm [shape: bf16[256,128], index: 5, kind: input, shape index: {}]   ;;  %s7631_s6 = inlined_call_operand.hbm [shape: f32[1,128], index: 6, kind: input, shape index: {}]   ;;  %s7632_s7 = inlined_call_operand.hbm [shape: f32[2,128], index: 7, kind: output, shape index: {}]  }
   0x1   :  { %7643 = sst [smem:[#allocation23_spill]] %s7625_s0 }
   0x2   :  { %7644 = sst [smem:[#allocation24_spill]] %s7626_s1 }
   0x3   :  { %7645 = sst [smem:[#allocation25_spill]] %s7627_s2 }
   0x4   :  { %7646 = sst [smem:[#allocation26_spill]] %s7630_s5 }
   0x5   :  { %12 = vsyncpa [#allocation4], 0 }
   0x6   :  { %13 = vsyncpa [#allocation7], 0 }
   0x7   :  { %15 = vsyncpa [#allocation7 + $0x1], 0 }
   0x8   :  { %16 = vsyncpa [#allocation10], 0 }
   0x9   :  { %18 = vsyncpa [#allocation10 + $0x1], 0 }
   0xa   :  { %19 = vsyncpa [#allocation13], 0 }
   0xb   :  { %20 = vsyncpa [#allocation5], 0  ;;  %s6627_s24 = smov 0   ;;  %s6629_s25 = smov 0  }
   0xc   :  { %s6631_s26 = smov 0   ;;  %s6633_s27 = smov 0  }
   0xd LB: > { %7647 = sst [smem:[#allocation21_spill]] %s6566_s26  ;;  %s6646_s28 = sadd.s32 4294967295, %s6570_s27   ;;  %s6570_s27 = sphi %s6633_s27, %s7678_s27   ;;  %s6566_s26 = sphi %s6631_s26, %s7675_s26   ;;  %s6562_s25 = sphi %s6629_s25, %s7677_s25   ;;  %s6558_s24 = sphi %s6627_s24, %s7676_s24  }
   0xe   : > { %s6649_s29 = sadd.s32 1, %s6570_s27   ;;  %s54_s8 = sadd.s32 1, %s6566_s26 }
   0xf   : > { %s51_s30 = ssub.s32 %s6570_s27, %s6649_s29  ;;  %p61_p1 = scmp.ne.s32.totalorder %s6566_s26, %s6562_s25 }
  0x10   : > { %p52_p0 = scmp.eq.s32.totalorder %s51_s30, 0  ;;  %p62_p2 = scmp.eq.s32.totalorder %s6570_s27, 0 }
  0x11   : > { %p67_p3 = scmp.ne.s32.totalorder %s6562_s25, %s6558_s24  ;;  %p7633_p5 = scmp.eq.s32.totalorder %s6646_s28, 0 }
  0x12   : > { %s6659_s9 = scalar_select %p52_p0, %s6566_s26, %s54_s8  }
  0x13   : > { %p6661_p4 = por %p62_p2, %p61_p1  ;;  %p5138_p6 = scmp.ge.s32.totalorder %s6570_s27, 1 }
  0x14   : > { %7648 = sst [smem:[#allocation22_spill]] %s6659_s9  ;;  %p219_p7 = scmp.lt.s32.totalorder %s6570_s27, 3 }
  0x15   : > { %p6670_p8 = por %p7633_p5, %p67_p3  ;;  %s6572_s13 = smov [#allocation12]  }
  0x16   : > { %p6675_p10 = pnand %p5138_p6, %p219_p7  ;;  %s242_s14 = sshll.u32 %s6572_s13, 4  ;;  %s243_s14 = int_to_ptr.vmem [resolvable:$true] %s242_s14 }
  0x17   : > { %s7650_s11 = scalar_select %p6670_p8, 1, 0 }
  0x18   : > { %s7651_s12 = scalar_select %p6675_p10, 1, 0 }
  0x19   : > { %p5779_p11 = pneg %p6675_p10  ;;  %p5805_p13 = scmp.lt.s32.totalorder %s6570_s27, 2 }
  0x1a   : > { %s6690_s17 = sand.u32 1, %s6566_s26   ;;  %s6317_s18 = scalar_lea.vmem %s243_s14, 2048 }
  0x1b   : > { %p6683_p12 = pnand %p5779_p11, %p7633_p5  ;;  %p6318_p1 = scmp.ne.s32.totalorder %s243_s14, %s6317_s18 }
  0x1c   : > { %p6325_p6 = scmp.lt.s32.totalorder %s243_s14, %s243_s14  ;;  %p6326_p7 = scmp.lt.s32.totalorder %s6317_s18, %s6317_s18 }
  0x1d   : > { %s7652_s15 = scalar_select %p6683_p12, 1, 0 }
  0x1e   : > { %p7634_p0 = pneg %p6683_p12  ;;  %p6327_p11 = por %p6326_p7, %p6325_p6 }
  0x20   : > { %p6320_p2 = pnand %p6318_p1, %p7634_p0 }
  0x22   : > { %p6321_p3 = pneg %p6320_p2 }
  0x24   : > { %p6328_p9 = pnand %p6327_p11, %p6321_p3 }
  0x26   : > { %6331 = shalt.err (!%p6328_p9)
}
  0x27   : > { %s7639_s19 = smov 64   ;;  %s6574_s20 = smov 4  }
  0x28   : > { %s7653_s5 = sld [smem:[#allocation26_spill]]  ;;  %s5143_s23 = sshll.u32 %s6690_s17, 8 }
  0x29   : > { %s5727_s24 = sshll.u32 %s6570_s27, 12  ;;  %s7654_s1 = sld [smem:[#allocation24_spill]] }
  0x2a   : > { %s271_s18 = scalar_lea.vmem [#allocation6], %s5143_s23  ;;  %p6715_p9 = pnand %p5805_p13, %p6661_p4 }
  0x2b   : > { %s278_s16 = sshll.u32 %s271_s18, 4  ;;  %s6719_s16 = int_to_ptr.vmem [resolvable:$true] %s278_s16 }
  0x2c   : > { %p6729_p2 = pneg %p6715_p9 }
  0x2e   : > { %5785 = dma.hbm_to_vmem [thread:$0]  (!%p6683_p12), %s7653_s5, 2048, %s243_s14, [#allocation13], %s7639_s19, %s7639_s19, %s6574_s20  }
  0x2f   : > { %s6709_s13 = scalar_lea.hbm %s7654_s1, %s5727_s24  ;;  %s7656_s14 = sand.u32 1, %s6570_s27  }
  0x30   : > { %s6723_s20 = scalar_lea.sflag [#allocation7], %s7656_s14  ;;  %s6332_s21 = scalar_lea.hbm %s6709_s13, 4096 }
  0x31   : > { %p6333_p1 = scmp.ne.s32.totalorder %s6709_s13, %s6332_s21  ;;  %s6337_s24 = scalar_lea.hbm %s7654_s1, 8192 }
  0x32   : > { %p6338_p13 = scmp.lt.s32.totalorder %s6709_s13, %s7654_s1  ;;  %p6339_p6 = scmp.lt.s32.totalorder %s6337_s24, %s6332_s21 }
  0x33   : > { %p6335_p3 = pnand %p6729_p2, %p6333_p1 }
  0x34   : > { %p6340_p7 = por %p6339_p6, %p6338_p13 }
  0x35   : > { %p6336_p4 = pneg %p6335_p3 }
  0x37   : > { %p6341_p11 = pnand %p6340_p7, %p6336_p4 }
  0x39   : > { %6344 = shalt.err (!%p6341_p11)
}
  0x3a   : > { %s6345_s18 = scalar_lea.vmem %s6719_s16, 4096  ;;  %s6575_s14 = smov [#allocation6]  }
  0x3b   : > { %p6346_p5 = scmp.ne.s32.totalorder %s6719_s16, %s6345_s18  ;;  %s6350_s10 = sshll.u32 %s6575_s14, 4  ;;  %s6351_s10 = int_to_ptr.vmem [resolvable:$false] %s6350_s10 }
  0x3c   : > { %s6352_s23 = scalar_lea.vmem %s6351_s10, 8192  ;;  %p6353_p0 = scmp.lt.s32.totalorder %s6719_s16, %s6351_s10 }
  0x3d   : > { %p6348_p1 = pnand %p6346_p5, %p6729_p2  ;;  %p6354_p8 = scmp.lt.s32.totalorder %s6352_s23, %s6345_s18 }
  0x3f   : > { %p6349_p3 = pneg %p6348_p1  ;;  %p6355_p10 = por %p6354_p8, %p6353_p0 }
  0x41   : > { %p6356_p12 = pnand %p6355_p10, %p6349_p3 }
  0x43   : > { %6359 = shalt.err (!%p6356_p12)
}
  0x44   : > { %s7641_s21 = smov 128   ;;  %s7642_s24 = smov 8  }
  0x45   : > { %5792 = dma.hbm_to_vmem [thread:$0]  (!%p6715_p9), %s6709_s13, 4096, %s6719_s16, %s6723_s20, %s7641_s21, %s7641_s21, %s7642_s24  }
  0x46   : > { %s5146_s30 = sshll.u32 %s6690_s17, 11  ;;  %s5728_s8 = sshll.u32 %s6570_s27, 15 }
  0x47   : > { %s7658_s2 = sld [smem:[#allocation25_spill]]  ;;  %s292_s23 = scalar_lea.vmem [#allocation8], %s5146_s30 }
  0x48   : > { %s299_s19 = sshll.u32 %s292_s23, 4  ;;  %s6767_s26 = scalar_lea.hbm %s7628_s3, %s5728_s8  ;;  %s6762_s19 = int_to_ptr.vmem [resolvable:$true] %s299_s19 }
  0x49   : > { %s313_s16 = scalar_lea.vmem [#allocation9], %s5146_s30  ;;  %s7659_s21 = sand.u32 1, %s6570_s27  }
  0x4a   : > { %s320_s13 = sshll.u32 %s313_s16, 4  ;;  %s6773_s18 = scalar_lea.sflag [#allocation10], %s7659_s21  ;;  %s6769_s13 = int_to_ptr.vmem [resolvable:$true] %s320_s13 }
  0x4b   : > { %s6360_s14 = scalar_lea.hbm %s6767_s26, 32768  ;;  %s6365_s1 = scalar_lea.hbm %s7628_s3, 65536 }
  0x4c   : > { %p6361_p5 = scmp.ne.s32.totalorder %s6767_s26, %s6360_s14  ;;  %p6366_p12 = scmp.lt.s32.totalorder %s6767_s26, %s7628_s3 }
  0x4d   : > { %s6760_s10 = scalar_lea.hbm %s7658_s2, %s5728_s8  ;;  %p6367_p0 = scmp.lt.s32.totalorder %s6365_s1, %s6360_s14 }
  0x4e   : > { %p6363_p8 = pnand %p6361_p5, %p6729_p2 }
  0x4f   : > { %p6368_p4 = por %p6367_p0, %p6366_p12 }
  0x50   : > { %p6364_p10 = pneg %p6363_p8 }
  0x52   : > { %p6369_p13 = pnand %p6368_p4, %p6364_p10 }
  0x54   : > { %6372 = shalt.err (!%p6369_p13)
}
  0x55   : > { %s6373_s21 = scalar_lea.vmem %s6769_s13, 32768  ;;  %s6578_s30 = smov [#allocation9]  }
  0x56   : > { %p6374_p6 = scmp.ne.s32.totalorder %s6769_s13, %s6373_s21  ;;  %s6378_s24 = sshll.u32 %s6578_s30, 4  ;;  %s6379_s24 = int_to_ptr.vmem [resolvable:$false] %s6378_s24 }
  0x57   : > { %s6380_s16 = scalar_lea.vmem %s6379_s24, 65536  ;;  %p6381_p1 = scmp.lt.s32.totalorder %s6769_s13, %s6379_s24 }
  0x58   : > { %p6376_p7 = pnand %p6374_p6, %p6729_p2  ;;  %p6382_p3 = scmp.lt.s32.totalorder %s6380_s16, %s6373_s21 }
  0x5a   : > { %p6377_p11 = pneg %p6376_p7  ;;  %p6383_p5 = por %p6382_p3, %p6381_p1 }
  0x5c   : > { %p6384_p8 = pnand %p6383_p5, %p6377_p11 }
  0x5e   : > { %6387 = shalt.err (!%p6384_p8)
}
  0x5f   : > { %s7660_s14 = smov 8   ;;  %s7661_s23 = smov 128  }
  0x60   : > { %5798 = dma.hbm_to_vmem [thread:$0]  (!%p6715_p9), %s6767_s26, 32768, %s6769_s13, %s6773_s18, %s7661_s23, %s7661_s23, %s7660_s14  }
  0x61   : > { %s6579_s1 = smov [#allocation3]   ;;  %s6580_s8 = smov [#allocation14]  }
  0x62   : > { %s232_s5 = sshll.u32 %s6579_s1, 4  ;;  %s256_s30 = sshll.u32 %s6580_s8, 4  ;;  %s233_s5 = int_to_ptr.vmem [resolvable:$true] %s232_s5  ;;  %s257_s30 = int_to_ptr.vmem [resolvable:$true] %s256_s30 }
  0x63   : > { %s6399_s24 = scalar_lea.vmem %s233_s5, 64  ;;  %p7662_p12 = scmp.ne.s32.totalorder %s7652_s15, 0 }
  0x64   : > { %p6400_p10 = scmp.ne.s32.totalorder %s233_s5, %s6399_s24  ;;  %p6407_p6 = scmp.lt.s32.totalorder %s233_s5, %s233_s5 }
  0x65   : > { %p7663_p0 = pneg %p7662_p12  ;;  %p6408_p7 = scmp.lt.s32.totalorder %s6399_s24, %s6399_s24 }
  0x67   : > { %p6402_p4 = pnand %p6400_p10, %p7663_p0  ;;  %p6409_p11 = por %p6408_p7, %p6407_p6 }
  0x69   : > { %p6403_p13 = pneg %p6402_p4 }
  0x6b   : > { %p6410_p1 = pnand %p6409_p11, %p6403_p13 }
  0x6d   : > { %6413 = shalt.err (!%p6410_p1)
}
  0x6e   : > { %s7664_s0 = sld [smem:[#allocation23_spill]]  ;;  %s6425_s13 = scalar_lea.vmem %s257_s30, 16 }
  0x6f   : > { %p6426_p3 = scmp.ne.s32.totalorder %s257_s30, %s6425_s13  ;;  %p7665_p5 = pmov %p7663_p0 }
  0x70   : > { %s6432_s16 = scalar_lea.vmem %s257_s30, 32  ;;  %p6433_p0 = scmp.lt.s32.totalorder %s257_s30, %s257_s30 }
  0x71   : > { %p6428_p8 = pnand %p6426_p3, %p7665_p5  ;;  %p6434_p4 = scmp.lt.s32.totalorder %s6432_s16, %s6425_s13 }
  0x73   : > { %p6429_p10 = pneg %p6428_p8  ;;  %p6435_p6 = por %p6434_p4, %p6433_p0 }
  0x74   : > { %5782 = dma.hbm_to_vmem [thread:$0]  (!%p7662_p12), %s7664_s0, 64, %s233_s5, [#allocation4]  }
  0x75   : > { %p6436_p13 = pnand %p6435_p6, %p6429_p10 }
  0x77   : > { %6439 = shalt.err (!%p6436_p13)
}
  0x78   : > { %5788 = dma.hbm_to_vmem [thread:$0]  (!%p7662_p12), %s7631_s6, 16, %s257_s30, [#allocation13]  }
  0x79   : > { %s6440_s1 = scalar_lea.hbm %s6760_s10, 32768  ;;  %s6445_s24 = scalar_lea.hbm %s7658_s2, 65536 }
  0x7a   : > { %p6441_p7 = scmp.ne.s32.totalorder %s6760_s10, %s6440_s1  ;;  %p6446_p3 = scmp.lt.s32.totalorder %s6760_s10, %s7658_s2 }
  0x7b   : > { %p6447_p5 = scmp.lt.s32.totalorder %s6445_s24, %s6440_s1 }
  0x7c   : > { %p6443_p11 = pnand %p6441_p7, %p6729_p2 }
  0x7d   : > { %p6448_p8 = por %p6447_p5, %p6446_p3 }
  0x7e   : > { %p6444_p1 = pneg %p6443_p11 }
  0x80   : > { %p6449_p10 = pnand %p6448_p8, %p6444_p1 }
  0x82   : > { %6452 = shalt.err (!%p6449_p10)
}
  0x83   : > { %s6453_s15 = scalar_lea.vmem %s6762_s19, 32768  ;;  %s6581_s30 = smov [#allocation8]  }
  0x84   : > { %p6454_p12 = scmp.ne.s32.totalorder %s6762_s19, %s6453_s15  ;;  %s6458_s13 = sshll.u32 %s6581_s30, 4  ;;  %s6459_s13 = int_to_ptr.vmem [resolvable:$false] %s6458_s13 }
  0x85   : > { %s6460_s16 = scalar_lea.vmem %s6459_s13, 65536  ;;  %p6461_p6 = scmp.lt.s32.totalorder %s6762_s19, %s6459_s13 }
  0x86   : > { %p6456_p0 = pnand %p6454_p12, %p6729_p2  ;;  %p6462_p13 = scmp.lt.s32.totalorder %s6460_s16, %s6453_s15 }
  0x88   : > { %p6457_p4 = pneg %p6456_p0  ;;  %p6463_p7 = por %p6462_p13, %p6461_p6 }
  0x8a   : > { %p6464_p11 = pnand %p6463_p7, %p6457_p4 }
  0x8c   : > { %6467 = shalt.err (!%p6464_p11)
}
  0x8d   : > { %s6582_s14 = smov 1024   ;;  %s7666_s23 = smov 64  }
  0x8e   : > { %5795 = dma.hbm_to_vmem [thread:$0]  (!%p6715_p9), %s6760_s10, 32768, %s6762_s19, %s6723_s20, %s6582_s14, %s6582_s14, %s7666_s23  }
  0x8f   : > { %s5752_s1 = smul.u32 28, %s6690_s17  ;;  %s6473_s0 = scalar_lea.hbm %s7629_s4, 896 }
  0x90   : > { %s5753_s5 = smul.u32 448, %s6570_s27 }
  0x91   : > { %s334_s26 = scalar_lea.vmem [#allocation11], %s5752_s1 }
  0x92   : > { %s340_s21 = scalar_lea.hbm %s7629_s4, %s5753_s5  ;;  %s342_s15 = sshll.u32 %s334_s26, 4  ;;  %s343_s15 = int_to_ptr.vmem [resolvable:$true] %s342_s15 }
  0x93   : > { %s6468_s30 = scalar_lea.hbm %s340_s21, 448  ;;  %p6474_p8 = scmp.lt.s32.totalorder %s340_s21, %s7629_s4 }
  0x94   : > { %p6469_p1 = scmp.ne.s32.totalorder %s340_s21, %s6468_s30  ;;  %p6475_p10 = scmp.lt.s32.totalorder %s6473_s0, %s6468_s30 }
  0x96   : > { %p6471_p3 = pnand %p6469_p1, %p6729_p2  ;;  %p6476_p12 = por %p6475_p10, %p6474_p8 }
  0x98   : > { %p6472_p5 = pneg %p6471_p3 }
  0x9a   : > { %p6477_p0 = pnand %p6476_p12, %p6472_p5 }
  0x9c   : > { %6480 = shalt.err (!%p6477_p0)
}
  0x9d   : > { %s6481_s27 = scalar_lea.vmem %s343_s15, 448  ;;  %s6583_s17 = smov [#allocation11]  }
  0x9e   : > { %p6482_p4 = scmp.ne.s32.totalorder %s343_s15, %s6481_s27  ;;  %s6486_s20 = sshll.u32 %s6583_s17, 4  ;;  %s6487_s20 = int_to_ptr.vmem [resolvable:$false] %s6486_s20 }
  0x9f   : > { %s6488_s10 = scalar_lea.vmem %s6487_s20, 896  ;;  %p6489_p7 = scmp.lt.s32.totalorder %s343_s15, %s6487_s20 }
  0xa0   : > { %p6484_p6 = pnand %p6482_p4, %p6729_p2  ;;  %p6490_p11 = scmp.lt.s32.totalorder %s6488_s10, %s6481_s27 }
  0xa2   : > { %p6485_p13 = pneg %p6484_p6  ;;  %p6491_p1 = por %p6490_p11, %p6489_p7 }
  0xa4   : > { %p6492_p3 = pnand %p6491_p1, %p6485_p13 }
  0xa6   : > { %6495 = shalt.err (!%p6492_p3)
}
  0xa7   : > { %5801 = dma.hbm_to_vmem [thread:$0]  (!%p6715_p9), %s340_s21, 448, %s343_s15, %s6773_s18  }
  0xa8   : > { %p7667_p5 = scmp.ne.s32.totalorder %s7651_s12, 0 }
  0xa9   : > { %p7668_p8 = scmp.eq.s32.totalorder (!%p7667_p5), %s6646_s28, 0 }
  0xaa   : > { %351 = sbr.rel (%p7667_p5) target bundleno = 2022 (0x7e6), region = 48 }
  0xaf   : > { %6537 = dma.done.wait (%p7668_p8), [#allocation4], 64   ;;  %p7669_p2 = pmov %p7668_p8 }
  0xb0   : > { %s357_s0 = sand.u32 1, %s6646_s28   ;;  %s359_s2 = sand.u32 1, %s6562_s25  }
  0xb1   : > { %6539 = vsyncadd (%p7669_p2), [#allocation4], 4294967232  ;;  %s5155_s22 = sshll.u32 %s359_s2, 8  ;;  %s358_s14 = scalar_lea.sflag [#allocation7], %s357_s0 }
  0xb2   : > { %s6863_s23 = scalar_lea.vmem [#allocation6], %s5155_s22  ;;  %p7670_p10 = scmp.ne.s32.totalorder %s7650_s11, 0 }
  0xb4   : > { %6541 = dma.done.wait (%p7670_p10), %s358_s14, 36864  }
  0xb5   : > { %6543 = vsyncadd (%p7670_p10), %s358_s14, 4294930432  ;;  %s5156_s9 = sshll.u32 %s359_s2, 11  ;;  %s376_s18 = scalar_lea.sflag [#allocation10], %s357_s0 }
  0xb6   : > { %s6869_s12 = scalar_lea.vmem [#allocation8], %s5156_s9  ;;  %s6871_s1 = scalar_lea.vmem [#allocation9], %s5156_s9 }
  0xb7   : > { %6545 = dma.done.wait (%p7670_p10), %s376_s18, 33216  }
  0xb8   : > { %6547 = vsyncadd (%p7670_p10), %s376_s18, 4294934080  ;;  %s5754_s5 = smul.u32 28, %s359_s2  ;;  %p7671_p9 = pmov %p7669_p2 }
  0xba   : > { %s6877_s8 = scalar_lea.vmem [#allocation11], %s5754_s5 }
  0xbb   : > { %6549 = dma.done.wait (%p7671_p9), [#allocation13], 2064   ;;  %p7672_p12 = pmov %p7669_p2 }
  0xbc   : > { %p7673_p0 = scmp.ne.s32.totalorder %s6646_s28, 0 }
  0xbd   : > { %6551 = vsyncadd (%p7672_p12), [#allocation13], 4294965232 }
  0xbe   : > { %441 = sbr.rel (%p7673_p0) target bundleno = 197 (0xc5), region = 80 }
  0xc3   : > { %v442_v0 = vld [vmem:[#allocation3] sm:$0xf] }
  0xc4   : > { %443 = vst [vmem:[#allocation2] sm:$0xf] %v442_v0 }
  0xc5 PF: > { %v5854_v1 = vld [vmem:[%s6863_s23 + $0x74] ss:$8 sps:$4 sm:$0xff]   ;;  %v5856_v2 = vld [vmem:[%s6863_s23 + $0x70] ss:$8 sps:$4 sm:$0xff]   ;;  %v5857_v3 = vld [vmem:[%s6863_s23 + $0x64] ss:$8 sps:$4 sm:$0xff]   ;;  %v457_v10 = vlaneseq }
  0xc6   : > { %669 = vmatprep.subr.bf16.mxu0 %v5854_v1  ;;  %v5859_v4 = vld [vmem:[%s6863_s23 + $0x60] ss:$8 sps:$4 sm:$0xff]   ;;  %v5860_v5 = vld [vmem:[%s6863_s23 + $0x54] ss:$8 sps:$4 sm:$0xff]   ;;  %v5862_v6 = vld [vmem:[%s6863_s23 + $0x50] ss:$8 sps:$4 sm:$0xff]  }
  0xc7   : > { %670 = vmatpush1.bf16.msra.mxu0 %v5856_v2  ;;  %v5863_v7 = vld [vmem:[%s6863_s23 + $0x44] ss:$8 sps:$4 sm:$0xff]   ;;  %v6584_v8 = vmov 1983009808   ;;  %v5865_v11 = vld [vmem:[%s6863_s23 + $0x40] ss:$8 sps:$4 sm:$0xff]  }
  0xc8   : > { %671 = vmatprep.subr.bf16.mxu0 %v5857_v3  ;;  %v455_v9 = vunpack.c.l.s4 %v6584_v8  ;;  %v5866_v12 = vld [vmem:[%s6863_s23 + $0x34] ss:$8 sps:$4 sm:$0xff]   ;;  %v6894_v14 = vshrl.u32 %v457_v10, 7  ;;  %v5868_v15 = vld [vmem:[%s6863_s23 + $0x30] ss:$8 sps:$4 sm:$0xff]   ;;  %vm733_vm0 = vcmask 1041408  }
  0xc9   : > { %v5869_v16 = vld [vmem:[%s6863_s23 + $0x24] ss:$8 sps:$4 sm:$0xff]   ;;  %v5871_v18 = vld [vmem:[%s6863_s23 + $0x20] ss:$8 sps:$4 sm:$0xff]   ;;  %v5872_v19 = vld [vmem:[%s6863_s23 + $0x14] ss:$8 sps:$4 sm:$0xff]  }
  0xca   : > { %v456_v13 = vunpack.c.0.s8 %v455_v9  ;;  %v5874_v20 = vld [vmem:[%s6863_s23 + $0x10] ss:$8 sps:$4 sm:$0xff]   ;;  %v5875_v22 = vld [vmem:[%s6863_s23 + $0x4] ss:$8 sps:$4 sm:$0xff]   ;;  %v5877_v25 = vld [vmem:[%s6863_s23] ss:$8 sps:$4 sm:$0xff]  }
  0xcb   : > { %672 = vmatpush1.bf16.msra.mxu0 %v5859_v4  ;;  %v444_v21 = vld [vmem:[#allocation2] sm:$0xf]  ;;  %v5878_v26 = vld [vmem:[%s6863_s23 + $0xf4] ss:$8 sps:$4 sm:$0xff]   ;;  %v5881_v29 = vld [vmem:[%s6863_s23 + $0xe4] ss:$8 sps:$4 sm:$0xff]  }
  0xcc   : > { %673 = vmatprep.subr.bf16.mxu0 %v5860_v5  ;;  %v6899_v17 = vsub.s32 %v456_v13, %v6894_v14  ;;  %v5880_v28 = vld [vmem:[%s6863_s23 + $0xf0] ss:$8 sps:$4 sm:$0xff]   ;;  %v5883_v30 = vld [vmem:[%s6863_s23 + $0xe0] ss:$8 sps:$4 sm:$0xff]   ;;  %v5884_v31 = vld [vmem:[%s6863_s23 + $0xd4] ss:$8 sps:$4 sm:$0xff]  }
  0xcd   : > { %v5886_v32 = vld [vmem:[%s6863_s23 + $0xd0] ss:$8 sps:$4 sm:$0xff]   ;;  %v5887_v33 = vld [vmem:[%s6863_s23 + $0xc4] ss:$8 sps:$4 sm:$0xff]   ;;  %v5889_v34 = vld [vmem:[%s6863_s23 + $0xc0] ss:$8 sps:$4 sm:$0xff]  }
  0xce   : > { %v460_v23 = vrot.slane %v444_v21, %v6899_v17  ;;  %v5890_v35 = vld [vmem:[%s6863_s23 + $0xb4] ss:$8 sps:$4 sm:$0xff]   ;;  %v5892_v36 = vld [vmem:[%s6863_s23 + $0xb0] ss:$8 sps:$4 sm:$0xff]   ;;  %v5893_v37 = vld [vmem:[%s6863_s23 + $0xa4] ss:$8 sps:$4 sm:$0xff]  }
  0xcf   : > { %674 = vmatpush1.bf16.msra.mxu0 %v5862_v6  ;;  %v5895_v38 = vld [vmem:[%s6863_s23 + $0xa0] ss:$8 sps:$4 sm:$0xff]   ;;  %v5896_v39 = vld [vmem:[%s6863_s23 + $0x94] ss:$8 sps:$4 sm:$0xff]   ;;  %v5898_v40 = vld [vmem:[%s6863_s23 + $0x90] ss:$8 sps:$4 sm:$0xff]  }
  0xd0   : > { %675 = vmatprep.subr.bf16.mxu0 %v5863_v7  ;;  %v461_v24 = vcombine.high %v460_v23, %v460_v23  ;;  %v5899_v41 = vld [vmem:[%s6863_s23 + $0x84] ss:$8 sps:$4 sm:$0xff]   ;;  %v5901_v42 = vld [vmem:[%s6863_s23 + $0x80] ss:$8 sps:$4 sm:$0xff]   ;;  %v464_v43 = vpack.c.bf16 %v460_v23, %v460_v23  ;;  %v6924_v44 = vsub.s32 0, %v6894_v14  ;;  %v6927_v45 = vsub.s32 1, %v6894_v14 }
  0xd1   : > { %v445_v46 = vld [vmem:[%s6877_s8] sm:$0x3]  ;;  %v945_v1 = vld [vmem:[%s6869_s12 + $0x388] sm:$0xff]  ;;  %p5705_p4 = scmp.ne.s32.totalorder %s6646_s28, 1 }
  0xd2   : > { %v465_v27 = vpack.c.bf16 %v461_v24, %v461_v24  ;;  %v502_v47 = vrot.slane %v445_v46, %v6924_v44  ;;  %v506_v48 = vrot.slane %v445_v46, %v6927_v45  ;;  %v944_v63 = vld [vmem:[%s6869_s12 + $0x380] sm:$0xff]  ;;  %v953_v3 = vld [vmem:[%s6869_s12 + $0x3c8] sm:$0xff] }
  0xd3   : > { %676 = vmatpush1.bf16.msra.mxu0 %v5865_v11  ;;  %v952_v0 = vld [vmem:[%s6869_s12 + $0x3c0] sm:$0xff]  ;;  %v5307_v7 = vcombine.low %v945_v1, %v953_v3  ;;  %v5308_v8 = vcombine.high %v945_v1, %v953_v3  ;;  %v929_v10 = vld [vmem:[%s6869_s12 + $0x308] sm:$0xff] }
  0xd4   : > { %677 = vmatprep.subr.bf16.mxu0 %v5866_v12  ;;  %701 = vmatprep.mubr.bf16.mxu0 %v465_v27  ;;  %v5306_v2 = vcombine.high %v944_v63, %v952_v0  ;;  %v5305_v4 = vcombine.low %v944_v63, %v952_v0  ;;  %v928_v5 = vld [vmem:[%s6869_s12 + $0x300] sm:$0xff]  ;;  %v937_v11 = vld [vmem:[%s6869_s12 + $0x348] sm:$0xff] }
  0xd5   : > { %v936_v6 = vld [vmem:[%s6869_s12 + $0x340] sm:$0xff]  ;;  %v5292_v13 = vcombine.high %v929_v10, %v937_v11 }
  0xd6   : > { %v5290_v9 = vcombine.high %v928_v5, %v936_v6  ;;  %v912_v12 = vld [vmem:[%s6869_s12 + $0x280] sm:$0xff]  ;;  %2450 = vmatprep.subr.bf16.mxu1 %v5306_v2 }
  0xd7   : > { %678 = vmatpush1.bf16.msra.mxu0 %v5868_v15  ;;  %v920_v15 = vld [vmem:[%s6869_s12 + $0x2c0] sm:$0xff]  ;;  %2451 = vmatpush1.bf16.msra.mxu1 %v5305_v4  ;;  %v6585_v4 = vmov 269488144  }
  0xd8   : > { %679 = vmatprep.subr.bf16.mxu0 %v5869_v16  ;;  %v913_v16 = vld [vmem:[%s6869_s12 + $0x288] sm:$0xff]  ;;  %2452 = vmatprep.subr.bf16.mxu1 %v5290_v9  ;;  %v896_v23 = vld [vmem:[%s6869_s12 + $0x200] sm:$0xff]  ;;  %v5273_v27 = vcombine.low %v912_v12, %v920_v15 }
  0xd9   : > { %v904_v24 = vld [vmem:[%s6869_s12 + $0x240] sm:$0xff] }
  0xdb   : > { %680 = vmatpush1.bf16.msra.mxu0 %v5871_v18  ;;  %v921_v18 = vld [vmem:[%s6869_s12 + $0x2c8] sm:$0xff] }
  0xdc   : > { %681 = vmatprep.subr.bf16.mxu0 %v5872_v19  ;;  %v5289_v19 = vcombine.low %v928_v5, %v936_v6  ;;  %v743_v5 = vunpack.c.l.s4 %v6585_v4 }
  0xde   : > { %2453 = vmatpush1.bf16.msra.mxu1 %v5289_v19  ;;  %v744_v6 = vunpack.c.0.s8 %v743_v5 }
  0xdf   : > { %682 = vmatpush1.bf16.msra.mxu0 %v5874_v20  ;;  %v5291_v20 = vcombine.low %v929_v10, %v937_v11 }
  0xe0   : > { %683 = vmatprep.subr.bf16.mxu0 %v5875_v22  ;;  %v5276_v22 = vcombine.high %v913_v16, %v921_v18 }
  0xe3   : > { %684 = vmatpush1.bf16.msra.mxu0 %v5877_v25  ;;  %v897_v25 = vld [vmem:[%s6869_s12 + $0x208] sm:$0xff] }
  0xe4   : > { %685 = vmatprep.subr.bf16.mxu0 %v5878_v26  ;;  %v905_v26 = vld [vmem:[%s6869_s12 + $0x248] sm:$0xff] }
  0xe7   : > { %686 = vmatpush2.bf16.msra.mxu0 %v5880_v28  ;;  %v5275_v28 = vcombine.low %v913_v16, %v921_v18 }
  0xe8   : > { %687 = vmatprep.subr.bf16.mxu0 %v5881_v29  ;;  %v5258_v29 = vcombine.high %v896_v23, %v904_v24 }
  0xeb   : > { %688 = vmatpush2.bf16.msra.mxu0 %v5883_v30  ;;  %v5260_v30 = vcombine.high %v897_v25, %v905_v26 }
  0xec   : > { %689 = vmatprep.subr.bf16.mxu0 %v5884_v31  ;;  %v880_v31 = vld [vmem:[%s6869_s12 + $0x180] sm:$0xff] }
  0xef   : > { %690 = vmatpush2.bf16.msra.mxu0 %v5886_v32  ;;  %v888_v32 = vld [vmem:[%s6869_s12 + $0x1c0] sm:$0xff] }
  0xf0   : > { %691 = vmatprep.subr.bf16.mxu0 %v5887_v33  ;;  %v881_v33 = vld [vmem:[%s6869_s12 + $0x188] sm:$0xff] }
  0xf3   : > { %692 = vmatpush2.bf16.msra.mxu0 %v5889_v34  ;;  %v889_v34 = vld [vmem:[%s6869_s12 + $0x1c8] sm:$0xff] }
  0xf4   : > { %693 = vmatprep.subr.bf16.mxu0 %v5890_v35  ;;  %v5257_v35 = vcombine.low %v896_v23, %v904_v24  ;;  %v5243_v46 = vcombine.low %v881_v33, %v889_v34  ;;  %v1081_v23 = vld [vmem:[%s6869_s12 + $0x7c8] sm:$0xff] }
  0xf7   : > { %694 = vmatpush2.bf16.msra.mxu0 %v5892_v36  ;;  %v5259_v36 = vcombine.low %v897_v25, %v905_v26 }
  0xf8   : > { %695 = vmatprep.subr.bf16.mxu0 %v5893_v37  ;;  %v5242_v37 = vcombine.high %v880_v31, %v888_v32 }
  0xfb   : > { %696 = vmatpush2.bf16.msra.mxu0 %v5895_v38  ;;  %v5244_v38 = vcombine.high %v881_v33, %v889_v34 }
  0xfc   : > { %697 = vmatprep.subr.bf16.mxu0 %v5896_v39  ;;  %v864_v39 = vld [vmem:[%s6869_s12 + $0x100] sm:$0xff] }
  0xff   : > { %698 = vmatpush2.bf16.msra.mxu0 %v5898_v40  ;;  %v872_v40 = vld [vmem:[%s6869_s12 + $0x140] sm:$0xff] }
 0x100   : > { %699 = vmatprep.subr.bf16.mxu0 %v5899_v41  ;;  %v865_v41 = vld [vmem:[%s6869_s12 + $0x108] sm:$0xff] }
 0x103   : > { %700 = vmatpush2.bf16.msra.mxu0 %v5901_v42  ;;  %v873_v42 = vld [vmem:[%s6869_s12 + $0x148] sm:$0xff] }
 0x104   : > { %2491 = vmatprep.subr.bf16.mxu0 %v5308_v8 }
 0x106   : > { %702 = vmatmul.mubr.bf16.vlgmr.msra.gmra.mxu0 %v464_v43  ;;  %v5241_v43 = vcombine.low %v880_v31, %v888_v32  ;;  %v1065_v31 = vld [vmem:[%s6869_s12 + $0x748] sm:$0xff] }
 0x107   : > { %2492 = vmatpush1.bf16.msra.mxu0 %v5307_v7  ;;  %v6972_v7 = vsub.s32 %v744_v6, %v6894_v14  ;;  %v976_v6 = vld [vmem:[%s6869_s12 + $0x480] sm:$0xff] }
 0x108   : > { %2493 = vmatprep.subr.bf16.mxu0 %v5292_v13 }
 0x10b   : > { %2494 = vmatpush1.bf16.msra.mxu0 %v5291_v20  ;;  %v1072_v20 = vld [vmem:[%s6869_s12 + $0x780] sm:$0xff] }
 0x10c   : > { %2495 = vmatprep.subr.bf16.mxu0 %v5276_v22 }
 0x10f   : > { %2496 = vmatpush1.bf16.msra.mxu0 %v5275_v28  ;;  %v1064_v28 = vld [vmem:[%s6869_s12 + $0x740] sm:$0xff] }
 0x110   : > { %2497 = vmatprep.subr.bf16.mxu0 %v5260_v30 }
 0x113   : > { %2498 = vmatpush1.bf16.msra.mxu0 %v5259_v36  ;;  %v1048_v36 = vld [vmem:[%s6869_s12 + $0x6c0] sm:$0xff] }
 0x114   : > { %2499 = vmatprep.subr.bf16.mxu0 %v5244_v38 }
 0x117   : > { %2500 = vmatpush1.bf16.msra.mxu0 %v5243_v46  ;;  %v1032_v46 = vld [vmem:[%s6869_s12 + $0x640] sm:$0xff] }
 0x1c6   : > { %v703_v49 = vpop.f32.mrf.mxu0 }
 0x1c7   : > { %v704_v51 = vadd.f32 %v703_v49, %v502_v47  ;;  %v5226_v47 = vcombine.high %v864_v39, %v872_v40  ;;  %v848_v49 = vld [vmem:[%s6869_s12 + $0x80] sm:$0xff] }
 0x1c8   : > { %v705_v50 = vpop.f32.mrf.mxu0 }
 0x1c9   : > { %v706_v52 = vadd.f32 %v705_v50, %v506_v48  ;;  %v5228_v48 = vcombine.high %v865_v41, %v873_v42  ;;  %v856_v50 = vld [vmem:[%s6869_s12 + $0xc0] sm:$0xff] }
 0x1ca   : > { %v707_v53 = vpop.f32.mrf.mxu0 }
 0x1cb   : > { %v712_v54 = vcombine.low %v704_v51, %v706_v52  ;;  %v849_v51 = vld [vmem:[%s6869_s12 + $0x88] sm:$0xff]  ;;  %v5225_v53 = vcombine.low %v864_v39, %v872_v40  ;;  %2501 = vmatprep.subr.bf16.mxu0 %v5228_v48 }
 0x1cc   : > { %v708_v55 = vpop.f32.mrf.mxu0  ;;  %v857_v52 = vld [vmem:[%s6869_s12 + $0xc8] sm:$0xff] }
 0x1cd   : > { %v719_v56 = vrot.slane %v712_v54, %v6899_v17  ;;  %v5227_v54 = vcombine.low %v865_v41, %v873_v42  ;;  %v5210_v55 = vcombine.high %v848_v49, %v856_v50  ;;  %v5211_v63 = vcombine.low %v849_v51, %v857_v52  ;;  %v1049_v39 = vld [vmem:[%s6869_s12 + $0x6c8] sm:$0xff] }
 0x1cf   : > { %v6933_v57 = vadd.f32 %v719_v56, %v444_v21  ;;  %v5274_v21 = vcombine.high %v912_v12, %v920_v15  ;;  %v5212_v56 = vcombine.high %v849_v51, %v857_v52  ;;  %2502 = vmatpush1.bf16.msra.mxu0 %v5227_v54  ;;  %v1016_v54 = vld [vmem:[%s6869_s12 + $0x5c0] sm:$0xff] }
 0x1d1   : > { %v729_v58 = vrot.slane %v6933_v57, %v6899_v17  ;;  %2454 = vmatprep.subr.bf16.mxu1 %v5274_v21  ;;  %2503 = vmatprep.subr.bf16.mxu0 %v5212_v56  ;;  %v1080_v21 = vld [vmem:[%s6869_s12 + $0x7c0] sm:$0xff] }
 0x1d2   : > { %2455 = vmatpush1.bf16.msra.mxu1 %v5273_v27  ;;  %v5434_v22 = vcombine.high %v1072_v20, %v1080_v21  ;;  %v5433_v26 = vcombine.low %v1072_v20, %v1080_v21  ;;  %v1056_v27 = vld [vmem:[%s6869_s12 + $0x700] sm:$0xff]  ;;  %v961_v20 = vld [vmem:[%s6869_s12 + $0x408] sm:$0xff] }
 0x1d3   : > { %v730_v59 = vcombine.high %v729_v58, %v729_v58  ;;  %v734_v60 = vsel %vm733_vm0, %v729_v58, 0.0  ;;  %2456 = vmatprep.subr.bf16.mxu1 %v5258_v29  ;;  %v832_v58 = vld [vmem:[%s6869_s12] sm:$0xff]  ;;  %2504 = vmatpush1.bf16.msra.mxu0 %v5211_v63  ;;  %v1057_v29 = vld [vmem:[%s6869_s12 + $0x708] sm:$0xff]  ;;  %v5418_v30 = vcombine.high %v1056_v27, %v1064_v28  ;;  %v5417_v34 = vcombine.low %v1056_v27, %v1064_v28  ;;  %v947_v27 = vld [vmem:[%s6869_s12 + $0x398] sm:$0xff] }
 0x1d4   : > { %v5419_v32 = vcombine.low %v1057_v29, %v1065_v31  ;;  %v5420_v33 = vcombine.high %v1057_v29, %v1065_v31  ;;  %v1000_v63 = vld [vmem:[%s6869_s12 + $0x540] sm:$0xff]  ;;  %v955_v29 = vld [vmem:[%s6869_s12 + $0x3d8] sm:$0xff] }
 0x1d5   : > { %v735_v61 = vsel %vm733_vm0, %v730_v59, 0.0  ;;  %v840_v59 = vld [vmem:[%s6869_s12 + $0x40] sm:$0xff]  ;;  %v5311_v31 = vcombine.low %v947_v27, %v955_v29 }
 0x1d6   : > { %v736_v62 = vadd.f32 %v735_v61, %v734_v60  ;;  %2457 = vmatpush1.bf16.msra.mxu1 %v5257_v35  ;;  %v833_v60 = vld [vmem:[%s6869_s12 + $0x8] sm:$0xff]  ;;  %v5194_v0 = vcombine.high %v832_v58, %v840_v59  ;;  %v5193_v2 = vcombine.low %v832_v58, %v840_v59  ;;  %v1040_v35 = vld [vmem:[%s6869_s12 + $0x680] sm:$0xff] }
 0x1d7   : > { %2458 = vmatprep.subr.bf16.mxu1 %v5242_v37  ;;  %v841_v61 = vld [vmem:[%s6869_s12 + $0x48] sm:$0xff]  ;;  %v5402_v38 = vcombine.high %v1040_v35, %v1048_v36  ;;  %v5401_v42 = vcombine.low %v1040_v35, %v1048_v36  ;;  %v446_v36 = vld [vmem:[%s6877_s8 + $0x2] sm:$0x3] }
 0x1d8   : > { %737 = vadd.xlane.f32.xlu0 %v736_v62  ;;  %v5209_v62 = vcombine.low %v848_v49, %v856_v50  ;;  %v5196_v1 = vcombine.high %v833_v60, %v841_v61  ;;  %v5195_v3 = vcombine.low %v833_v60, %v841_v61  ;;  %v1041_v37 = vld [vmem:[%s6869_s12 + $0x688] sm:$0xff] }
 0x1d9   : > { %v5403_v40 = vcombine.low %v1041_v37, %v1049_v39  ;;  %v5404_v41 = vcombine.high %v1041_v37, %v1049_v39  ;;  %v1033_v49 = vld [vmem:[%s6869_s12 + $0x648] sm:$0xff]  ;;  %v447_v37 = vld [vmem:[%s6877_s8 + $0x4] sm:$0x3]  ;;  %v789_v39 = vrot.slane %v446_v36, %v6927_v45 }
 0x1da   : > { %2459 = vmatpush1.bf16.msra.mxu1 %v5241_v43  ;;  %2505 = vmatprep.subr.bf16.mxu0 %v5196_v1  ;;  %v1024_v43 = vld [vmem:[%s6869_s12 + $0x600] sm:$0xff]  ;;  %v1017_v58 = vld [vmem:[%s6869_s12 + $0x5c8] sm:$0xff] }
 0x1db   : > { %2460 = vmatprep.subr.bf16.mxu1 %v5226_v47  ;;  %2506 = vmatpush1.bf16.msra.mxu0 %v5195_v3  ;;  %v1025_v47 = vld [vmem:[%s6869_s12 + $0x608] sm:$0xff]  ;;  %v5386_v48 = vcombine.high %v1024_v43, %v1032_v46  ;;  %v5385_v52 = vcombine.low %v1024_v43, %v1032_v46 }
 0x1dc   : > { %v5387_v50 = vcombine.low %v1025_v47, %v1033_v49  ;;  %v5388_v51 = vcombine.high %v1025_v47, %v1033_v49 }
 0x1de   : > { %2461 = vmatpush1.bf16.msra.mxu1 %v5225_v53  ;;  %v1008_v53 = vld [vmem:[%s6869_s12 + $0x580] sm:$0xff] }
 0x1df   : > { %2462 = vmatprep.subr.bf16.mxu1 %v5210_v55  ;;  %v1009_v55 = vld [vmem:[%s6869_s12 + $0x588] sm:$0xff]  ;;  %v5370_v56 = vcombine.high %v1008_v53, %v1016_v54  ;;  %v5369_v61 = vcombine.low %v1008_v53, %v1016_v54 }
 0x1e0   : > { %v5371_v59 = vcombine.low %v1009_v55, %v1017_v58  ;;  %v5372_v60 = vcombine.high %v1009_v55, %v1017_v58  ;;  %v930_v55 = vld [vmem:[%s6869_s12 + $0x310] sm:$0xff]  ;;  %v931_v58 = vld [vmem:[%s6869_s12 + $0x318] sm:$0xff] }
 0x1e2   : > { %2463 = vmatpush1.bf16.msra.mxu1 %v5209_v62  ;;  %v992_v62 = vld [vmem:[%s6869_s12 + $0x500] sm:$0xff] }
 0x1e3   : > { %2464 = vmatprep.subr.bf16.mxu1 %v5194_v0  ;;  %v993_v0 = vld [vmem:[%s6869_s12 + $0x508] sm:$0xff]  ;;  %v5354_v1 = vcombine.high %v992_v62, %v1000_v63  ;;  %v5353_v5 = vcombine.low %v992_v62, %v1000_v63  ;;  %v914_v62 = vld [vmem:[%s6869_s12 + $0x290] sm:$0xff] }
 0x1e6   : > { %2465 = vmatpush1.bf16.msra.mxu1 %v5193_v2  ;;  %v1001_v2 = vld [vmem:[%s6869_s12 + $0x548] sm:$0xff] }
 0x1e7   : > { %2466 = vmatprep.subr.bf16.mxu1 %v5434_v22  ;;  %v5355_v3 = vcombine.low %v993_v0, %v1001_v2  ;;  %v5356_v4 = vcombine.high %v993_v0, %v1001_v2  ;;  %v922_v0 = vld [vmem:[%s6869_s12 + $0x2d0] sm:$0xff]  ;;  %v923_v2 = vld [vmem:[%s6869_s12 + $0x2d8] sm:$0xff] }
 0x1ea   : > { %2467 = vmatpush2.bf16.msra.mxu1 %v5433_v26  ;;  %v954_v26 = vld [vmem:[%s6869_s12 + $0x3d0] sm:$0xff] }
 0x1eb   : > { %2468 = vmatprep.subr.bf16.mxu1 %v5418_v30 }
 0x1ee   : > { %2469 = vmatpush2.bf16.msra.mxu1 %v5417_v34 }
 0x1ef   : > { %2470 = vmatprep.subr.bf16.mxu1 %v5402_v38  ;;  %v785_v38 = vrot.slane %v446_v36, %v6924_v44  ;;  %v851_v36 = vld [vmem:[%s6869_s12 + $0x98] sm:$0xff] }
 0x1f2   : > { %2471 = vmatpush2.bf16.msra.mxu1 %v5401_v42  ;;  %v790_v42 = vcombine.low %v785_v38, %v789_v39 }
 0x1f3   : > { %2472 = vmatprep.subr.bf16.mxu1 %v5386_v48 }
 0x1f4   : > { %v797_v47 = vrot.slane %v790_v42, %v6899_v17  ;;  %v834_v42 = vld [vmem:[%s6869_s12 + $0x10] sm:$0xff] }
 0x1f6   : > { %2473 = vmatpush2.bf16.msra.mxu1 %v5385_v52 }
 0x1f7   : > { %2474 = vmatprep.subr.bf16.mxu1 %v5370_v56  ;;  %v938_v56 = vld [vmem:[%s6869_s12 + $0x350] sm:$0xff] }
 0x1fa   : > { %2475 = vmatpush2.bf16.msra.mxu1 %v5369_v61 }
 0x1fb   : > { %2476 = vmatprep.subr.bf16.mxu1 %v5354_v1  ;;  %v915_v1 = vld [vmem:[%s6869_s12 + $0x298] sm:$0xff] }
 0x1fe   : > { %2477 = vmatpush2.bf16.msra.mxu1 %v5353_v5  ;;  %v5278_v5 = vcombine.high %v914_v62, %v922_v0 }
 0x261   : > { %v738_v8 = vpop.xlane.xlu0 %737 }
 0x262   : > { %v740_v9 = vmul.f32 0.00390625, %v738_v8  ;;  %v984_v8 = vld [vmem:[%s6869_s12 + $0x4c0] sm:$0xff] }
 0x264   : > { %v748_v10 = vrot.slane %v740_v9, %v6972_v7  ;;  %v977_v9 = vld [vmem:[%s6869_s12 + $0x488] sm:$0xff] }
 0x266   : > { %v6976_v11 = vsub.f32 %v6933_v57, %v748_v10  ;;  %v1073_v57 = vld [vmem:[%s6869_s12 + $0x788] sm:$0xff]  ;;  %v5338_v10 = vcombine.high %v976_v6, %v984_v8 }
 0x267   : > { %v5435_v24 = vcombine.low %v1073_v57, %v1081_v23  ;;  %v5436_v25 = vcombine.high %v1073_v57, %v1081_v23  ;;  %v969_v57 = vld [vmem:[%s6869_s12 + $0x448] sm:$0xff] }
 0x268   : > { %v751_v12 = vmul.f32 %v6976_v11, %v6976_v11  ;;  %2478 = vmatprep.subr.bf16.mxu1 %v5338_v10  ;;  %v5323_v22 = vcombine.low %v961_v20, %v969_v57  ;;  %v5324_v23 = vcombine.high %v961_v20, %v969_v57  ;;  %v899_v10 = vld [vmem:[%s6869_s12 + $0x218] sm:$0xff]  ;;  %v890_v20 = vld [vmem:[%s6869_s12 + $0x1d0] sm:$0xff] }
 0x269   : > { %2507 = vmatprep.subr.bf16.mxu0 %v5436_v25  ;;  %v946_v25 = vld [vmem:[%s6869_s12 + $0x390] sm:$0xff]  ;;  %v891_v57 = vld [vmem:[%s6869_s12 + $0x1d8] sm:$0xff] }
 0x26a   : > { %v759_v13 = vrot.slane %v751_v12, %v6899_v17  ;;  %2508 = vmatpush2.bf16.msra.mxu0 %v5435_v24  ;;  %v985_v12 = vld [vmem:[%s6869_s12 + $0x4c8] sm:$0xff]  ;;  %v5310_v28 = vcombine.high %v946_v25, %v954_v26  ;;  %v5309_v30 = vcombine.low %v946_v25, %v954_v26  ;;  %v866_v26 = vld [vmem:[%s6869_s12 + $0x110] sm:$0xff] }
 0x26b   : > { %2509 = vmatprep.subr.bf16.mxu0 %v5420_v33 }
 0x26c   : > { %v760_v15 = vcombine.high %v759_v13, %v759_v13  ;;  %v763_v16 = vsel %vm733_vm0, %v759_v13, 0.0  ;;  %v5339_v13 = vcombine.low %v977_v9, %v985_v12 }
 0x26e   : > { %v764_v18 = vsel %vm733_vm0, %v760_v15, 0.0  ;;  %2510 = vmatpush2.bf16.msra.mxu0 %v5419_v32  ;;  %v5340_v15 = vcombine.high %v977_v9, %v985_v12  ;;  %v5312_v32 = vcombine.high %v947_v27, %v955_v29  ;;  %v906_v9 = vld [vmem:[%s6869_s12 + $0x250] sm:$0xff]  ;;  %v907_v12 = vld [vmem:[%s6869_s12 + $0x258] sm:$0xff] }
 0x26f   : > { %v765_v19 = vadd.f32 %v764_v18, %v763_v16  ;;  %2511 = vmatprep.subr.bf16.mxu0 %v5404_v41  ;;  %v5337_v16 = vcombine.low %v976_v6, %v984_v8  ;;  %v960_v18 = vld [vmem:[%s6869_s12 + $0x400] sm:$0xff]  ;;  %v808_v41 = vrot.slane %v447_v37, %v6927_v45  ;;  %v5280_v6 = vcombine.high %v915_v1, %v923_v2  ;;  %v898_v8 = vld [vmem:[%s6869_s12 + $0x210] sm:$0xff]  ;;  %v875_v29 = vld [vmem:[%s6869_s12 + $0x158] sm:$0xff] }
 0x270   : > { %v874_v27 = vld [vmem:[%s6869_s12 + $0x150] sm:$0xff] }
 0x271   : > { %766 = vadd.xlane.f32.xlu0 %v765_v19  ;;  %2479 = vmatpush2.bf16.msra.mxu1 %v5337_v16  ;;  %v968_v19 = vld [vmem:[%s6869_s12 + $0x440] sm:$0xff]  ;;  %v5262_v16 = vcombine.high %v898_v8, %v906_v9  ;;  %v5229_v38 = vcombine.low %v866_v26, %v874_v27 }
 0x272   : > { %2512 = vmatpush2.bf16.msra.mxu0 %v5403_v40  ;;  %v5322_v21 = vcombine.high %v960_v18, %v968_v19  ;;  %v5321_v24 = vcombine.low %v960_v18, %v968_v19  ;;  %v804_v40 = vrot.slane %v447_v37, %v6924_v44  ;;  %v5264_v18 = vcombine.high %v899_v10, %v907_v12  ;;  %v882_v19 = vld [vmem:[%s6869_s12 + $0x190] sm:$0xff]  ;;  %v859_v37 = vld [vmem:[%s6869_s12 + $0xd8] sm:$0xff] }
 0x273   : > { %2513 = vmatprep.subr.bf16.mxu0 %v5388_v51 }
 0x274   : > { %2480 = vmatprep.subr.bf16.mxu1 %v5322_v21  ;;  %v809_v43 = vcombine.low %v804_v40, %v808_v41  ;;  %v883_v21 = vld [vmem:[%s6869_s12 + $0x198] sm:$0xff]  ;;  %v5216_v41 = vcombine.high %v851_v36, %v859_v37 }
 0x275   : > { %2481 = vmatpush2.bf16.msra.mxu1 %v5321_v24  ;;  %v5246_v24 = vcombine.high %v882_v19, %v890_v20  ;;  %v5248_v25 = vcombine.high %v883_v21, %v891_v57 }
 0x276   : > { %2514 = vmatpush2.bf16.msra.mxu0 %v5387_v50  ;;  %2532 = vmatprep.subr.bf16.mxu1 %v5310_v28  ;;  %v816_v49 = vrot.slane %v809_v43, %v6899_v17  ;;  %v867_v28 = vld [vmem:[%s6869_s12 + $0x118] sm:$0xff]  ;;  %v842_v43 = vld [vmem:[%s6869_s12 + $0x50] sm:$0xff] }
 0x277   : > { %2515 = vmatprep.subr.bf16.mxu0 %v5372_v60  ;;  %v5231_v39 = vcombine.low %v867_v28, %v875_v29 }
 0x27a   : > { %2516 = vmatpush2.bf16.msra.mxu0 %v5371_v59  ;;  %v939_v59 = vld [vmem:[%s6869_s12 + $0x358] sm:$0xff] }
 0x27b   : > { %2517 = vmatprep.subr.bf16.mxu0 %v5356_v4  ;;  %v5296_v63 = vcombine.high %v931_v58, %v939_v59  ;;  %v5295_v4 = vcombine.low %v931_v58, %v939_v59  ;;  %v5197_v58 = vcombine.low %v834_v42, %v842_v43 }
 0x27e   : > { %2518 = vmatpush2.bf16.msra.mxu0 %v5355_v3  ;;  %v5293_v3 = vcombine.low %v930_v55, %v938_v56 }
 0x27f   : > { %2519 = vmatprep.subr.bf16.mxu0 %v5340_v15  ;;  %v5279_v15 = vcombine.low %v915_v1, %v923_v2  ;;  %v1059_v1 = vld [vmem:[%s6869_s12 + $0x718] sm:$0xff] }
 0x280   : > { %v1067_v2 = vld [vmem:[%s6869_s12 + $0x758] sm:$0xff] }
 0x282   : > { %2520 = vmatpush2.bf16.msra.mxu0 %v5339_v13  ;;  %v5277_v13 = vcombine.low %v914_v62, %v922_v0  ;;  %v1066_v0 = vld [vmem:[%s6869_s12 + $0x750] sm:$0xff] }
 0x283   : > { %2521 = vmatprep.subr.bf16.mxu0 %v5324_v23  ;;  %v5263_v23 = vcombine.low %v899_v10, %v907_v12  ;;  %v1043_v10 = vld [vmem:[%s6869_s12 + $0x698] sm:$0xff] }
 0x284   : > { %v1051_v12 = vld [vmem:[%s6869_s12 + $0x6d8] sm:$0xff] }
 0x286   : > { %2522 = vmatpush2.bf16.msra.mxu0 %v5323_v22  ;;  %v5261_v22 = vcombine.low %v898_v8, %v906_v9  ;;  %v1042_v8 = vld [vmem:[%s6869_s12 + $0x690] sm:$0xff] }
 0x287   : > { %2573 = vmatprep.subr.bf16.mxu0 %v5312_v32  ;;  %v5230_v32 = vcombine.high %v866_v26, %v874_v27  ;;  %v1050_v9 = vld [vmem:[%s6869_s12 + $0x6d0] sm:$0xff] }
 0x288   : > { %v1010_v26 = vld [vmem:[%s6869_s12 + $0x590] sm:$0xff] }
 0x289   : > { %v1018_v27 = vld [vmem:[%s6869_s12 + $0x5d0] sm:$0xff] }
 0x2fa   : > { %v767_v33 = vpop.xlane.xlu0 %766 }
 0x2fb   : > { %v768_v34 = vmul.f32 0.00390625, %v767_v33  ;;  %v5232_v33 = vcombine.high %v867_v28, %v875_v29  ;;  %v1011_v28 = vld [vmem:[%s6869_s12 + $0x598] sm:$0xff] }
 0x2fc   : > { %v1019_v29 = vld [vmem:[%s6869_s12 + $0x5d8] sm:$0xff] }
 0x2fd   : > { %v769_v35 = vadd.f32 1e-05, %v768_v34  ;;  %v850_v34 = vld [vmem:[%s6869_s12 + $0x90] sm:$0xff] }
 0x2ff   : > { %6286 = vrsqrt.f32 %v769_v35  ;;  %v858_v35 = vld [vmem:[%s6869_s12 + $0xd0] sm:$0xff] }
 0x300   : > { %v5214_v40 = vcombine.high %v850_v34, %v858_v35 }
 0x30c   : > { %v6287_v46 = vpop.eup %6286 }
 0x30d   : > { %v778_v48 = vrot.slane %v6287_v46, %v6972_v7  ;;  %v835_v46 = vld [vmem:[%s6869_s12 + $0x18] sm:$0xff] }
 0x30f   : > { %v780_v50 = vmul.f32 %v778_v48, %v6976_v11  ;;  %v5294_v11 = vcombine.high %v930_v55, %v938_v56  ;;  %v5213_v48 = vcombine.low %v850_v34, %v858_v35  ;;  %v1075_v55 = vld [vmem:[%s6869_s12 + $0x798] sm:$0xff]  ;;  %v994_v34 = vld [vmem:[%s6869_s12 + $0x510] sm:$0xff] }
 0x310   : > { %v1083_v56 = vld [vmem:[%s6869_s12 + $0x7d8] sm:$0xff]  ;;  %v1002_v35 = vld [vmem:[%s6869_s12 + $0x550] sm:$0xff] }
 0x311   : > { %v799_v51 = vmul.f32 %v797_v47, %v780_v50  ;;  %v843_v47 = vld [vmem:[%s6869_s12 + $0x58] sm:$0xff]  ;;  %v5198_v50 = vcombine.high %v834_v42, %v842_v43  ;;  %v978_v42 = vld [vmem:[%s6869_s12 + $0x490] sm:$0xff] }
 0x312   : > { %v5199_v59 = vcombine.low %v835_v46, %v843_v47  ;;  %v986_v43 = vld [vmem:[%s6869_s12 + $0x4d0] sm:$0xff] }
 0x313   : > { %v7029_v52 = vadd.f32 %v816_v49, %v799_v51  ;;  %v5215_v49 = vcombine.low %v851_v36, %v859_v37  ;;  %v5200_v51 = vcombine.high %v835_v46, %v843_v47  ;;  %v995_v36 = vld [vmem:[%s6869_s12 + $0x518] sm:$0xff] }
 0x314   : > { %v1003_v37 = vld [vmem:[%s6869_s12 + $0x558] sm:$0xff] }
 0x315   : > { %v826_v53 = vrot.slane %v7029_v52, %v6899_v17  ;;  %v979_v46 = vld [vmem:[%s6869_s12 + $0x498] sm:$0xff] }
 0x316   : > { %v987_v47 = vld [vmem:[%s6869_s12 + $0x4d8] sm:$0xff] }
 0x317   : > { %v827_v54 = vcombine.high %v826_v53, %v826_v53  ;;  %v7039_v61 = vpack.c.bf16 %v826_v53, %v826_v53  ;;  %v1074_v53 = vld [vmem:[%s6869_s12 + $0x790] sm:$0xff] }
 0x319   : > { %v7037_v60 = vpack.c.bf16 %v827_v54, %v827_v54  ;;  %v1082_v54 = vld [vmem:[%s6869_s12 + $0x7d0] sm:$0xff] }
 0x31a   : > { %v5438_v62 = vcombine.high %v1074_v53, %v1082_v54 }
 0x31b   : > { %2482 = vmatprep.mubr.bf16.mxu1 %v7037_v60  ;;  %2523 = vmatprep.mubr.bf16.mxu0 %v7037_v60 }
 0x31c   : > { %2483 = vmatmul.mubr.bf16.vlgmr.msra.gmra.mxu1 %v7039_v61  ;;  %2524 = vmatmul.mubr.bf16.vlgmr.msra.gmra.mxu0 %v7039_v61 }
 0x31d   : > { %2533 = vmatpush1.bf16.msra.mxu1 %v5309_v30  ;;  %2574 = vmatpush1.bf16.msra.mxu0 %v5311_v31  ;;  %v5245_v30 = vcombine.low %v882_v19, %v890_v20  ;;  %v5247_v31 = vcombine.low %v883_v21, %v891_v57  ;;  %v1026_v19 = vld [vmem:[%s6869_s12 + $0x610] sm:$0xff]  ;;  %v1027_v21 = vld [vmem:[%s6869_s12 + $0x618] sm:$0xff] }
 0x31e   : > { %2564 = vmatprep.mubr.bf16.mxu1 %v7037_v60  ;;  %2605 = vmatprep.mubr.bf16.mxu0 %v7037_v60  ;;  %v1034_v20 = vld [vmem:[%s6869_s12 + $0x650] sm:$0xff]  ;;  %v1035_v57 = vld [vmem:[%s6869_s12 + $0x658] sm:$0xff] }
 0x31f   : > { %2534 = vmatprep.subr.bf16.mxu1 %v5294_v11  ;;  %2575 = vmatprep.subr.bf16.mxu0 %v5296_v63  ;;  %v5440_v11 = vcombine.high %v1075_v55, %v1083_v56  ;;  %v1058_v63 = vld [vmem:[%s6869_s12 + $0x710] sm:$0xff] }
 0x321   : > { %2535 = vmatpush1.bf16.msra.mxu1 %v5293_v3  ;;  %2576 = vmatpush1.bf16.msra.mxu0 %v5295_v4  ;;  %v5437_v3 = vcombine.low %v1074_v53, %v1082_v54  ;;  %v5439_v4 = vcombine.low %v1075_v55, %v1083_v56  ;;  %v962_v53 = vld [vmem:[%s6869_s12 + $0x410] sm:$0xff]  ;;  %v963_v55 = vld [vmem:[%s6869_s12 + $0x418] sm:$0xff] }
 0x322   : > { %2536 = vmatprep.subr.bf16.mxu1 %v5278_v5  ;;  %2577 = vmatprep.subr.bf16.mxu0 %v5280_v6  ;;  %v5422_v5 = vcombine.high %v1058_v63, %v1066_v0  ;;  %v5424_v6 = vcombine.high %v1059_v1, %v1067_v2  ;;  %v970_v54 = vld [vmem:[%s6869_s12 + $0x450] sm:$0xff]  ;;  %v971_v56 = vld [vmem:[%s6869_s12 + $0x458] sm:$0xff] }
 0x325   : > { %2537 = vmatpush1.bf16.msra.mxu1 %v5277_v13  ;;  %2578 = vmatpush1.bf16.msra.mxu0 %v5279_v15  ;;  %v5421_v13 = vcombine.low %v1058_v63, %v1066_v0  ;;  %v5423_v15 = vcombine.low %v1059_v1, %v1067_v2  ;;  %v948_v63 = vld [vmem:[%s6869_s12 + $0x3a0] sm:$0xff]  ;;  %v949_v1 = vld [vmem:[%s6869_s12 + $0x3a8] sm:$0xff] }
 0x326   : > { %2538 = vmatprep.subr.bf16.mxu1 %v5262_v16  ;;  %2579 = vmatprep.subr.bf16.mxu0 %v5264_v18  ;;  %v5406_v16 = vcombine.high %v1042_v8, %v1050_v9  ;;  %v5408_v18 = vcombine.high %v1043_v10, %v1051_v12  ;;  %v956_v0 = vld [vmem:[%s6869_s12 + $0x3e0] sm:$0xff]  ;;  %v957_v2 = vld [vmem:[%s6869_s12 + $0x3e8] sm:$0xff] }
 0x329   : > { %2539 = vmatpush1.bf16.msra.mxu1 %v5261_v22  ;;  %2580 = vmatpush1.bf16.msra.mxu0 %v5263_v23  ;;  %v5405_v22 = vcombine.low %v1042_v8, %v1050_v9  ;;  %v5407_v23 = vcombine.low %v1043_v10, %v1051_v12  ;;  %v932_v8 = vld [vmem:[%s6869_s12 + $0x320] sm:$0xff]  ;;  %v933_v10 = vld [vmem:[%s6869_s12 + $0x328] sm:$0xff] }
 0x32a   : > { %2540 = vmatprep.subr.bf16.mxu1 %v5246_v24  ;;  %2581 = vmatprep.subr.bf16.mxu0 %v5248_v25  ;;  %v5390_v24 = vcombine.high %v1026_v19, %v1034_v20  ;;  %v5392_v25 = vcombine.high %v1027_v21, %v1035_v57  ;;  %v940_v9 = vld [vmem:[%s6869_s12 + $0x360] sm:$0xff]  ;;  %v941_v12 = vld [vmem:[%s6869_s12 + $0x368] sm:$0xff] }
 0x32d   : > { %2541 = vmatpush1.bf16.msra.mxu1 %v5245_v30  ;;  %2582 = vmatpush1.bf16.msra.mxu0 %v5247_v31  ;;  %v5389_v30 = vcombine.low %v1026_v19, %v1034_v20  ;;  %v5391_v31 = vcombine.low %v1027_v21, %v1035_v57  ;;  %v916_v19 = vld [vmem:[%s6869_s12 + $0x2a0] sm:$0xff]  ;;  %v917_v21 = vld [vmem:[%s6869_s12 + $0x2a8] sm:$0xff] }
 0x32e   : > { %2542 = vmatprep.subr.bf16.mxu1 %v5230_v32  ;;  %2583 = vmatprep.subr.bf16.mxu0 %v5232_v33  ;;  %v5374_v32 = vcombine.high %v1010_v26, %v1018_v27  ;;  %v5376_v33 = vcombine.high %v1011_v28, %v1019_v29  ;;  %v924_v20 = vld [vmem:[%s6869_s12 + $0x2e0] sm:$0xff]  ;;  %v925_v57 = vld [vmem:[%s6869_s12 + $0x2e8] sm:$0xff] }
 0x331   : > { %2543 = vmatpush1.bf16.msra.mxu1 %v5229_v38  ;;  %2584 = vmatpush1.bf16.msra.mxu0 %v5231_v39  ;;  %v5373_v38 = vcombine.low %v1010_v26, %v1018_v27  ;;  %v5375_v39 = vcombine.low %v1011_v28, %v1019_v29  ;;  %v900_v26 = vld [vmem:[%s6869_s12 + $0x220] sm:$0xff]  ;;  %v901_v28 = vld [vmem:[%s6869_s12 + $0x228] sm:$0xff] }
 0x332   : > { %2544 = vmatprep.subr.bf16.mxu1 %v5214_v40  ;;  %2585 = vmatprep.subr.bf16.mxu0 %v5216_v41  ;;  %v5358_v40 = vcombine.high %v994_v34, %v1002_v35  ;;  %v5360_v41 = vcombine.high %v995_v36, %v1003_v37  ;;  %v908_v27 = vld [vmem:[%s6869_s12 + $0x260] sm:$0xff]  ;;  %v909_v29 = vld [vmem:[%s6869_s12 + $0x268] sm:$0xff] }
 0x335   : > { %2545 = vmatpush1.bf16.msra.mxu1 %v5213_v48  ;;  %2586 = vmatpush1.bf16.msra.mxu0 %v5215_v49  ;;  %v5357_v48 = vcombine.low %v994_v34, %v1002_v35  ;;  %v5359_v49 = vcombine.low %v995_v36, %v1003_v37  ;;  %v884_v34 = vld [vmem:[%s6869_s12 + $0x1a0] sm:$0xff]  ;;  %v885_v36 = vld [vmem:[%s6869_s12 + $0x1a8] sm:$0xff] }
 0x336   : > { %2546 = vmatprep.subr.bf16.mxu1 %v5198_v50  ;;  %2587 = vmatprep.subr.bf16.mxu0 %v5200_v51  ;;  %v5342_v50 = vcombine.high %v978_v42, %v986_v43  ;;  %v5344_v51 = vcombine.high %v979_v46, %v987_v47  ;;  %v892_v35 = vld [vmem:[%s6869_s12 + $0x1e0] sm:$0xff]  ;;  %v893_v37 = vld [vmem:[%s6869_s12 + $0x1e8] sm:$0xff] }
 0x339   : > { %2547 = vmatpush1.bf16.msra.mxu1 %v5197_v58  ;;  %2588 = vmatpush1.bf16.msra.mxu0 %v5199_v59  ;;  %v5341_v58 = vcombine.low %v978_v42, %v986_v43  ;;  %v5343_v59 = vcombine.low %v979_v46, %v987_v47  ;;  %v868_v42 = vld [vmem:[%s6869_s12 + $0x120] sm:$0xff]  ;;  %v869_v46 = vld [vmem:[%s6869_s12 + $0x128] sm:$0xff] }
 0x33a   : > { %2548 = vmatprep.subr.bf16.mxu1 %v5438_v62  ;;  %2589 = vmatprep.subr.bf16.mxu0 %v5440_v11  ;;  %v5326_v62 = vcombine.high %v962_v53, %v970_v54  ;;  %v5328_v11 = vcombine.high %v963_v55, %v971_v56  ;;  %v876_v43 = vld [vmem:[%s6869_s12 + $0x160] sm:$0xff]  ;;  %v877_v47 = vld [vmem:[%s6869_s12 + $0x168] sm:$0xff] }
 0x33d   : > { %2549 = vmatpush2.bf16.msra.mxu1 %v5437_v3  ;;  %2590 = vmatpush2.bf16.msra.mxu0 %v5439_v4  ;;  %v5325_v3 = vcombine.low %v962_v53, %v970_v54  ;;  %v5327_v4 = vcombine.low %v963_v55, %v971_v56  ;;  %v852_v53 = vld [vmem:[%s6869_s12 + $0xa0] sm:$0xff]  ;;  %v853_v55 = vld [vmem:[%s6869_s12 + $0xa8] sm:$0xff] }
 0x33e   : > { %2550 = vmatprep.subr.bf16.mxu1 %v5422_v5  ;;  %2591 = vmatprep.subr.bf16.mxu0 %v5424_v6  ;;  %v5314_v5 = vcombine.high %v948_v63, %v956_v0  ;;  %v5316_v6 = vcombine.high %v949_v1, %v957_v2  ;;  %v860_v54 = vld [vmem:[%s6869_s12 + $0xe0] sm:$0xff]  ;;  %v861_v56 = vld [vmem:[%s6869_s12 + $0xe8] sm:$0xff] }
 0x341   : > { %2551 = vmatpush2.bf16.msra.mxu1 %v5421_v13  ;;  %2592 = vmatpush2.bf16.msra.mxu0 %v5423_v15  ;;  %v5313_v13 = vcombine.low %v948_v63, %v956_v0  ;;  %v5315_v15 = vcombine.low %v949_v1, %v957_v2  ;;  %v836_v63 = vld [vmem:[%s6869_s12 + $0x20] sm:$0xff]  ;;  %v837_v1 = vld [vmem:[%s6869_s12 + $0x28] sm:$0xff] }
 0x342   : > { %2552 = vmatprep.subr.bf16.mxu1 %v5406_v16  ;;  %2593 = vmatprep.subr.bf16.mxu0 %v5408_v18  ;;  %v5298_v16 = vcombine.high %v932_v8, %v940_v9  ;;  %v5300_v18 = vcombine.high %v933_v10, %v941_v12  ;;  %v844_v0 = vld [vmem:[%s6869_s12 + $0x60] sm:$0xff]  ;;  %v845_v2 = vld [vmem:[%s6869_s12 + $0x68] sm:$0xff] }
 0x345   : > { %2553 = vmatpush2.bf16.msra.mxu1 %v5405_v22  ;;  %2594 = vmatpush2.bf16.msra.mxu0 %v5407_v23  ;;  %v5297_v22 = vcombine.low %v932_v8, %v940_v9  ;;  %v5299_v23 = vcombine.low %v933_v10, %v941_v12  ;;  %v1076_v8 = vld [vmem:[%s6869_s12 + $0x7a0] sm:$0xff]  ;;  %v1077_v10 = vld [vmem:[%s6869_s12 + $0x7a8] sm:$0xff] }
 0x346   : > { %2554 = vmatprep.subr.bf16.mxu1 %v5390_v24  ;;  %2595 = vmatprep.subr.bf16.mxu0 %v5392_v25  ;;  %v5282_v24 = vcombine.high %v916_v19, %v924_v20  ;;  %v5284_v25 = vcombine.high %v917_v21, %v925_v57  ;;  %v1084_v9 = vld [vmem:[%s6869_s12 + $0x7e0] sm:$0xff]  ;;  %v1085_v12 = vld [vmem:[%s6869_s12 + $0x7e8] sm:$0xff] }
 0x349   : > { %2555 = vmatpush2.bf16.msra.mxu1 %v5389_v30  ;;  %2596 = vmatpush2.bf16.msra.mxu0 %v5391_v31  ;;  %v5281_v30 = vcombine.low %v916_v19, %v924_v20  ;;  %v5283_v31 = vcombine.low %v917_v21, %v925_v57  ;;  %v1060_v19 = vld [vmem:[%s6869_s12 + $0x720] sm:$0xff]  ;;  %v1061_v21 = vld [vmem:[%s6869_s12 + $0x728] sm:$0xff] }
 0x34a   : > { %2556 = vmatprep.subr.bf16.mxu1 %v5374_v32  ;;  %2597 = vmatprep.subr.bf16.mxu0 %v5376_v33  ;;  %v5266_v32 = vcombine.high %v900_v26, %v908_v27  ;;  %v5268_v33 = vcombine.high %v901_v28, %v909_v29  ;;  %v1068_v20 = vld [vmem:[%s6869_s12 + $0x760] sm:$0xff]  ;;  %v1069_v57 = vld [vmem:[%s6869_s12 + $0x768] sm:$0xff] }
 0x34d   : > { %2557 = vmatpush2.bf16.msra.mxu1 %v5373_v38  ;;  %2598 = vmatpush2.bf16.msra.mxu0 %v5375_v39  ;;  %v5265_v38 = vcombine.low %v900_v26, %v908_v27  ;;  %v5267_v39 = vcombine.low %v901_v28, %v909_v29  ;;  %v1044_v26 = vld [vmem:[%s6869_s12 + $0x6a0] sm:$0xff]  ;;  %v1045_v28 = vld [vmem:[%s6869_s12 + $0x6a8] sm:$0xff] }
 0x34e   : > { %2558 = vmatprep.subr.bf16.mxu1 %v5358_v40  ;;  %2599 = vmatprep.subr.bf16.mxu0 %v5360_v41  ;;  %v5250_v40 = vcombine.high %v884_v34, %v892_v35  ;;  %v5252_v41 = vcombine.high %v885_v36, %v893_v37  ;;  %v1052_v27 = vld [vmem:[%s6869_s12 + $0x6e0] sm:$0xff]  ;;  %v1053_v29 = vld [vmem:[%s6869_s12 + $0x6e8] sm:$0xff] }
 0x351   : > { %2559 = vmatpush2.bf16.msra.mxu1 %v5357_v48  ;;  %2600 = vmatpush2.bf16.msra.mxu0 %v5359_v49  ;;  %v5249_v48 = vcombine.low %v884_v34, %v892_v35  ;;  %v5251_v49 = vcombine.low %v885_v36, %v893_v37  ;;  %v1028_v34 = vld [vmem:[%s6869_s12 + $0x620] sm:$0xff]  ;;  %v1029_v36 = vld [vmem:[%s6869_s12 + $0x628] sm:$0xff] }
 0x352   : > { %2560 = vmatprep.subr.bf16.mxu1 %v5342_v50  ;;  %2601 = vmatprep.subr.bf16.mxu0 %v5344_v51  ;;  %v5234_v50 = vcombine.high %v868_v42, %v876_v43  ;;  %v5236_v51 = vcombine.high %v869_v46, %v877_v47  ;;  %v1036_v35 = vld [vmem:[%s6869_s12 + $0x660] sm:$0xff]  ;;  %v1037_v37 = vld [vmem:[%s6869_s12 + $0x668] sm:$0xff] }
 0x355   : > { %2561 = vmatpush2.bf16.msra.mxu1 %v5341_v58  ;;  %2602 = vmatpush2.bf16.msra.mxu0 %v5343_v59  ;;  %v5233_v58 = vcombine.low %v868_v42, %v876_v43  ;;  %v5235_v59 = vcombine.low %v869_v46, %v877_v47  ;;  %v1012_v42 = vld [vmem:[%s6869_s12 + $0x5a0] sm:$0xff]  ;;  %v1013_v46 = vld [vmem:[%s6869_s12 + $0x5a8] sm:$0xff] }
 0x356   : > { %2562 = vmatprep.subr.bf16.mxu1 %v5326_v62  ;;  %2603 = vmatprep.subr.bf16.mxu0 %v5328_v11  ;;  %v5218_v62 = vcombine.high %v852_v53, %v860_v54  ;;  %v5220_v11 = vcombine.high %v853_v55, %v861_v56  ;;  %v1020_v43 = vld [vmem:[%s6869_s12 + $0x5e0] sm:$0xff]  ;;  %v1021_v47 = vld [vmem:[%s6869_s12 + $0x5e8] sm:$0xff] }
 0x359   : > { %2563 = vmatpush2.bf16.msra.mxu1 %v5325_v3  ;;  %2604 = vmatpush2.bf16.msra.mxu0 %v5327_v4  ;;  %v5217_v3 = vcombine.low %v852_v53, %v860_v54  ;;  %v5219_v4 = vcombine.low %v853_v55, %v861_v56  ;;  %v996_v53 = vld [vmem:[%s6869_s12 + $0x520] sm:$0xff]  ;;  %v997_v55 = vld [vmem:[%s6869_s12 + $0x528] sm:$0xff] }
 0x35a   : > { %2614 = vmatprep.subr.bf16.mxu1 %v5314_v5  ;;  %2655 = vmatprep.subr.bf16.mxu0 %v5316_v6  ;;  %v5202_v5 = vcombine.high %v836_v63, %v844_v0  ;;  %v5204_v6 = vcombine.high %v837_v1, %v845_v2  ;;  %v1004_v54 = vld [vmem:[%s6869_s12 + $0x560] sm:$0xff]  ;;  %v1005_v56 = vld [vmem:[%s6869_s12 + $0x568] sm:$0xff] }
 0x35c   : > { %2565 = vmatmul.mubr.bf16.vlgmr.msra.gmra.mxu1 %v7039_v61  ;;  %2606 = vmatmul.mubr.bf16.vlgmr.msra.gmra.mxu0 %v7039_v61 }
 0x35d   : > { %2615 = vmatpush1.bf16.msra.mxu1 %v5313_v13  ;;  %2646 = vmatprep.mubr.bf16.mxu1 %v7037_v60  ;;  %v5201_v13 = vcombine.low %v836_v63, %v844_v0  ;;  %v980_v63 = vld [vmem:[%s6869_s12 + $0x4a0] sm:$0xff] }
 0x35e   : > { %2656 = vmatpush1.bf16.msra.mxu0 %v5315_v15  ;;  %2687 = vmatprep.mubr.bf16.mxu0 %v7037_v60  ;;  %v5203_v15 = vcombine.low %v837_v1, %v845_v2  ;;  %v988_v0 = vld [vmem:[%s6869_s12 + $0x4e0] sm:$0xff]  ;;  %v981_v1 = vld [vmem:[%s6869_s12 + $0x4a8] sm:$0xff] }
 0x35f   : > { %2616 = vmatprep.subr.bf16.mxu1 %v5298_v16  ;;  %2657 = vmatprep.subr.bf16.mxu0 %v5300_v18  ;;  %v5442_v16 = vcombine.high %v1076_v8, %v1084_v9  ;;  %v5444_v18 = vcombine.high %v1077_v10, %v1085_v12  ;;  %v989_v2 = vld [vmem:[%s6869_s12 + $0x4e8] sm:$0xff] }
 0x361   : > { %2617 = vmatpush1.bf16.msra.mxu1 %v5297_v22  ;;  %v5441_v22 = vcombine.low %v1076_v8, %v1084_v9  ;;  %v964_v8 = vld [vmem:[%s6869_s12 + $0x420] sm:$0xff] }
 0x362   : > { %2658 = vmatpush1.bf16.msra.mxu0 %v5299_v23  ;;  %2618 = vmatprep.subr.bf16.mxu1 %v5282_v24  ;;  %v5443_v23 = vcombine.low %v1077_v10, %v1085_v12  ;;  %v5426_v24 = vcombine.high %v1060_v19, %v1068_v20  ;;  %v972_v9 = vld [vmem:[%s6869_s12 + $0x460] sm:$0xff]  ;;  %v965_v10 = vld [vmem:[%s6869_s12 + $0x428] sm:$0xff] }
 0x363   : > { %2659 = vmatprep.subr.bf16.mxu0 %v5284_v25  ;;  %v5428_v25 = vcombine.high %v1061_v21, %v1069_v57  ;;  %v973_v12 = vld [vmem:[%s6869_s12 + $0x468] sm:$0xff] }
 0x365   : > { %2619 = vmatpush1.bf16.msra.mxu1 %v5281_v30  ;;  %v5425_v30 = vcombine.low %v1060_v19, %v1068_v20  ;;  %v950_v19 = vld [vmem:[%s6869_s12 + $0x3b0] sm:$0xff] }
 0x366   : > { %2660 = vmatpush1.bf16.msra.mxu0 %v5283_v31  ;;  %2620 = vmatprep.subr.bf16.mxu1 %v5266_v32  ;;  %v5427_v31 = vcombine.low %v1061_v21, %v1069_v57  ;;  %v5410_v32 = vcombine.high %v1044_v26, %v1052_v27  ;;  %v958_v20 = vld [vmem:[%s6869_s12 + $0x3f0] sm:$0xff]  ;;  %v951_v21 = vld [vmem:[%s6869_s12 + $0x3b8] sm:$0xff] }
 0x367   : > { %2661 = vmatprep.subr.bf16.mxu0 %v5268_v33  ;;  %v5412_v33 = vcombine.high %v1045_v28, %v1053_v29  ;;  %v959_v57 = vld [vmem:[%s6869_s12 + $0x3f8] sm:$0xff] }
 0x369   : > { %2621 = vmatpush1.bf16.msra.mxu1 %v5265_v38  ;;  %v5409_v38 = vcombine.low %v1044_v26, %v1052_v27  ;;  %v934_v26 = vld [vmem:[%s6869_s12 + $0x330] sm:$0xff] }
 0x36a   : > { %2662 = vmatpush1.bf16.msra.mxu0 %v5267_v39  ;;  %2622 = vmatprep.subr.bf16.mxu1 %v5250_v40  ;;  %v5411_v39 = vcombine.low %v1045_v28, %v1053_v29  ;;  %v5394_v40 = vcombine.high %v1028_v34, %v1036_v35  ;;  %v942_v27 = vld [vmem:[%s6869_s12 + $0x370] sm:$0xff]  ;;  %v5317_v28 = vcombine.low %v950_v19, %v958_v20  ;;  %v935_v29 = vld [vmem:[%s6869_s12 + $0x338] sm:$0xff] }
 0x36b   : > { %2663 = vmatprep.subr.bf16.mxu0 %v5252_v41  ;;  %v5396_v41 = vcombine.high %v1029_v36, %v1037_v37 }
 0x36d   : > { %2623 = vmatpush1.bf16.msra.mxu1 %v5249_v48  ;;  %v5393_v48 = vcombine.low %v1028_v34, %v1036_v35  ;;  %v926_v34 = vld [vmem:[%s6869_s12 + $0x2f0] sm:$0xff] }
 0x36e   : > { %2664 = vmatpush1.bf16.msra.mxu0 %v5251_v49  ;;  %2624 = vmatprep.subr.bf16.mxu1 %v5234_v50  ;;  %v5395_v49 = vcombine.low %v1029_v36, %v1037_v37  ;;  %v5378_v50 = vcombine.high %v1012_v42, %v1020_v43  ;;  %v919_v36 = vld [vmem:[%s6869_s12 + $0x2b8] sm:$0xff] }
 0x36f   : > { %2665 = vmatprep.subr.bf16.mxu0 %v5236_v51  ;;  %v5380_v51 = vcombine.high %v1013_v46, %v1021_v47  ;;  %v927_v37 = vld [vmem:[%s6869_s12 + $0x2f8] sm:$0xff] }
 0x371   : > { %2625 = vmatpush1.bf16.msra.mxu1 %v5233_v58  ;;  %v5377_v58 = vcombine.low %v1012_v42, %v1020_v43  ;;  %v902_v42 = vld [vmem:[%s6869_s12 + $0x230] sm:$0xff] }
 0x372   : > { %2666 = vmatpush1.bf16.msra.mxu0 %v5235_v59  ;;  %2626 = vmatprep.subr.bf16.mxu1 %v5218_v62  ;;  %v5379_v59 = vcombine.low %v1013_v46, %v1021_v47  ;;  %v5362_v62 = vcombine.high %v996_v53, %v1004_v54  ;;  %v910_v43 = vld [vmem:[%s6869_s12 + $0x270] sm:$0xff]  ;;  %v903_v46 = vld [vmem:[%s6869_s12 + $0x238] sm:$0xff] }
 0x373   : > { %2667 = vmatprep.subr.bf16.mxu0 %v5220_v11  ;;  %v5364_v11 = vcombine.high %v997_v55, %v1005_v56  ;;  %v911_v47 = vld [vmem:[%s6869_s12 + $0x278] sm:$0xff] }
 0x375   : > { %2627 = vmatpush1.bf16.msra.mxu1 %v5217_v3  ;;  %v5361_v3 = vcombine.low %v996_v53, %v1004_v54  ;;  %v894_v53 = vld [vmem:[%s6869_s12 + $0x1f0] sm:$0xff]  ;;  %v887_v54 = vld [vmem:[%s6869_s12 + $0x1b8] sm:$0xff] }
 0x376   : > { %2668 = vmatpush1.bf16.msra.mxu0 %v5219_v4  ;;  %2628 = vmatprep.subr.bf16.mxu1 %v5202_v5  ;;  %v5363_v4 = vcombine.low %v997_v55, %v1005_v56  ;;  %v5346_v5 = vcombine.high %v980_v63, %v988_v0  ;;  %v895_v55 = vld [vmem:[%s6869_s12 + $0x1f8] sm:$0xff]  ;;  %v5269_v56 = vcombine.low %v902_v42, %v910_v43 }
 0x377   : > { %2669 = vmatprep.subr.bf16.mxu0 %v5204_v6  ;;  %v5348_v6 = vcombine.high %v981_v1, %v989_v2 }
 0x379   : > { %2629 = vmatpush1.bf16.msra.mxu1 %v5201_v13  ;;  %v5345_v13 = vcombine.low %v980_v63, %v988_v0  ;;  %v878_v63 = vld [vmem:[%s6869_s12 + $0x170] sm:$0xff]  ;;  %v871_v0 = vld [vmem:[%s6869_s12 + $0x138] sm:$0xff] }
 0x37a   : > { %2670 = vmatpush1.bf16.msra.mxu0 %v5203_v15  ;;  %2630 = vmatprep.subr.bf16.mxu1 %v5442_v16  ;;  %v5347_v15 = vcombine.low %v981_v1, %v989_v2  ;;  %v5330_v16 = vcombine.high %v964_v8, %v972_v9  ;;  %v879_v1 = vld [vmem:[%s6869_s12 + $0x178] sm:$0xff] }
 0x37b   : > { %2671 = vmatprep.subr.bf16.mxu0 %v5444_v18  ;;  %v5332_v18 = vcombine.high %v965_v10, %v973_v12 }
 0x37d   : > { %2631 = vmatpush2.bf16.msra.mxu1 %v5441_v22  ;;  %v5329_v22 = vcombine.low %v964_v8, %v972_v9  ;;  %v862_v8 = vld [vmem:[%s6869_s12 + $0xf0] sm:$0xff]  ;;  %v855_v9 = vld [vmem:[%s6869_s12 + $0xb8] sm:$0xff] }
 0x37e   : > { %2672 = vmatpush2.bf16.msra.mxu0 %v5443_v23  ;;  %2632 = vmatprep.subr.bf16.mxu1 %v5426_v24  ;;  %v5331_v23 = vcombine.low %v965_v10, %v973_v12  ;;  %v5318_v24 = vcombine.high %v950_v19, %v958_v20  ;;  %v863_v10 = vld [vmem:[%s6869_s12 + $0xf8] sm:$0xff]  ;;  %v846_v19 = vld [vmem:[%s6869_s12 + $0x70] sm:$0xff] }
 0x37f   : > { %2673 = vmatprep.subr.bf16.mxu0 %v5428_v25  ;;  %v5320_v25 = vcombine.high %v951_v21, %v959_v57  ;;  %v839_v20 = vld [vmem:[%s6869_s12 + $0x38] sm:$0xff] }
 0x381   : > { %2633 = vmatpush2.bf16.msra.mxu1 %v5425_v30  ;;  %v943_v30 = vld [vmem:[%s6869_s12 + $0x378] sm:$0xff] }
 0x382   : > { %2674 = vmatpush2.bf16.msra.mxu0 %v5427_v31  ;;  %2634 = vmatprep.subr.bf16.mxu1 %v5410_v32  ;;  %v5319_v31 = vcombine.low %v951_v21, %v959_v57  ;;  %v5302_v32 = vcombine.high %v934_v26, %v942_v27  ;;  %v5304_v35 = vcombine.high %v935_v29, %v943_v30  ;;  %v847_v21 = vld [vmem:[%s6869_s12 + $0x78] sm:$0xff] }
 0x383   : > { %2675 = vmatprep.subr.bf16.mxu0 %v5412_v33  ;;  %v918_v33 = vld [vmem:[%s6869_s12 + $0x2b0] sm:$0xff] }
 0x385   : > { %2635 = vmatpush2.bf16.msra.mxu1 %v5409_v38  ;;  %v5301_v38 = vcombine.low %v934_v26, %v942_v27  ;;  %v1086_v26 = vld [vmem:[%s6869_s12 + $0x7f0] sm:$0xff]  ;;  %v1079_v27 = vld [vmem:[%s6869_s12 + $0x7b8] sm:$0xff] }
 0x386   : > { %2676 = vmatpush2.bf16.msra.mxu0 %v5411_v39  ;;  %2636 = vmatprep.subr.bf16.mxu1 %v5394_v40  ;;  %v5303_v39 = vcombine.low %v935_v29, %v943_v30  ;;  %v5286_v40 = vcombine.high %v918_v33, %v926_v34  ;;  %v5207_v30 = vcombine.low %v839_v20, %v847_v21 }
 0x387   : > { %2677 = vmatprep.subr.bf16.mxu0 %v5396_v41  ;;  %v5288_v41 = vcombine.high %v919_v36, %v927_v37 }
 0x389   : > { %2637 = vmatpush2.bf16.msra.mxu1 %v5393_v48  ;;  %v5285_v48 = vcombine.low %v918_v33, %v926_v34  ;;  %v1062_v33 = vld [vmem:[%s6869_s12 + $0x730] sm:$0xff] }
 0x38a   : > { %2678 = vmatpush2.bf16.msra.mxu0 %v5395_v49  ;;  %2638 = vmatprep.subr.bf16.mxu1 %v5378_v50  ;;  %v5287_v49 = vcombine.low %v919_v36, %v927_v37  ;;  %v5270_v50 = vcombine.high %v902_v42, %v910_v43  ;;  %v1070_v34 = vld [vmem:[%s6869_s12 + $0x770] sm:$0xff]  ;;  %v1071_v36 = vld [vmem:[%s6869_s12 + $0x778] sm:$0xff] }
 0x38b   : > { %2679 = vmatprep.subr.bf16.mxu0 %v5380_v51  ;;  %v886_v51 = vld [vmem:[%s6869_s12 + $0x1b0] sm:$0xff]  ;;  %v1047_v43 = vld [vmem:[%s6869_s12 + $0x6b8] sm:$0xff] }
 0x38c   : > { %v5253_v2 = vcombine.low %v886_v51, %v894_v53  ;;  %v1054_v42 = vld [vmem:[%s6869_s12 + $0x6f0] sm:$0xff] }
 0x38d   : > { %2639 = vmatpush2.bf16.msra.mxu1 %v5377_v58  ;;  %v5271_v58 = vcombine.low %v903_v46, %v911_v47 }
 0x38e   : > { %2680 = vmatpush2.bf16.msra.mxu0 %v5379_v59  ;;  %2640 = vmatprep.subr.bf16.mxu1 %v5362_v62  ;;  %v5254_v59 = vcombine.high %v886_v51, %v894_v53  ;;  %v5256_v62 = vcombine.high %v887_v54, %v895_v55  ;;  %v1038_v51 = vld [vmem:[%s6869_s12 + $0x670] sm:$0xff]  ;;  %v1031_v53 = vld [vmem:[%s6869_s12 + $0x638] sm:$0xff] }
 0x38f   : > { %2681 = vmatprep.subr.bf16.mxu0 %v5364_v11  ;;  %v870_v11 = vld [vmem:[%s6869_s12 + $0x130] sm:$0xff] }
 0x390   : > { %v5237_v12 = vcombine.low %v870_v11, %v878_v63 }
 0x391   : > { %2641 = vmatpush2.bf16.msra.mxu1 %v5361_v3  ;;  %v5255_v3 = vcombine.low %v887_v54, %v895_v55  ;;  %v1039_v54 = vld [vmem:[%s6869_s12 + $0x678] sm:$0xff] }
 0x392   : > { %2682 = vmatpush2.bf16.msra.mxu0 %v5363_v4  ;;  %2642 = vmatprep.subr.bf16.mxu1 %v5346_v5  ;;  %v5238_v4 = vcombine.high %v870_v11, %v878_v63  ;;  %v5240_v5 = vcombine.high %v871_v0, %v879_v1  ;;  %v1022_v11 = vld [vmem:[%s6869_s12 + $0x5f0] sm:$0xff]  ;;  %v1015_v63 = vld [vmem:[%s6869_s12 + $0x5b8] sm:$0xff] }
 0x393   : > { %2683 = vmatprep.subr.bf16.mxu0 %v5348_v6  ;;  %v854_v6 = vld [vmem:[%s6869_s12 + $0xb0] sm:$0xff] }
 0x394   : > { %v5221_v57 = vcombine.low %v854_v6, %v862_v8 }
 0x395   : > { %2643 = vmatpush2.bf16.msra.mxu1 %v5345_v13  ;;  %v5239_v13 = vcombine.low %v871_v0, %v879_v1  ;;  %v1023_v0 = vld [vmem:[%s6869_s12 + $0x5f8] sm:$0xff] }
 0x396   : > { %2684 = vmatpush2.bf16.msra.mxu0 %v5347_v15  ;;  %2644 = vmatprep.subr.bf16.mxu1 %v5330_v16  ;;  %v5222_v15 = vcombine.high %v854_v6, %v862_v8  ;;  %v5224_v16 = vcombine.high %v855_v9, %v863_v10  ;;  %v1006_v6 = vld [vmem:[%s6869_s12 + $0x570] sm:$0xff]  ;;  %v999_v8 = vld [vmem:[%s6869_s12 + $0x538] sm:$0xff] }
 0x397   : > { %2685 = vmatprep.subr.bf16.mxu0 %v5332_v18  ;;  %v838_v18 = vld [vmem:[%s6869_s12 + $0x30] sm:$0xff] }
 0x398   : > { %v5205_v29 = vcombine.low %v838_v18, %v846_v19 }
 0x399   : > { %2645 = vmatpush2.bf16.msra.mxu1 %v5329_v22  ;;  %v5223_v22 = vcombine.low %v855_v9, %v863_v10  ;;  %v1007_v9 = vld [vmem:[%s6869_s12 + $0x578] sm:$0xff] }
 0x39a   : > { %2686 = vmatpush2.bf16.msra.mxu0 %v5331_v23  ;;  %2696 = vmatprep.subr.bf16.mxu1 %v5318_v24  ;;  %v5206_v23 = vcombine.high %v838_v18, %v846_v19  ;;  %v5208_v24 = vcombine.high %v839_v20, %v847_v21  ;;  %v990_v18 = vld [vmem:[%s6869_s12 + $0x4f0] sm:$0xff]  ;;  %v983_v19 = vld [vmem:[%s6869_s12 + $0x4b8] sm:$0xff] }
 0x39b   : > { %2737 = vmatprep.subr.bf16.mxu0 %v5320_v25  ;;  %v1078_v25 = vld [vmem:[%s6869_s12 + $0x7b0] sm:$0xff]  ;;  %v991_v20 = vld [vmem:[%s6869_s12 + $0x4f8] sm:$0xff] }
 0x39c   : > { %2647 = vmatmul.mubr.bf16.vlgmr.msra.gmra.mxu1 %v7039_v61  ;;  %v5445_v37 = vcombine.low %v1078_v25, %v1086_v26 }
 0x39d   : > { %2688 = vmatmul.mubr.bf16.vlgmr.msra.gmra.mxu0 %v7039_v61  ;;  %2697 = vmatpush1.bf16.msra.mxu1 %v5317_v28  ;;  %v1087_v28 = vld [vmem:[%s6869_s12 + $0x7f8] sm:$0xff] }
 0x39e   : > { %2728 = vmatprep.mubr.bf16.mxu1 %v7037_v60  ;;  %2738 = vmatpush1.bf16.msra.mxu0 %v5319_v31  ;;  %v5446_v31 = vcombine.high %v1078_v25, %v1086_v26  ;;  %v974_v25 = vld [vmem:[%s6869_s12 + $0x470] sm:$0xff]  ;;  %v967_v26 = vld [vmem:[%s6869_s12 + $0x438] sm:$0xff] }
 0x39f   : > { %2769 = vmatprep.mubr.bf16.mxu0 %v7037_v60  ;;  %2698 = vmatprep.subr.bf16.mxu1 %v5302_v32  ;;  %v5272_v60 = vcombine.high %v903_v46, %v911_v47  ;;  %v5448_v32 = vcombine.high %v1079_v27, %v1087_v28  ;;  %v1055_v46 = vld [vmem:[%s6869_s12 + $0x6f8] sm:$0xff]  ;;  %v5429_v47 = vcombine.low %v1062_v33, %v1070_v34 }
 0x3a0   : > { %2739 = vmatprep.subr.bf16.mxu0 %v5304_v35  ;;  %v1063_v35 = vld [vmem:[%s6869_s12 + $0x738] sm:$0xff] }
 0x3a1   : > { %2699 = vmatpush1.bf16.msra.mxu1 %v5301_v38  ;;  %v5447_v38 = vcombine.low %v1079_v27, %v1087_v28  ;;  %v975_v27 = vld [vmem:[%s6869_s12 + $0x478] sm:$0xff] }
 0x3a2   : > { %2740 = vmatpush1.bf16.msra.mxu0 %v5303_v39  ;;  %2700 = vmatprep.subr.bf16.mxu1 %v5286_v40  ;;  %v5430_v39 = vcombine.high %v1062_v33, %v1070_v34  ;;  %v5432_v40 = vcombine.high %v1063_v35, %v1071_v36  ;;  %v5335_v33 = vcombine.low %v967_v26, %v975_v27  ;;  %v5904_v34 = vld [vmem:[%s6871_s1 + $0x74] ss:$8 sps:$4 sm:$0xff]  }
 0x3a3   : > { %2741 = vmatprep.subr.bf16.mxu0 %v5288_v41  ;;  %v1046_v41 = vld [vmem:[%s6869_s12 + $0x6b0] sm:$0xff] }
 0x3a4   : > { %v5413_v55 = vcombine.low %v1046_v41, %v1054_v42 }
 0x3a5   : > { %2701 = vmatpush1.bf16.msra.mxu1 %v5285_v48  ;;  %v5431_v48 = vcombine.low %v1063_v35, %v1071_v36  ;;  %v5907_v35 = vld [vmem:[%s6871_s1 + $0x174] ss:$8 sps:$4 sm:$0xff]   ;;  %v1104_v36 = vsub.s32 3, %v6894_v14 }
 0x3a6   : > { %2742 = vmatpush1.bf16.msra.mxu0 %v5287_v49  ;;  %2702 = vmatprep.subr.bf16.mxu1 %v5270_v50  ;;  %v5414_v49 = vcombine.high %v1046_v41, %v1054_v42  ;;  %v5416_v50 = vcombine.high %v1047_v43, %v1055_v46 }
 0x3a7   : > { %2743 = vmatprep.subr.bf16.mxu0 %v5272_v60  ;;  %v1030_v60 = vld [vmem:[%s6869_s12 + $0x630] sm:$0xff] }
 0x3a8   : > { %v5397_v1 = vcombine.low %v1030_v60, %v1038_v51 }
 0x3a9   : > { %2703 = vmatpush1.bf16.msra.mxu1 %v5269_v56  ;;  %v5415_v56 = vcombine.low %v1047_v43, %v1055_v46  ;;  %v5913_v43 = vld [vmem:[%s6871_s1 + $0x164] ss:$8 sps:$4 sm:$0xff]  }
 0x3aa   : > { %2744 = vmatpush1.bf16.msra.mxu0 %v5271_v58  ;;  %2704 = vmatprep.subr.bf16.mxu1 %v5254_v59  ;;  %v5398_v58 = vcombine.high %v1030_v60, %v1038_v51  ;;  %v5400_v59 = vcombine.high %v1031_v53, %v1039_v54  ;;  %v5911_v60 = vld [vmem:[%s6871_s1 + $0x160] ss:$8 sps:$4 sm:$0xff]   ;;  %v5916_v51 = vld [vmem:[%s6871_s1 + $0x54] ss:$8 sps:$4 sm:$0xff]  }
 0x3ab   : > { %2745 = vmatprep.subr.bf16.mxu0 %v5256_v62  ;;  %v1014_v62 = vld [vmem:[%s6869_s12 + $0x5b0] sm:$0xff] }
 0x3ac   : > { %v5381_v10 = vcombine.low %v1014_v62, %v1022_v11 }
 0x3ad   : > { %2705 = vmatpush1.bf16.msra.mxu1 %v5253_v2  ;;  %v5399_v2 = vcombine.low %v1031_v53, %v1039_v54 }
 0x3ae   : > { %2746 = vmatpush1.bf16.msra.mxu0 %v5255_v3  ;;  %2706 = vmatprep.subr.bf16.mxu1 %v5238_v4  ;;  %v5382_v3 = vcombine.high %v1014_v62, %v1022_v11  ;;  %v5384_v4 = vcombine.high %v1015_v63, %v1023_v0  ;;  %v5914_v62 = vld [vmem:[%s6871_s1 + $0x50] ss:$8 sps:$4 sm:$0xff]  }
 0x3af   : > { %2747 = vmatprep.subr.bf16.mxu0 %v5240_v5  ;;  %v998_v5 = vld [vmem:[%s6869_s12 + $0x530] sm:$0xff] }
 0x3b0   : > { %v5365_v21 = vcombine.low %v998_v5, %v1006_v6 }
 0x3b1   : > { %2707 = vmatpush1.bf16.msra.mxu1 %v5237_v12  ;;  %v5383_v12 = vcombine.low %v1015_v63, %v1023_v0  ;;  %v5917_v0 = vld [vmem:[%s6871_s1 + $0x150] ss:$8 sps:$4 sm:$0xff]  }
 0x3b2   : > { %2748 = vmatpush1.bf16.msra.mxu0 %v5239_v13  ;;  %2708 = vmatprep.subr.bf16.mxu1 %v5222_v15  ;;  %v5366_v13 = vcombine.high %v998_v5, %v1006_v6  ;;  %v5368_v15 = vcombine.high %v999_v8, %v1007_v9  ;;  %v5920_v5 = vld [vmem:[%s6871_s1 + $0x40] ss:$8 sps:$4 sm:$0xff]  }
 0x3b3   : > { %2749 = vmatprep.subr.bf16.mxu0 %v5224_v16  ;;  %v982_v16 = vld [vmem:[%s6869_s12 + $0x4b0] sm:$0xff]  ;;  %v5923_v6 = vld [vmem:[%s6871_s1 + $0x140] ss:$8 sps:$4 sm:$0xff]  }
 0x3b4   : > { %v5349_v28 = vcombine.low %v982_v16, %v990_v18 }
 0x3b5   : > { %2709 = vmatpush1.bf16.msra.mxu1 %v5221_v57  ;;  %v5367_v57 = vcombine.low %v999_v8, %v1007_v9  ;;  %v5928_v8 = vld [vmem:[%s6871_s1 + $0x34] ss:$8 sps:$4 sm:$0xff]  }
 0x3b6   : > { %2750 = vmatpush1.bf16.msra.mxu0 %v5223_v22  ;;  %2710 = vmatprep.subr.bf16.mxu1 %v5206_v23  ;;  %v5350_v22 = vcombine.high %v982_v16, %v990_v18  ;;  %v5352_v23 = vcombine.high %v983_v19, %v991_v20  ;;  %v5931_v9 = vld [vmem:[%s6871_s1 + $0x134] ss:$8 sps:$4 sm:$0xff]   ;;  %v5932_v16 = vld [vmem:[%s6871_s1 + $0x20] ss:$8 sps:$4 sm:$0xff]  }
 0x3b7   : > { %2751 = vmatprep.subr.bf16.mxu0 %v5208_v24  ;;  %v966_v24 = vld [vmem:[%s6869_s12 + $0x430] sm:$0xff]  ;;  %v5935_v18 = vld [vmem:[%s6871_s1 + $0x120] ss:$8 sps:$4 sm:$0xff]  }
 0x3b9   : > { %2711 = vmatpush1.bf16.msra.mxu1 %v5205_v29  ;;  %v5351_v29 = vcombine.low %v983_v19, %v991_v20  ;;  %v5940_v19 = vld [vmem:[%s6871_s1 + $0x14] ss:$8 sps:$4 sm:$0xff]  }
 0x3ba   : > { %2752 = vmatpush1.bf16.msra.mxu0 %v5207_v30  ;;  %2712 = vmatprep.subr.bf16.mxu1 %v5446_v31  ;;  %v5334_v30 = vcombine.high %v966_v24, %v974_v25  ;;  %v5336_v31 = vcombine.high %v967_v26, %v975_v27  ;;  %v5943_v20 = vld [vmem:[%s6871_s1 + $0x114] ss:$8 sps:$4 sm:$0xff]  }
 0x3bb   : > { %2753 = vmatprep.subr.bf16.mxu0 %v5448_v32  ;;  %v5333_v32 = vcombine.low %v966_v24, %v974_v25  ;;  %v5944_v24 = vld [vmem:[%s6871_s1] ss:$8 sps:$4 sm:$0xff]   ;;  %v5952_v26 = vld [vmem:[%s6871_s1 + $0xf4] ss:$8 sps:$4 sm:$0xff]  }
 0x3bc   : > { %v5947_v25 = vld [vmem:[%s6871_s1 + $0x100] ss:$8 sps:$4 sm:$0xff]   ;;  %v5955_v27 = vld [vmem:[%s6871_s1 + $0x1f4] ss:$8 sps:$4 sm:$0xff]  }
 0x3bd   : > { %2713 = vmatpush2.bf16.msra.mxu1 %v5445_v37  ;;  %v5902_v37 = vld [vmem:[%s6871_s1 + $0x70] ss:$8 sps:$4 sm:$0xff]  }
 0x3be   : > { %2754 = vmatpush2.bf16.msra.mxu0 %v5447_v38  ;;  %2714 = vmatprep.subr.bf16.mxu1 %v5430_v39  ;;  %v5905_v38 = vld [vmem:[%s6871_s1 + $0x170] ss:$8 sps:$4 sm:$0xff]   ;;  %v7245_v39 = vld [vmem:[%s6877_s8 + $0x6] sm:$0xff] }
 0x3bf   : > { %2755 = vmatprep.subr.bf16.mxu0 %v5432_v40  ;;  %v5910_v40 = vld [vmem:[%s6871_s1 + $0x64] ss:$8 sps:$4 sm:$0xff]   ;;  %v1097_v41 = vrot.slane %v7245_v39, %v6927_v45  ;;  %v1105_v42 = vrot.slane %v7245_v39, %v1104_v36 }
 0x3c1   : > { %2715 = vmatpush2.bf16.msra.mxu1 %v5429_v47 }
 0x3c2   : > { %2756 = vmatpush2.bf16.msra.mxu0 %v5431_v48  ;;  %2716 = vmatprep.subr.bf16.mxu1 %v5414_v49  ;;  %v5908_v48 = vld [vmem:[%s6871_s1 + $0x60] ss:$8 sps:$4 sm:$0xff]  }
 0x3c3   : > { %2757 = vmatprep.subr.bf16.mxu0 %v5416_v50 }
 0x3c5   : > { %2717 = vmatpush2.bf16.msra.mxu1 %v5413_v55  ;;  %v5919_v55 = vld [vmem:[%s6871_s1 + $0x154] ss:$8 sps:$4 sm:$0xff]  }
 0x3c6   : > { %2758 = vmatpush2.bf16.msra.mxu0 %v5415_v56  ;;  %2718 = vmatprep.subr.bf16.mxu1 %v5398_v58 }
 0x3c7   : > { %2759 = vmatprep.subr.bf16.mxu0 %v5400_v59 }
 0x3c9   : > { %2719 = vmatpush2.bf16.msra.mxu1 %v5397_v1 }
 0x3ca   : > { %2760 = vmatpush2.bf16.msra.mxu0 %v5399_v2  ;;  %2720 = vmatprep.subr.bf16.mxu1 %v5382_v3  ;;  %v5922_v3 = vld [vmem:[%s6871_s1 + $0x44] ss:$8 sps:$4 sm:$0xff]  }
 0x3cb   : > { %2761 = vmatprep.subr.bf16.mxu0 %v5384_v4  ;;  %v5925_v4 = vld [vmem:[%s6871_s1 + $0x144] ss:$8 sps:$4 sm:$0xff]  }
 0x3cd   : > { %2721 = vmatpush2.bf16.msra.mxu1 %v5381_v10  ;;  %v5926_v10 = vld [vmem:[%s6871_s1 + $0x30] ss:$8 sps:$4 sm:$0xff]  }
 0x3ce   : > { %2762 = vmatpush2.bf16.msra.mxu0 %v5383_v12  ;;  %2722 = vmatprep.subr.bf16.mxu1 %v5366_v13  ;;  %v5929_v12 = vld [vmem:[%s6871_s1 + $0x130] ss:$8 sps:$4 sm:$0xff]   ;;  %v5934_v13 = vld [vmem:[%s6871_s1 + $0x24] ss:$8 sps:$4 sm:$0xff]  }
 0x3cf   : > { %2763 = vmatprep.subr.bf16.mxu0 %v5368_v15  ;;  %v5937_v15 = vld [vmem:[%s6871_s1 + $0x124] ss:$8 sps:$4 sm:$0xff]  }
 0x3d1   : > { %2723 = vmatpush2.bf16.msra.mxu1 %v5365_v21  ;;  %v5938_v21 = vld [vmem:[%s6871_s1 + $0x10] ss:$8 sps:$4 sm:$0xff]  }
 0x3d2   : > { %2764 = vmatpush2.bf16.msra.mxu0 %v5367_v57  ;;  %2724 = vmatprep.subr.bf16.mxu1 %v5350_v22  ;;  %v5941_v57 = vld [vmem:[%s6871_s1 + $0x110] ss:$8 sps:$4 sm:$0xff]   ;;  %v5946_v22 = vld [vmem:[%s6871_s1 + $0x4] ss:$8 sps:$4 sm:$0xff]  }
 0x3d3   : > { %2765 = vmatprep.subr.bf16.mxu0 %v5352_v23  ;;  %v5949_v23 = vld [vmem:[%s6871_s1 + $0x104] ss:$8 sps:$4 sm:$0xff]  }
 0x3d5   : > { %2725 = vmatpush2.bf16.msra.mxu1 %v5349_v28  ;;  %v5950_v28 = vld [vmem:[%s6871_s1 + $0xf0] ss:$8 sps:$4 sm:$0xff]  }
 0x3d6   : > { %2766 = vmatpush2.bf16.msra.mxu0 %v5351_v29  ;;  %2726 = vmatprep.subr.bf16.mxu1 %v5334_v30  ;;  %v5953_v29 = vld [vmem:[%s6871_s1 + $0x1f0] ss:$8 sps:$4 sm:$0xff]   ;;  %v5958_v30 = vld [vmem:[%s6871_s1 + $0xe4] ss:$8 sps:$4 sm:$0xff]  }
 0x3d7   : > { %2767 = vmatprep.subr.bf16.mxu0 %v5336_v31  ;;  %v5961_v31 = vld [vmem:[%s6871_s1 + $0x1e4] ss:$8 sps:$4 sm:$0xff]  }
 0x3d9   : > { %2727 = vmatpush2.bf16.msra.mxu1 %v5333_v32  ;;  %v5956_v32 = vld [vmem:[%s6871_s1 + $0xe0] ss:$8 sps:$4 sm:$0xff]  }
 0x3da   : > { %2768 = vmatpush2.bf16.msra.mxu0 %v5335_v33  ;;  %4357 = vmatprep.subr.bf16.mxu1 %v5904_v34  ;;  %v5959_v33 = vld [vmem:[%s6871_s1 + $0x1e0] ss:$8 sps:$4 sm:$0xff]   ;;  %v5964_v34 = vld [vmem:[%s6871_s1 + $0xd4] ss:$8 sps:$4 sm:$0xff]  }
 0x3db   : > { %4398 = vmatprep.subr.bf16.mxu0 %v5907_v35  ;;  %v5967_v35 = vld [vmem:[%s6871_s1 + $0x1d4] ss:$8 sps:$4 sm:$0xff]  }
 0x3dc   : > { %2729 = vmatmul.mubr.bf16.vlgmr.msra.gmra.mxu1 %v7039_v61  ;;  %v7255_v46 = vpop.f32.mrf.mxu1  ;;  %v7257_v47 = vpop.f32.mrf.mxu0 }
 0x3dd   : > { %2770 = vmatmul.mubr.bf16.vlgmr.msra.gmra.mxu0 %v7039_v61  ;;  %4358 = vmatpush1.bf16.msra.mxu1 %v5902_v37  ;;  %v5962_v37 = vld [vmem:[%s6871_s1 + $0xd0] ss:$8 sps:$4 sm:$0xff]  }
 0x3de   : > { %4399 = vmatpush1.bf16.msra.mxu0 %v5905_v38  ;;  %v2486_v49 = vpop.f32.mrf.mxu1  ;;  %v2527_v50 = vpop.f32.mrf.mxu0  ;;  %4359 = vmatprep.subr.bf16.mxu1 %v5910_v40  ;;  %v5965_v38 = vld [vmem:[%s6871_s1 + $0x1d0] ss:$8 sps:$4 sm:$0xff]   ;;  %v5970_v40 = vld [vmem:[%s6871_s1 + $0xc4] ss:$8 sps:$4 sm:$0xff]  }
 0x3df   : > { %v2487_v53 = vadd.f32 %v2486_v49, %v1097_v41  ;;  %v2528_v54 = vadd.f32 %v2527_v50, %v1105_v42  ;;  %4400 = vmatprep.subr.bf16.mxu0 %v5913_v43  ;;  %v5973_v41 = vld [vmem:[%s6871_s1 + $0x1c4] ss:$8 sps:$4 sm:$0xff]   ;;  %v5968_v42 = vld [vmem:[%s6871_s1 + $0xc0] ss:$8 sps:$4 sm:$0xff]   ;;  %v5979_v49 = vld [vmem:[%s6871_s1 + $0x1b4] ss:$8 sps:$4 sm:$0xff]  }
 0x3e0   : > { %v2488_v56 = vpop.f32.mrf.mxu1  ;;  %v2529_v58 = vpop.f32.mrf.mxu0  ;;  %v5971_v43 = vld [vmem:[%s6871_s1 + $0x1c0] ss:$8 sps:$4 sm:$0xff]   ;;  %v5974_v50 = vld [vmem:[%s6871_s1 + $0xb0] ss:$8 sps:$4 sm:$0xff]  }
 0x3e1   : > { %v2779_v59 = vmax.f32 %v2487_v53, 0.0  ;;  %v2781_v61 = vmax.f32 %v2528_v54, 0.0  ;;  %4360 = vmatpush1.bf16.msra.mxu1 %v5908_v48  ;;  %v5976_v48 = vld [vmem:[%s6871_s1 + $0xb4] ss:$8 sps:$4 sm:$0xff]   ;;  %v1100_v53 = vsub.s32 2, %v6894_v14  ;;  %v1093_v56 = vrot.slane %v7245_v39, %v6924_v44 }
 0x3e2   : > { %4401 = vmatpush1.bf16.msra.mxu0 %v5911_v60  ;;  %v2489_v11 = vpop.f32.mrf.mxu1  ;;  %v2530_v63 = vpop.f32.mrf.mxu0  ;;  %4361 = vmatprep.subr.bf16.mxu1 %v5916_v51  ;;  %v5977_v60 = vld [vmem:[%s6871_s1 + $0x1b0] ss:$8 sps:$4 sm:$0xff]   ;;  %v5982_v51 = vld [vmem:[%s6871_s1 + $0xa4] ss:$8 sps:$4 sm:$0xff]   ;;  %v5983_v58 = vld [vmem:[%s6871_s1 + $0x1a0] ss:$8 sps:$4 sm:$0xff]  }
 0x3e3   : > { %v2795_v1 = vpack.c.bf16 %v2779_v59, %v2779_v59  ;;  %v2797_v2 = vpack.c.bf16 %v2781_v61, %v2781_v61  ;;  %4402 = vmatprep.subr.bf16.mxu0 %v5919_v55  ;;  %v5985_v54 = vld [vmem:[%s6871_s1 + $0x1a4] ss:$8 sps:$4 sm:$0xff]   ;;  %v5980_v55 = vld [vmem:[%s6871_s1 + $0xa0] ss:$8 sps:$4 sm:$0xff]   ;;  %v5988_v59 = vld [vmem:[%s6871_s1 + $0x94] ss:$8 sps:$4 sm:$0xff]   ;;  %v1101_v61 = vrot.slane %v7245_v39, %v1100_v53  ;;  %v2485_v63 = vadd.f32 %v7255_v46, %v1093_v56 }
 0x3e4   : > { %v5986_v11 = vld [vmem:[%s6871_s1 + $0x90] ss:$8 sps:$4 sm:$0xff]   ;;  %v6030_v56 = vld [vmem:[%s6871_s1 + $0x224] ss:$8 sps:$4 sm:$0xff]  }
 0x3e5   : > { %4362 = vmatpush1.bf16.msra.mxu1 %v5914_v62  ;;  %4389 = vmatprep.mubr.bf16.mxu1 %v2795_v1  ;;  %v5991_v62 = vld [vmem:[%s6871_s1 + $0x194] ss:$8 sps:$4 sm:$0xff]   ;;  %v5994_v1 = vld [vmem:[%s6871_s1 + $0x84] ss:$8 sps:$4 sm:$0xff]  }
 0x3e6   : > { %4403 = vmatpush1.bf16.msra.mxu0 %v5917_v0  ;;  %4430 = vmatprep.mubr.bf16.mxu0 %v2797_v2  ;;  %v5989_v0 = vld [vmem:[%s6871_s1 + $0x190] ss:$8 sps:$4 sm:$0xff]   ;;  %v2526_v2 = vadd.f32 %v7257_v47, %v1101_v61  ;;  %v1120_v47 = vsub.s32 7, %v6894_v14  ;;  %v6031_v61 = vld [vmem:[%s6871_s1 + $0x320] ss:$8 sps:$4 sm:$0xff]  }
 0x3e7   : > { %4363 = vmatprep.subr.bf16.mxu1 %v5922_v3  ;;  %4404 = vmatprep.subr.bf16.mxu0 %v5925_v4  ;;  %v5997_v3 = vld [vmem:[%s6871_s1 + $0x184] ss:$8 sps:$4 sm:$0xff]   ;;  %v5992_v4 = vld [vmem:[%s6871_s1 + $0x80] ss:$8 sps:$4 sm:$0xff]  }
 0x3e8   : > { %v2780_v46 = vmax.f32 %v2526_v2, 0.0  ;;  %v6045_v2 = vld [vmem:[%s6871_s1 + $0x304] ss:$8 sps:$4 sm:$0xff]  }
 0x3e9   : > { %4364 = vmatpush1.bf16.msra.mxu1 %v5920_v5  ;;  %v2778_v5 = vmax.f32 %v2485_v63, 0.0  ;;  %v6034_v63 = vld [vmem:[%s6871_s1 + $0x210] ss:$8 sps:$4 sm:$0xff]  }
 0x3ea   : > { %4405 = vmatpush1.bf16.msra.mxu0 %v5923_v6  ;;  %4365 = vmatprep.subr.bf16.mxu1 %v5928_v8  ;;  %v5995_v6 = vld [vmem:[%s6871_s1 + $0x180] ss:$8 sps:$4 sm:$0xff]   ;;  %v6000_v8 = vld [vmem:[%s6871_s1 + $0x274] ss:$8 sps:$4 sm:$0xff]  }
 0x3eb   : > { %4406 = vmatprep.subr.bf16.mxu0 %v5931_v9  ;;  %v6003_v9 = vld [vmem:[%s6871_s1 + $0x374] ss:$8 sps:$4 sm:$0xff]  }
 0x3ed   : > { %4366 = vmatpush1.bf16.msra.mxu1 %v5926_v10  ;;  %v1112_v10 = vsub.s32 5, %v6894_v14 }
 0x3ee   : > { %4407 = vmatpush1.bf16.msra.mxu0 %v5929_v12  ;;  %4367 = vmatprep.subr.bf16.mxu1 %v5934_v13  ;;  %v5998_v12 = vld [vmem:[%s6871_s1 + $0x270] ss:$8 sps:$4 sm:$0xff]   ;;  %v2794_v13 = vpack.c.bf16 %v2778_v5, %v2778_v5  ;;  %v6048_v5 = vld [vmem:[%s6871_s1 + $0x2f4] ss:$8 sps:$4 sm:$0xff]  }
 0x3ef   : > { %4408 = vmatprep.subr.bf16.mxu0 %v5937_v15  ;;  %v6001_v15 = vld [vmem:[%s6871_s1 + $0x370] ss:$8 sps:$4 sm:$0xff]  }
 0x3f1   : > { %4368 = vmatpush1.bf16.msra.mxu1 %v5932_v16  ;;  %v6006_v16 = vld [vmem:[%s6871_s1 + $0x264] ss:$8 sps:$4 sm:$0xff]  }
 0x3f2   : > { %4409 = vmatpush1.bf16.msra.mxu0 %v5935_v18  ;;  %4369 = vmatprep.subr.bf16.mxu1 %v5940_v19  ;;  %v2796_v18 = vpack.c.bf16 %v2780_v46, %v2780_v46  ;;  %v1113_v19 = vrot.slane %v7245_v39, %v1112_v10  ;;  %v6049_v46 = vld [vmem:[%s6871_s1 + $0x3f0] ss:$8 sps:$4 sm:$0xff]  }
 0x3f3   : > { %4410 = vmatprep.subr.bf16.mxu0 %v5943_v20  ;;  %v1121_v20 = vrot.slane %v7245_v39, %v1120_v47 }
 0x3f5   : > { %4370 = vmatpush1.bf16.msra.mxu1 %v5938_v21  ;;  %v6009_v21 = vld [vmem:[%s6871_s1 + $0x364] ss:$8 sps:$4 sm:$0xff]  }
 0x3f6   : > { %4411 = vmatpush1.bf16.msra.mxu0 %v5941_v57  ;;  %4371 = vmatprep.subr.bf16.mxu1 %v5946_v22 }
 0x3f7   : > { %4412 = vmatprep.subr.bf16.mxu0 %v5949_v23  ;;  %v6004_v23 = vld [vmem:[%s6871_s1 + $0x260] ss:$8 sps:$4 sm:$0xff]  }
 0x3f9   : > { %4372 = vmatpush1.bf16.msra.mxu1 %v5944_v24 }
 0x3fa   : > { %4413 = vmatpush1.bf16.msra.mxu0 %v5947_v25  ;;  %4373 = vmatprep.subr.bf16.mxu1 %v5952_v26  ;;  %v6007_v26 = vld [vmem:[%s6871_s1 + $0x360] ss:$8 sps:$4 sm:$0xff]  }
 0x3fb   : > { %4414 = vmatprep.subr.bf16.mxu0 %v5955_v27  ;;  %v6012_v27 = vld [vmem:[%s6871_s1 + $0x254] ss:$8 sps:$4 sm:$0xff]  }
 0x3fd   : > { %4374 = vmatpush2.bf16.msra.mxu1 %v5950_v28 }
 0x3fe   : > { %4415 = vmatpush2.bf16.msra.mxu0 %v5953_v29  ;;  %4375 = vmatprep.subr.bf16.mxu1 %v5958_v30  ;;  %v6015_v30 = vld [vmem:[%s6871_s1 + $0x354] ss:$8 sps:$4 sm:$0xff]  }
 0x3ff   : > { %4416 = vmatprep.subr.bf16.mxu0 %v5961_v31 }
 0x401   : > { %4376 = vmatpush2.bf16.msra.mxu1 %v5956_v32 }
 0x402   : > { %4417 = vmatpush2.bf16.msra.mxu0 %v5959_v33  ;;  %4377 = vmatprep.subr.bf16.mxu1 %v5964_v34 }
 0x403   : > { %4418 = vmatprep.subr.bf16.mxu0 %v5967_v35  ;;  %v6010_v35 = vld [vmem:[%s6871_s1 + $0x250] ss:$8 sps:$4 sm:$0xff]  }
 0x405   : > { %4378 = vmatpush2.bf16.msra.mxu1 %v5962_v37 }
 0x406   : > { %4419 = vmatpush2.bf16.msra.mxu0 %v5965_v38  ;;  %4379 = vmatprep.subr.bf16.mxu1 %v5970_v40  ;;  %v6013_v40 = vld [vmem:[%s6871_s1 + $0x350] ss:$8 sps:$4 sm:$0xff]  }
 0x407   : > { %4420 = vmatprep.subr.bf16.mxu0 %v5973_v41 }
 0x409   : > { %4380 = vmatpush2.bf16.msra.mxu1 %v5968_v42 }
 0x40a   : > { %4421 = vmatpush2.bf16.msra.mxu0 %v5971_v43  ;;  %4381 = vmatprep.subr.bf16.mxu1 %v5976_v48  ;;  %v6018_v43 = vld [vmem:[%s6871_s1 + $0x244] ss:$8 sps:$4 sm:$0xff]  }
 0x40b   : > { %4422 = vmatprep.subr.bf16.mxu0 %v5979_v49  ;;  %v6021_v48 = vld [vmem:[%s6871_s1 + $0x344] ss:$8 sps:$4 sm:$0xff]   ;;  %v6016_v49 = vld [vmem:[%s6871_s1 + $0x240] ss:$8 sps:$4 sm:$0xff]  }
 0x40d   : > { %4382 = vmatpush2.bf16.msra.mxu1 %v5974_v50  ;;  %v6019_v50 = vld [vmem:[%s6871_s1 + $0x340] ss:$8 sps:$4 sm:$0xff]  }
 0x40e   : > { %4423 = vmatpush2.bf16.msra.mxu0 %v5977_v60  ;;  %4383 = vmatprep.subr.bf16.mxu1 %v5982_v51  ;;  %v6024_v60 = vld [vmem:[%s6871_s1 + $0x234] ss:$8 sps:$4 sm:$0xff]  }
 0x40f   : > { %4424 = vmatprep.subr.bf16.mxu0 %v5985_v54  ;;  %v6027_v51 = vld [vmem:[%s6871_s1 + $0x334] ss:$8 sps:$4 sm:$0xff]   ;;  %v6022_v54 = vld [vmem:[%s6871_s1 + $0x230] ss:$8 sps:$4 sm:$0xff]  }
 0x411   : > { %4384 = vmatpush2.bf16.msra.mxu1 %v5980_v55  ;;  %v6025_v55 = vld [vmem:[%s6871_s1 + $0x330] ss:$8 sps:$4 sm:$0xff]  }
 0x412   : > { %4425 = vmatpush2.bf16.msra.mxu0 %v5983_v58  ;;  %4385 = vmatprep.subr.bf16.mxu1 %v5988_v59  ;;  %v6033_v58 = vld [vmem:[%s6871_s1 + $0x324] ss:$8 sps:$4 sm:$0xff]   ;;  %v6028_v59 = vld [vmem:[%s6871_s1 + $0x220] ss:$8 sps:$4 sm:$0xff]  }
 0x413   : > { %4426 = vmatprep.subr.bf16.mxu0 %v5991_v62  ;;  %v6036_v62 = vld [vmem:[%s6871_s1 + $0x214] ss:$8 sps:$4 sm:$0xff]  }
 0x415   : > { %4386 = vmatpush2.bf16.msra.mxu1 %v5986_v11  ;;  %v6039_v11 = vld [vmem:[%s6871_s1 + $0x314] ss:$8 sps:$4 sm:$0xff]  }
 0x416   : > { %4427 = vmatpush2.bf16.msra.mxu0 %v5989_v0  ;;  %4387 = vmatprep.subr.bf16.mxu1 %v5994_v1  ;;  %v6037_v0 = vld [vmem:[%s6871_s1 + $0x310] ss:$8 sps:$4 sm:$0xff]   ;;  %v6042_v1 = vld [vmem:[%s6871_s1 + $0x204] ss:$8 sps:$4 sm:$0xff]  }
 0x417   : > { %4428 = vmatprep.subr.bf16.mxu0 %v5997_v3  ;;  %v6040_v3 = vld [vmem:[%s6871_s1 + $0x200] ss:$8 sps:$4 sm:$0xff]  }
 0x419   : > { %4388 = vmatpush2.bf16.msra.mxu1 %v5992_v4  ;;  %v6043_v4 = vld [vmem:[%s6871_s1 + $0x300] ss:$8 sps:$4 sm:$0xff]  }
 0x41a   : > { %4429 = vmatpush2.bf16.msra.mxu0 %v5995_v6  ;;  %4439 = vmatprep.subr.bf16.mxu1 %v6000_v8  ;;  %v6051_v6 = vld [vmem:[%s6871_s1 + $0x3f4] ss:$8 sps:$4 sm:$0xff]   ;;  %v6046_v8 = vld [vmem:[%s6871_s1 + $0x2f0] ss:$8 sps:$4 sm:$0xff]  }
 0x41b   : > { %4480 = vmatprep.subr.bf16.mxu0 %v6003_v9  ;;  %v6054_v9 = vld [vmem:[%s6871_s1 + $0x2e4] ss:$8 sps:$4 sm:$0xff]  }
 0x41c   : > { %v7340_v57 = vpop.f32.mrf.mxu1  ;;  %v7342_v22 = vpop.f32.mrf.mxu0  ;;  %4390 = vmatmul.mubr.bf16.vlgmr.msra.gmra.mxu1 %v2794_v13  ;;  %v6052_v13 = vld [vmem:[%s6871_s1 + $0x2e0] ss:$8 sps:$4 sm:$0xff]  }
 0x41d   : > { %4431 = vmatmul.mubr.bf16.vlgmr.msra.gmra.mxu0 %v2796_v18  ;;  %4440 = vmatpush1.bf16.msra.mxu1 %v5998_v12  ;;  %v6057_v12 = vld [vmem:[%s6871_s1 + $0x3e4] ss:$8 sps:$4 sm:$0xff]   ;;  %v6063_v18 = vld [vmem:[%s6871_s1 + $0x3d4] ss:$8 sps:$4 sm:$0xff]  }
 0x41e   : > { %4481 = vmatpush1.bf16.msra.mxu0 %v6001_v15  ;;  %v2568_v24 = vpop.f32.mrf.mxu1  ;;  %v2609_v25 = vpop.f32.mrf.mxu0  ;;  %4441 = vmatprep.subr.bf16.mxu1 %v6006_v16  ;;  %v6055_v15 = vld [vmem:[%s6871_s1 + $0x3e0] ss:$8 sps:$4 sm:$0xff]   ;;  %v6060_v16 = vld [vmem:[%s6871_s1 + $0x2d4] ss:$8 sps:$4 sm:$0xff]  }
 0x41f   : > { %v2569_v28 = vadd.f32 %v2568_v24, %v1113_v19  ;;  %v2610_v29 = vadd.f32 %v2609_v25, %v1121_v20  ;;  %4482 = vmatprep.subr.bf16.mxu0 %v6009_v21  ;;  %v6058_v19 = vld [vmem:[%s6871_s1 + $0x2d0] ss:$8 sps:$4 sm:$0xff]   ;;  %v6066_v21 = vld [vmem:[%s6871_s1 + $0x2c4] ss:$8 sps:$4 sm:$0xff]   ;;  %v6064_v24 = vld [vmem:[%s6871_s1 + $0x2c0] ss:$8 sps:$4 sm:$0xff]  }
 0x420   : > { %v2570_v31 = vpop.f32.mrf.mxu1  ;;  %v2611_v32 = vpop.f32.mrf.mxu0  ;;  %v6061_v20 = vld [vmem:[%s6871_s1 + $0x3d0] ss:$8 sps:$4 sm:$0xff]   ;;  %v6067_v25 = vld [vmem:[%s6871_s1 + $0x3c0] ss:$8 sps:$4 sm:$0xff]  }
 0x421   : > { %v2783_v33 = vmax.f32 %v2569_v28, 0.0  ;;  %v2785_v34 = vmax.f32 %v2610_v29, 0.0  ;;  %4442 = vmatpush1.bf16.msra.mxu1 %v6004_v23  ;;  %v6069_v23 = vld [vmem:[%s6871_s1 + $0x3c4] ss:$8 sps:$4 sm:$0xff]   ;;  %v6070_v28 = vld [vmem:[%s6871_s1 + $0x2b0] ss:$8 sps:$4 sm:$0xff]  }
 0x422   : > { %4483 = vmatpush1.bf16.msra.mxu0 %v6007_v26  ;;  %v2571_v37 = vpop.f32.mrf.mxu1  ;;  %v2612_v38 = vpop.f32.mrf.mxu0  ;;  %4443 = vmatprep.subr.bf16.mxu1 %v6012_v27  ;;  %v6072_v26 = vld [vmem:[%s6871_s1 + $0x2b4] ss:$8 sps:$4 sm:$0xff]   ;;  %v1108_v29 = vsub.s32 4, %v6894_v14  ;;  %v6078_v31 = vld [vmem:[%s6871_s1 + $0x2a4] ss:$8 sps:$4 sm:$0xff]   ;;  %v1116_v32 = vsub.s32 6, %v6894_v14 }
 0x423   : > { %v2799_v41 = vpack.c.bf16 %v2783_v33, %v2783_v33  ;;  %v2801_v42 = vpack.c.bf16 %v2785_v34, %v2785_v34  ;;  %4484 = vmatprep.subr.bf16.mxu0 %v6015_v30  ;;  %v6075_v27 = vld [vmem:[%s6871_s1 + $0x3b4] ss:$8 sps:$4 sm:$0xff]   ;;  %v6073_v30 = vld [vmem:[%s6871_s1 + $0x3b0] ss:$8 sps:$4 sm:$0xff]   ;;  %v6081_v33 = vld [vmem:[%s6871_s1 + $0x3a4] ss:$8 sps:$4 sm:$0xff]  }
 0x424   : > { %v6076_v34 = vld [vmem:[%s6871_s1 + $0x2a0] ss:$8 sps:$4 sm:$0xff]   ;;  %v6084_v38 = vld [vmem:[%s6871_s1 + $0x294] ss:$8 sps:$4 sm:$0xff]  }
 0x425   : > { %4444 = vmatpush1.bf16.msra.mxu1 %v6010_v35  ;;  %4471 = vmatprep.mubr.bf16.mxu1 %v2799_v41  ;;  %v1109_v35 = vrot.slane %v7245_v39, %v1108_v29  ;;  %v6079_v37 = vld [vmem:[%s6871_s1 + $0x3a0] ss:$8 sps:$4 sm:$0xff]   ;;  %v6087_v41 = vld [vmem:[%s6871_s1 + $0x394] ss:$8 sps:$4 sm:$0xff]  }
 0x426   : > { %4485 = vmatpush1.bf16.msra.mxu0 %v6013_v40  ;;  %4512 = vmatprep.mubr.bf16.mxu0 %v2801_v42  ;;  %v1117_v40 = vrot.slane %v7245_v39, %v1116_v32  ;;  %v6082_v42 = vld [vmem:[%s6871_s1 + $0x290] ss:$8 sps:$4 sm:$0xff]   ;;  %v6088_v39 = vld [vmem:[%s6871_s1 + $0x280] ss:$8 sps:$4 sm:$0xff]  }
 0x427   : > { %4445 = vmatprep.subr.bf16.mxu1 %v6018_v43  ;;  %4486 = vmatprep.subr.bf16.mxu0 %v6021_v48  ;;  %v2567_v43 = vadd.f32 %v7340_v57, %v1109_v35  ;;  %v6085_v48 = vld [vmem:[%s6871_s1 + $0x390] ss:$8 sps:$4 sm:$0xff]   ;;  %v6096_v57 = vld [vmem:[%s6871_s1 + $0x474] ss:$8 sps:$4 sm:$0xff]   ;;  %v6280_v14 = vld [vmem:[%s6871_s1 + $0x680] ss:$8 sps:$4 sm:$0xff]  }
 0x428   : > { %v6121_v35 = vld [vmem:[%s6871_s1 + $0x530] ss:$8 sps:$4 sm:$0xff]  }
 0x429   : > { %4446 = vmatpush1.bf16.msra.mxu1 %v6016_v49  ;;  %v6090_v49 = vld [vmem:[%s6871_s1 + $0x284] ss:$8 sps:$4 sm:$0xff]  }
 0x42a   : > { %4487 = vmatpush1.bf16.msra.mxu0 %v6019_v50  ;;  %4447 = vmatprep.subr.bf16.mxu1 %v6024_v60  ;;  %v2608_v50 = vadd.f32 %v7342_v22, %v1117_v40  ;;  %v6093_v60 = vld [vmem:[%s6871_s1 + $0x384] ss:$8 sps:$4 sm:$0xff]   ;;  %v6124_v40 = vld [vmem:[%s6871_s1 + $0x420] ss:$8 sps:$4 sm:$0xff]  }
 0x42b   : > { %4488 = vmatprep.subr.bf16.mxu0 %v6027_v51  ;;  %v2782_v51 = vmax.f32 %v2567_v43, 0.0  ;;  %v7416_v22 = vld [vmem:[%s6877_s8 + $0xe] sm:$0xff] }
 0x42c   : > { %v6135_v43 = vld [vmem:[%s6871_s1 + $0x514] ss:$8 sps:$4 sm:$0xff]  }
 0x42d   : > { %4448 = vmatpush1.bf16.msra.mxu1 %v6022_v54  ;;  %v6091_v54 = vld [vmem:[%s6871_s1 + $0x380] ss:$8 sps:$4 sm:$0xff]  }
 0x42e   : > { %4489 = vmatpush1.bf16.msra.mxu0 %v6025_v55  ;;  %4449 = vmatprep.subr.bf16.mxu1 %v6030_v56  ;;  %v2784_v55 = vmax.f32 %v2608_v50, 0.0  ;;  %v6099_v56 = vld [vmem:[%s6871_s1 + $0x574] ss:$8 sps:$4 sm:$0xff]   ;;  %v6138_v50 = vld [vmem:[%s6871_s1 + $0x404] ss:$8 sps:$4 sm:$0xff]  }
 0x42f   : > { %4490 = vmatprep.subr.bf16.mxu0 %v6033_v58  ;;  %v6094_v58 = vld [vmem:[%s6871_s1 + $0x470] ss:$8 sps:$4 sm:$0xff]  }
 0x431   : > { %4450 = vmatpush1.bf16.msra.mxu1 %v6028_v59  ;;  %v2798_v59 = vpack.c.bf16 %v2782_v51, %v2782_v51  ;;  %v6139_v51 = vld [vmem:[%s6871_s1 + $0x500] ss:$8 sps:$4 sm:$0xff]  }
 0x432   : > { %4491 = vmatpush1.bf16.msra.mxu0 %v6031_v61  ;;  %4451 = vmatprep.subr.bf16.mxu1 %v6036_v62  ;;  %v6097_v61 = vld [vmem:[%s6871_s1 + $0x570] ss:$8 sps:$4 sm:$0xff]   ;;  %v6102_v62 = vld [vmem:[%s6871_s1 + $0x464] ss:$8 sps:$4 sm:$0xff]  }
 0x433   : > { %4492 = vmatprep.subr.bf16.mxu0 %v6039_v11  ;;  %v2800_v11 = vpack.c.bf16 %v2784_v55, %v2784_v55  ;;  %v6142_v55 = vld [vmem:[%s6871_s1 + $0x4f0] ss:$8 sps:$4 sm:$0xff]  }
 0x435   : > { %4452 = vmatpush1.bf16.msra.mxu1 %v6034_v63  ;;  %v1129_v63 = vrot.slane %v7416_v22, %v6927_v45 }
 0x436   : > { %4493 = vmatpush1.bf16.msra.mxu0 %v6037_v0  ;;  %4453 = vmatprep.subr.bf16.mxu1 %v6042_v1  ;;  %v6105_v0 = vld [vmem:[%s6871_s1 + $0x564] ss:$8 sps:$4 sm:$0xff]  }
 0x437   : > { %4494 = vmatprep.subr.bf16.mxu0 %v6045_v2  ;;  %v1137_v2 = vrot.slane %v7416_v22, %v1104_v36 }
 0x439   : > { %4454 = vmatpush1.bf16.msra.mxu1 %v6040_v3 }
 0x43a   : > { %4495 = vmatpush1.bf16.msra.mxu0 %v6043_v4  ;;  %4455 = vmatprep.subr.bf16.mxu1 %v6048_v5  ;;  %v6100_v4 = vld [vmem:[%s6871_s1 + $0x460] ss:$8 sps:$4 sm:$0xff]  }
 0x43b   : > { %4496 = vmatprep.subr.bf16.mxu0 %v6051_v6  ;;  %v6103_v6 = vld [vmem:[%s6871_s1 + $0x560] ss:$8 sps:$4 sm:$0xff]  }
 0x43d   : > { %4456 = vmatpush2.bf16.msra.mxu1 %v6046_v8  ;;  %v6108_v8 = vld [vmem:[%s6871_s1 + $0x454] ss:$8 sps:$4 sm:$0xff]  }
 0x43e   : > { %4497 = vmatpush2.bf16.msra.mxu0 %v6049_v46  ;;  %4457 = vmatprep.subr.bf16.mxu1 %v6054_v9 }
 0x43f   : > { %4498 = vmatprep.subr.bf16.mxu0 %v6057_v12  ;;  %v6111_v12 = vld [vmem:[%s6871_s1 + $0x554] ss:$8 sps:$4 sm:$0xff]  }
 0x441   : > { %4458 = vmatpush2.bf16.msra.mxu1 %v6052_v13 }
 0x442   : > { %4499 = vmatpush2.bf16.msra.mxu0 %v6055_v15  ;;  %4459 = vmatprep.subr.bf16.mxu1 %v6060_v16 }
 0x443   : > { %4500 = vmatprep.subr.bf16.mxu0 %v6063_v18  ;;  %v6106_v18 = vld [vmem:[%s6871_s1 + $0x450] ss:$8 sps:$4 sm:$0xff]  }
 0x445   : > { %4460 = vmatpush2.bf16.msra.mxu1 %v6058_v19 }
 0x446   : > { %4501 = vmatpush2.bf16.msra.mxu0 %v6061_v20  ;;  %4461 = vmatprep.subr.bf16.mxu1 %v6066_v21  ;;  %v6109_v21 = vld [vmem:[%s6871_s1 + $0x550] ss:$8 sps:$4 sm:$0xff]  }
 0x447   : > { %4502 = vmatprep.subr.bf16.mxu0 %v6069_v23 }
 0x449   : > { %4462 = vmatpush2.bf16.msra.mxu1 %v6064_v24 }
 0x44a   : > { %4503 = vmatpush2.bf16.msra.mxu0 %v6067_v25  ;;  %4463 = vmatprep.subr.bf16.mxu1 %v6072_v26  ;;  %v6114_v25 = vld [vmem:[%s6871_s1 + $0x444] ss:$8 sps:$4 sm:$0xff]  }
 0x44b   : > { %4504 = vmatprep.subr.bf16.mxu0 %v6075_v27  ;;  %v6117_v26 = vld [vmem:[%s6871_s1 + $0x544] ss:$8 sps:$4 sm:$0xff]  }
 0x44d   : > { %4464 = vmatpush2.bf16.msra.mxu1 %v6070_v28  ;;  %v6112_v28 = vld [vmem:[%s6871_s1 + $0x440] ss:$8 sps:$4 sm:$0xff]  }
 0x44e   : > { %4505 = vmatpush2.bf16.msra.mxu0 %v6073_v30  ;;  %4465 = vmatprep.subr.bf16.mxu1 %v6078_v31  ;;  %v6115_v30 = vld [vmem:[%s6871_s1 + $0x540] ss:$8 sps:$4 sm:$0xff]   ;;  %v6120_v31 = vld [vmem:[%s6871_s1 + $0x434] ss:$8 sps:$4 sm:$0xff]  }
 0x44f   : > { %4506 = vmatprep.subr.bf16.mxu0 %v6081_v33  ;;  %v6123_v33 = vld [vmem:[%s6871_s1 + $0x534] ss:$8 sps:$4 sm:$0xff]  }
 0x451   : > { %4466 = vmatpush2.bf16.msra.mxu1 %v6076_v34  ;;  %v6118_v34 = vld [vmem:[%s6871_s1 + $0x430] ss:$8 sps:$4 sm:$0xff]  }
 0x452   : > { %4507 = vmatpush2.bf16.msra.mxu0 %v6079_v37  ;;  %4467 = vmatprep.subr.bf16.mxu1 %v6084_v38  ;;  %v6126_v37 = vld [vmem:[%s6871_s1 + $0x424] ss:$8 sps:$4 sm:$0xff]  }
 0x453   : > { %4508 = vmatprep.subr.bf16.mxu0 %v6087_v41  ;;  %v6129_v38 = vld [vmem:[%s6871_s1 + $0x524] ss:$8 sps:$4 sm:$0xff]   ;;  %v6127_v41 = vld [vmem:[%s6871_s1 + $0x520] ss:$8 sps:$4 sm:$0xff]  }
 0x455   : > { %4468 = vmatpush2.bf16.msra.mxu1 %v6082_v42  ;;  %v6132_v42 = vld [vmem:[%s6871_s1 + $0x414] ss:$8 sps:$4 sm:$0xff]  }
 0x456   : > { %4509 = vmatpush2.bf16.msra.mxu0 %v6085_v48  ;;  %4469 = vmatprep.subr.bf16.mxu1 %v6090_v49  ;;  %v6130_v48 = vld [vmem:[%s6871_s1 + $0x410] ss:$8 sps:$4 sm:$0xff]  }
 0x457   : > { %4510 = vmatprep.subr.bf16.mxu0 %v6093_v60  ;;  %v6133_v49 = vld [vmem:[%s6871_s1 + $0x510] ss:$8 sps:$4 sm:$0xff]   ;;  %v6141_v60 = vld [vmem:[%s6871_s1 + $0x504] ss:$8 sps:$4 sm:$0xff]  }
 0x459   : > { %4470 = vmatpush2.bf16.msra.mxu1 %v6088_v39  ;;  %v6136_v39 = vld [vmem:[%s6871_s1 + $0x400] ss:$8 sps:$4 sm:$0xff]  }
 0x45a   : > { %4511 = vmatpush2.bf16.msra.mxu0 %v6091_v54  ;;  %4521 = vmatprep.subr.bf16.mxu1 %v6096_v57  ;;  %v6144_v54 = vld [vmem:[%s6871_s1 + $0x4f4] ss:$8 sps:$4 sm:$0xff]  }
 0x45b   : > { %4562 = vmatprep.subr.bf16.mxu0 %v6099_v56  ;;  %v6147_v57 = vld [vmem:[%s6871_s1 + $0x5f4] ss:$8 sps:$4 sm:$0xff]   ;;  %v6145_v56 = vld [vmem:[%s6871_s1 + $0x5f0] ss:$8 sps:$4 sm:$0xff]  }
 0x45c   : > { %v7423_v1 = vpop.f32.mrf.mxu1  ;;  %4472 = vmatmul.mubr.bf16.vlgmr.msra.gmra.mxu1 %v2798_v59  ;;  %v6153_v59 = vld [vmem:[%s6871_s1 + $0x5e4] ss:$8 sps:$4 sm:$0xff]  }
 0x45d   : > { %v7428_v3 = vpop.f32.mrf.mxu0  ;;  %4513 = vmatmul.mubr.bf16.vlgmr.msra.gmra.mxu0 %v2800_v11  ;;  %4522 = vmatpush1.bf16.msra.mxu1 %v6094_v58  ;;  %v6150_v58 = vld [vmem:[%s6871_s1 + $0x4e4] ss:$8 sps:$4 sm:$0xff]   ;;  %v6156_v11 = vld [vmem:[%s6871_s1 + $0x4d4] ss:$8 sps:$4 sm:$0xff]  }
 0x45e   : > { %4563 = vmatpush1.bf16.msra.mxu0 %v6097_v61  ;;  %v2650_v5 = vpop.f32.mrf.mxu1  ;;  %4523 = vmatprep.subr.bf16.mxu1 %v6102_v62  ;;  %v6148_v61 = vld [vmem:[%s6871_s1 + $0x4e0] ss:$8 sps:$4 sm:$0xff]  }
 0x45f   : > { %v2651_v46 = vadd.f32 %v2650_v5, %v1129_v63  ;;  %v2691_v9 = vpop.f32.mrf.mxu0  ;;  %4564 = vmatprep.subr.bf16.mxu0 %v6105_v0  ;;  %v6151_v62 = vld [vmem:[%s6871_s1 + $0x5e0] ss:$8 sps:$4 sm:$0xff]   ;;  %v6159_v63 = vld [vmem:[%s6871_s1 + $0x5d4] ss:$8 sps:$4 sm:$0xff]   ;;  %v6154_v0 = vld [vmem:[%s6871_s1 + $0x4d0] ss:$8 sps:$4 sm:$0xff]  }
 0x460   : > { %v2692_v13 = vadd.f32 %v2691_v9, %v1137_v2  ;;  %v2652_v36 = vpop.f32.mrf.mxu1  ;;  %v6157_v2 = vld [vmem:[%s6871_s1 + $0x5d0] ss:$8 sps:$4 sm:$0xff]   ;;  %v6165_v5 = vld [vmem:[%s6871_s1 + $0x5c4] ss:$8 sps:$4 sm:$0xff]   ;;  %v6171_v9 = vld [vmem:[%s6871_s1 + $0x5b4] ss:$8 sps:$4 sm:$0xff]  }
 0x461   : > { %v2787_v15 = vmax.f32 %v2651_v46, 0.0  ;;  %v2693_v16 = vpop.f32.mrf.mxu0  ;;  %4524 = vmatpush1.bf16.msra.mxu1 %v6100_v4  ;;  %v6162_v4 = vld [vmem:[%s6871_s1 + $0x4c4] ss:$8 sps:$4 sm:$0xff]   ;;  %v6168_v46 = vld [vmem:[%s6871_s1 + $0x4b4] ss:$8 sps:$4 sm:$0xff]  }
 0x462   : > { %v2789_v19 = vmax.f32 %v2692_v13, 0.0  ;;  %4565 = vmatpush1.bf16.msra.mxu0 %v6103_v6  ;;  %v2653_v20 = vpop.f32.mrf.mxu1  ;;  %4525 = vmatprep.subr.bf16.mxu1 %v6108_v8  ;;  %v6160_v6 = vld [vmem:[%s6871_s1 + $0x4c0] ss:$8 sps:$4 sm:$0xff]   ;;  %v6169_v13 = vld [vmem:[%s6871_s1 + $0x5b0] ss:$8 sps:$4 sm:$0xff]  }
 0x463   : > { %v2803_v23 = vpack.c.bf16 %v2787_v15, %v2787_v15  ;;  %v2694_v24 = vpop.f32.mrf.mxu0  ;;  %4566 = vmatprep.subr.bf16.mxu0 %v6111_v12  ;;  %v6163_v8 = vld [vmem:[%s6871_s1 + $0x5c0] ss:$8 sps:$4 sm:$0xff]   ;;  %v6166_v12 = vld [vmem:[%s6871_s1 + $0x4b0] ss:$8 sps:$4 sm:$0xff]   ;;  %v6174_v36 = vld [vmem:[%s6871_s1 + $0x4a4] ss:$8 sps:$4 sm:$0xff]  }
 0x464   : > { %v2805_v27 = vpack.c.bf16 %v2789_v19, %v2789_v19  ;;  %v6177_v15 = vld [vmem:[%s6871_s1 + $0x5a4] ss:$8 sps:$4 sm:$0xff]   ;;  %v6172_v16 = vld [vmem:[%s6871_s1 + $0x4a0] ss:$8 sps:$4 sm:$0xff]   ;;  %v6180_v20 = vld [vmem:[%s6871_s1 + $0x494] ss:$8 sps:$4 sm:$0xff]  }
 0x465   : > { %4526 = vmatpush1.bf16.msra.mxu1 %v6106_v18  ;;  %4553 = vmatprep.mubr.bf16.mxu1 %v2803_v23  ;;  %v1125_v18 = vrot.slane %v7416_v22, %v6924_v44  ;;  %v6175_v19 = vld [vmem:[%s6871_s1 + $0x5a0] ss:$8 sps:$4 sm:$0xff]   ;;  %v6183_v23 = vld [vmem:[%s6871_s1 + $0x594] ss:$8 sps:$4 sm:$0xff]   ;;  %v6178_v24 = vld [vmem:[%s6871_s1 + $0x490] ss:$8 sps:$4 sm:$0xff]  }
 0x466   : > { %4567 = vmatpush1.bf16.msra.mxu0 %v6109_v21  ;;  %4594 = vmatprep.mubr.bf16.mxu0 %v2805_v27  ;;  %v1133_v21 = vrot.slane %v7416_v22, %v1100_v53  ;;  %v6186_v27 = vld [vmem:[%s6871_s1 + $0x484] ss:$8 sps:$4 sm:$0xff]   ;;  %v6184_v53 = vld [vmem:[%s6871_s1 + $0x480] ss:$8 sps:$4 sm:$0xff]  }
 0x467   : > { %4527 = vmatprep.subr.bf16.mxu1 %v6114_v25  ;;  %4568 = vmatprep.subr.bf16.mxu0 %v6117_v26  ;;  %v2649_v25 = vadd.f32 %v7423_v1, %v1125_v18  ;;  %v6181_v26 = vld [vmem:[%s6871_s1 + $0x590] ss:$8 sps:$4 sm:$0xff]   ;;  %v6192_v1 = vld [vmem:[%s6871_s1 + $0x674] ss:$8 sps:$4 sm:$0xff]   ;;  %v6220_v18 = vld [vmem:[%s6871_s1 + $0x620] ss:$8 sps:$4 sm:$0xff]  }
 0x469   : > { %4528 = vmatpush1.bf16.msra.mxu1 %v6112_v28  ;;  %v2690_v28 = vadd.f32 %v7428_v3, %v1133_v21  ;;  %v6193_v3 = vld [vmem:[%s6871_s1 + $0x770] ss:$8 sps:$4 sm:$0xff]   ;;  %v6231_v21 = vld [vmem:[%s6871_s1 + $0x714] ss:$8 sps:$4 sm:$0xff]  }
 0x46a   : > { %4569 = vmatpush1.bf16.msra.mxu0 %v6115_v30  ;;  %4529 = vmatprep.subr.bf16.mxu1 %v6120_v31  ;;  %v6189_v30 = vld [vmem:[%s6871_s1 + $0x584] ss:$8 sps:$4 sm:$0xff]   ;;  %v2786_v31 = vmax.f32 %v2649_v25, 0.0 }
 0x46b   : > { %4570 = vmatprep.subr.bf16.mxu0 %v6123_v33  ;;  %v6187_v33 = vld [vmem:[%s6871_s1 + $0x580] ss:$8 sps:$4 sm:$0xff]   ;;  %v6234_v25 = vld [vmem:[%s6871_s1 + $0x604] ss:$8 sps:$4 sm:$0xff]  }
 0x46d   : > { %4530 = vmatpush1.bf16.msra.mxu1 %v6118_v34  ;;  %v2788_v34 = vmax.f32 %v2690_v28, 0.0  ;;  %v6235_v28 = vld [vmem:[%s6871_s1 + $0x700] ss:$8 sps:$4 sm:$0xff]  }
 0x46e   : > { %4571 = vmatpush1.bf16.msra.mxu0 %v6121_v35  ;;  %4531 = vmatprep.subr.bf16.mxu1 %v6126_v37  ;;  %v6195_v35 = vld [vmem:[%s6871_s1 + $0x774] ss:$8 sps:$4 sm:$0xff]   ;;  %v6190_v37 = vld [vmem:[%s6871_s1 + $0x670] ss:$8 sps:$4 sm:$0xff]  }
 0x46f   : > { %4572 = vmatprep.subr.bf16.mxu0 %v6129_v38  ;;  %v2802_v38 = vpack.c.bf16 %v2786_v31, %v2786_v31  ;;  %v6238_v31 = vld [vmem:[%s6871_s1 + $0x6f0] ss:$8 sps:$4 sm:$0xff]  }
 0x471   : > { %4532 = vmatpush1.bf16.msra.mxu1 %v6124_v40  ;;  %v6198_v40 = vld [vmem:[%s6871_s1 + $0x664] ss:$8 sps:$4 sm:$0xff]  }
 0x472   : > { %4573 = vmatpush1.bf16.msra.mxu0 %v6127_v41  ;;  %4533 = vmatprep.subr.bf16.mxu1 %v6132_v42  ;;  %v2804_v41 = vpack.c.bf16 %v2788_v34, %v2788_v34  ;;  %v1145_v42 = vrot.slane %v7416_v22, %v1112_v10  ;;  %v6204_v10 = vld [vmem:[%s6871_s1 + $0x654] ss:$8 sps:$4 sm:$0xff]   ;;  %v6249_v34 = vld [vmem:[%s6871_s1 + $0x7e4] ss:$8 sps:$4 sm:$0xff]  }
 0x473   : > { %4574 = vmatprep.subr.bf16.mxu0 %v6135_v43  ;;  %v6201_v43 = vld [vmem:[%s6871_s1 + $0x764] ss:$8 sps:$4 sm:$0xff]  }
 0x475   : > { %4534 = vmatpush1.bf16.msra.mxu1 %v6130_v48 }
 0x476   : > { %4575 = vmatpush1.bf16.msra.mxu0 %v6133_v49  ;;  %4535 = vmatprep.subr.bf16.mxu1 %v6138_v50  ;;  %v1153_v49 = vrot.slane %v7416_v22, %v1120_v47 }
 0x477   : > { %4576 = vmatprep.subr.bf16.mxu0 %v6141_v60  ;;  %v6196_v60 = vld [vmem:[%s6871_s1 + $0x660] ss:$8 sps:$4 sm:$0xff]  }
 0x479   : > { %4536 = vmatpush1.bf16.msra.mxu1 %v6136_v39 }
 0x47a   : > { %4577 = vmatpush1.bf16.msra.mxu0 %v6139_v51  ;;  %4537 = vmatprep.subr.bf16.mxu1 %v6144_v54  ;;  %v6199_v51 = vld [vmem:[%s6871_s1 + $0x760] ss:$8 sps:$4 sm:$0xff]  }
 0x47b   : > { %4578 = vmatprep.subr.bf16.mxu0 %v6147_v57 }
 0x47d   : > { %4538 = vmatpush2.bf16.msra.mxu1 %v6142_v55  ;;  %v6207_v55 = vld [vmem:[%s6871_s1 + $0x754] ss:$8 sps:$4 sm:$0xff]  }
 0x47e   : > { %4579 = vmatpush2.bf16.msra.mxu0 %v6145_v56  ;;  %4539 = vmatprep.subr.bf16.mxu1 %v6150_v58 }
 0x47f   : > { %4580 = vmatprep.subr.bf16.mxu0 %v6153_v59 }
 0x481   : > { %4540 = vmatpush2.bf16.msra.mxu1 %v6148_v61  ;;  %v6202_v61 = vld [vmem:[%s6871_s1 + $0x650] ss:$8 sps:$4 sm:$0xff]  }
 0x482   : > { %4581 = vmatpush2.bf16.msra.mxu0 %v6151_v62  ;;  %4541 = vmatprep.subr.bf16.mxu1 %v6156_v11 }
 0x483   : > { %4582 = vmatprep.subr.bf16.mxu0 %v6159_v63  ;;  %v6205_v63 = vld [vmem:[%s6871_s1 + $0x750] ss:$8 sps:$4 sm:$0xff]  }
 0x485   : > { %4542 = vmatpush2.bf16.msra.mxu1 %v6154_v0 }
 0x486   : > { %4583 = vmatpush2.bf16.msra.mxu0 %v6157_v2  ;;  %4543 = vmatprep.subr.bf16.mxu1 %v6162_v4  ;;  %v6210_v4 = vld [vmem:[%s6871_s1 + $0x644] ss:$8 sps:$4 sm:$0xff]  }
 0x487   : > { %4584 = vmatprep.subr.bf16.mxu0 %v6165_v5  ;;  %v6213_v5 = vld [vmem:[%s6871_s1 + $0x744] ss:$8 sps:$4 sm:$0xff]  }
 0x489   : > { %4544 = vmatpush2.bf16.msra.mxu1 %v6160_v6 }
 0x48a   : > { %4585 = vmatpush2.bf16.msra.mxu0 %v6163_v8  ;;  %4545 = vmatprep.subr.bf16.mxu1 %v6168_v46  ;;  %v6208_v8 = vld [vmem:[%s6871_s1 + $0x640] ss:$8 sps:$4 sm:$0xff]  }
 0x48b   : > { %4586 = vmatprep.subr.bf16.mxu0 %v6171_v9  ;;  %v6211_v46 = vld [vmem:[%s6871_s1 + $0x740] ss:$8 sps:$4 sm:$0xff]   ;;  %v6216_v9 = vld [vmem:[%s6871_s1 + $0x634] ss:$8 sps:$4 sm:$0xff]  }
 0x48d   : > { %4546 = vmatpush2.bf16.msra.mxu1 %v6166_v12  ;;  %v6219_v12 = vld [vmem:[%s6871_s1 + $0x734] ss:$8 sps:$4 sm:$0xff]  }
 0x48e   : > { %4587 = vmatpush2.bf16.msra.mxu0 %v6169_v13  ;;  %4547 = vmatprep.subr.bf16.mxu1 %v6174_v36  ;;  %v6214_v13 = vld [vmem:[%s6871_s1 + $0x630] ss:$8 sps:$4 sm:$0xff]  }
 0x48f   : > { %4588 = vmatprep.subr.bf16.mxu0 %v6177_v15  ;;  %v6217_v36 = vld [vmem:[%s6871_s1 + $0x730] ss:$8 sps:$4 sm:$0xff]   ;;  %v6222_v15 = vld [vmem:[%s6871_s1 + $0x624] ss:$8 sps:$4 sm:$0xff]  }
 0x491   : > { %4548 = vmatpush2.bf16.msra.mxu1 %v6172_v16  ;;  %v6225_v16 = vld [vmem:[%s6871_s1 + $0x724] ss:$8 sps:$4 sm:$0xff]  }
 0x492   : > { %4589 = vmatpush2.bf16.msra.mxu0 %v6175_v19  ;;  %4549 = vmatprep.subr.bf16.mxu1 %v6180_v20  ;;  %v6223_v19 = vld [vmem:[%s6871_s1 + $0x720] ss:$8 sps:$4 sm:$0xff]   ;;  %v6228_v20 = vld [vmem:[%s6871_s1 + $0x614] ss:$8 sps:$4 sm:$0xff]  }
 0x493   : > { %4590 = vmatprep.subr.bf16.mxu0 %v6183_v23  ;;  %v6226_v23 = vld [vmem:[%s6871_s1 + $0x610] ss:$8 sps:$4 sm:$0xff]  }
 0x495   : > { %4550 = vmatpush2.bf16.msra.mxu1 %v6178_v24  ;;  %v6229_v24 = vld [vmem:[%s6871_s1 + $0x710] ss:$8 sps:$4 sm:$0xff]  }
 0x496   : > { %4591 = vmatpush2.bf16.msra.mxu0 %v6181_v26  ;;  %4551 = vmatprep.subr.bf16.mxu1 %v6186_v27  ;;  %v6237_v26 = vld [vmem:[%s6871_s1 + $0x704] ss:$8 sps:$4 sm:$0xff]   ;;  %v6232_v27 = vld [vmem:[%s6871_s1 + $0x600] ss:$8 sps:$4 sm:$0xff]  }
 0x497   : > { %4592 = vmatprep.subr.bf16.mxu0 %v6189_v30  ;;  %v6240_v30 = vld [vmem:[%s6871_s1 + $0x6f4] ss:$8 sps:$4 sm:$0xff]  }
 0x499   : > { %4552 = vmatpush2.bf16.msra.mxu1 %v6184_v53  ;;  %v6243_v53 = vld [vmem:[%s6871_s1 + $0x7f4] ss:$8 sps:$4 sm:$0xff]  }
 0x49a   : > { %4593 = vmatpush2.bf16.msra.mxu0 %v6187_v33  ;;  %4603 = vmatprep.subr.bf16.mxu1 %v6192_v1  ;;  %v6241_v33 = vld [vmem:[%s6871_s1 + $0x7f0] ss:$8 sps:$4 sm:$0xff]   ;;  %v6246_v1 = vld [vmem:[%s6871_s1 + $0x6e4] ss:$8 sps:$4 sm:$0xff]  }
 0x49b   : > { %4644 = vmatprep.subr.bf16.mxu0 %v6195_v35  ;;  %v6244_v35 = vld [vmem:[%s6871_s1 + $0x6e0] ss:$8 sps:$4 sm:$0xff]  }
 0x49c   : > { %v7504_v48 = vpop.f32.mrf.mxu1  ;;  %4554 = vmatmul.mubr.bf16.vlgmr.msra.gmra.mxu1 %v2802_v38  ;;  %v6252_v38 = vld [vmem:[%s6871_s1 + $0x6d4] ss:$8 sps:$4 sm:$0xff]  }
 0x49d   : > { %v7509_v50 = vpop.f32.mrf.mxu0  ;;  %4595 = vmatmul.mubr.bf16.vlgmr.msra.gmra.mxu0 %v2804_v41  ;;  %4604 = vmatpush1.bf16.msra.mxu1 %v6190_v37  ;;  %v6247_v37 = vld [vmem:[%s6871_s1 + $0x7e0] ss:$8 sps:$4 sm:$0xff]   ;;  %v6253_v41 = vld [vmem:[%s6871_s1 + $0x7d0] ss:$8 sps:$4 sm:$0xff]  }
 0x49e   : > { %4645 = vmatpush1.bf16.msra.mxu0 %v6193_v3  ;;  %v2732_v39 = vpop.f32.mrf.mxu1  ;;  %4605 = vmatprep.subr.bf16.mxu1 %v6198_v40  ;;  %v6255_v3 = vld [vmem:[%s6871_s1 + $0x7d4] ss:$8 sps:$4 sm:$0xff]   ;;  %v6250_v40 = vld [vmem:[%s6871_s1 + $0x6d0] ss:$8 sps:$4 sm:$0xff]  }
 0x49f   : > { %v2733_v54 = vadd.f32 %v2732_v39, %v1145_v42  ;;  %v2773_v57 = vpop.f32.mrf.mxu0  ;;  %4646 = vmatprep.subr.bf16.mxu0 %v6201_v43  ;;  %v6258_v42 = vld [vmem:[%s6871_s1 + $0x6c4] ss:$8 sps:$4 sm:$0xff]   ;;  %v6264_v39 = vld [vmem:[%s6871_s1 + $0x6b4] ss:$8 sps:$4 sm:$0xff]  }
 0x4a0   : > { %v2774_v56 = vadd.f32 %v2773_v57, %v1153_v49  ;;  %v2734_v47 = vpop.f32.mrf.mxu1  ;;  %v6261_v43 = vld [vmem:[%s6871_s1 + $0x7c4] ss:$8 sps:$4 sm:$0xff]   ;;  %v6256_v49 = vld [vmem:[%s6871_s1 + $0x6c0] ss:$8 sps:$4 sm:$0xff]  }
 0x4a1   : > { %v2791_v58 = vmax.f32 %v2733_v54, 0.0  ;;  %v2775_v59 = vpop.f32.mrf.mxu0  ;;  %4606 = vmatpush1.bf16.msra.mxu1 %v6196_v60  ;;  %v6259_v60 = vld [vmem:[%s6871_s1 + $0x7c0] ss:$8 sps:$4 sm:$0xff]   ;;  %v6265_v54 = vld [vmem:[%s6871_s1 + $0x7b0] ss:$8 sps:$4 sm:$0xff]   ;;  %v1141_v47 = vrot.slane %v7416_v22, %v1108_v29 }
 0x4a2   : > { %v2793_v62 = vmax.f32 %v2774_v56, 0.0  ;;  %4647 = vmatpush1.bf16.msra.mxu0 %v6199_v51  ;;  %v2735_v11 = vpop.f32.mrf.mxu1  ;;  %4607 = vmatprep.subr.bf16.mxu1 %v6204_v10  ;;  %v6267_v51 = vld [vmem:[%s6871_s1 + $0x7b4] ss:$8 sps:$4 sm:$0xff]   ;;  %v6262_v10 = vld [vmem:[%s6871_s1 + $0x6b0] ss:$8 sps:$4 sm:$0xff]  }
 0x4a3   : > { %v2807_v0 = vpack.c.bf16 %v2791_v58, %v2791_v58  ;;  %v2776_v2 = vpop.f32.mrf.mxu0  ;;  %4648 = vmatprep.subr.bf16.mxu0 %v6207_v55  ;;  %v6270_v57 = vld [vmem:[%s6871_s1 + $0x6a4] ss:$8 sps:$4 sm:$0xff]   ;;  %v6268_v56 = vld [vmem:[%s6871_s1 + $0x6a0] ss:$8 sps:$4 sm:$0xff]   ;;  %v6276_v59 = vld [vmem:[%s6871_s1 + $0x694] ss:$8 sps:$4 sm:$0xff]  }
 0x4a4   : > { %v2809_v6 = vpack.c.bf16 %v2793_v62, %v2793_v62  ;;  %v6273_v55 = vld [vmem:[%s6871_s1 + $0x7a4] ss:$8 sps:$4 sm:$0xff]   ;;  %v6271_v58 = vld [vmem:[%s6871_s1 + $0x7a0] ss:$8 sps:$4 sm:$0xff]   ;;  %v6279_v62 = vld [vmem:[%s6871_s1 + $0x794] ss:$8 sps:$4 sm:$0xff]  }
 0x4a5   : > { %4608 = vmatpush1.bf16.msra.mxu1 %v6202_v61  ;;  %4635 = vmatprep.mubr.bf16.mxu1 %v2807_v0  ;;  %v1149_v61 = vrot.slane %v7416_v22, %v1116_v32  ;;  %v6274_v11 = vld [vmem:[%s6871_s1 + $0x690] ss:$8 sps:$4 sm:$0xff]   ;;  %v6282_v0 = vld [vmem:[%s6871_s1 + $0x684] ss:$8 sps:$4 sm:$0xff]   ;;  %v6283_v32 = vld [vmem:[%s6871_s1 + $0x780] ss:$8 sps:$4 sm:$0xff]  }
 0x4a6   : > { %4649 = vmatpush1.bf16.msra.mxu0 %v6205_v63  ;;  %4676 = vmatprep.mubr.bf16.mxu0 %v2809_v6  ;;  %v2731_v63 = vadd.f32 %v7504_v48, %v1141_v47  ;;  %v6277_v29 = vld [vmem:[%s6871_s1 + $0x790] ss:$8 sps:$4 sm:$0xff]  }
 0x4a7   : > { %4609 = vmatprep.subr.bf16.mxu1 %v6210_v4  ;;  %4650 = vmatprep.subr.bf16.mxu0 %v6213_v5  ;;  %v2772_v2 = vadd.f32 %v7509_v50, %v1149_v61  ;;  %v6285_v4 = vld [vmem:[%s6871_s1 + $0x784] ss:$8 sps:$4 sm:$0xff]   ;;  %v450_v22 = vld [vmem:[%s6877_s8 + $0x16] sm:$0x3] }
 0x4a8   : > { %v2790_v5 = vmax.f32 %v2731_v63, 0.0  ;;  %v3070_v48 = vrot.slane %v450_v22, %v6924_v44 }
 0x4a9   : > { %4610 = vmatpush1.bf16.msra.mxu1 %v6208_v8  ;;  %v2792_v6 = vmax.f32 %v2772_v2, 0.0 }
 0x4aa   : > { %4651 = vmatpush1.bf16.msra.mxu0 %v6211_v46  ;;  %4611 = vmatprep.subr.bf16.mxu1 %v6216_v9  ;;  %v2806_v8 = vpack.c.bf16 %v2790_v5, %v2790_v5  ;;  %v3074_v9 = vrot.slane %v450_v22, %v6927_v45 }
 0x4ab   : > { %4652 = vmatprep.subr.bf16.mxu0 %v6219_v12  ;;  %v2808_v46 = vpack.c.bf16 %v2792_v6, %v2792_v6 }
 0x4ad   : > { %4612 = vmatpush1.bf16.msra.mxu1 %v6214_v13 }
 0x4ae   : > { %4653 = vmatpush1.bf16.msra.mxu0 %v6217_v36  ;;  %4613 = vmatprep.subr.bf16.mxu1 %v6222_v15 }
 0x4af   : > { %4654 = vmatprep.subr.bf16.mxu0 %v6225_v16 }
 0x4b1   : > { %4614 = vmatpush1.bf16.msra.mxu1 %v6220_v18 }
 0x4b2   : > { %4655 = vmatpush1.bf16.msra.mxu0 %v6223_v19  ;;  %4615 = vmatprep.subr.bf16.mxu1 %v6228_v20 }
 0x4b3   : > { %4656 = vmatprep.subr.bf16.mxu0 %v6231_v21 }
 0x4b5   : > { %4616 = vmatpush1.bf16.msra.mxu1 %v6226_v23 }
 0x4b6   : > { %4657 = vmatpush1.bf16.msra.mxu0 %v6229_v24  ;;  %4617 = vmatprep.subr.bf16.mxu1 %v6234_v25 }
 0x4b7   : > { %4658 = vmatprep.subr.bf16.mxu0 %v6237_v26 }
 0x4b9   : > { %4618 = vmatpush1.bf16.msra.mxu1 %v6232_v27 }
 0x4ba   : > { %4659 = vmatpush1.bf16.msra.mxu0 %v6235_v28  ;;  %4619 = vmatprep.subr.bf16.mxu1 %v6240_v30 }
 0x4bb   : > { %4660 = vmatprep.subr.bf16.mxu0 %v6243_v53 }
 0x4bd   : > { %4620 = vmatpush2.bf16.msra.mxu1 %v6238_v31 }
 0x4be   : > { %4661 = vmatpush2.bf16.msra.mxu0 %v6241_v33  ;;  %4621 = vmatprep.subr.bf16.mxu1 %v6246_v1 }
 0x4bf   : > { %4662 = vmatprep.subr.bf16.mxu0 %v6249_v34 }
 0x4c1   : > { %4622 = vmatpush2.bf16.msra.mxu1 %v6244_v35 }
 0x4c2   : > { %4663 = vmatpush2.bf16.msra.mxu0 %v6247_v37  ;;  %4623 = vmatprep.subr.bf16.mxu1 %v6252_v38 }
 0x4c3   : > { %4664 = vmatprep.subr.bf16.mxu0 %v6255_v3 }
 0x4c5   : > { %4624 = vmatpush2.bf16.msra.mxu1 %v6250_v40 }
 0x4c6   : > { %4665 = vmatpush2.bf16.msra.mxu0 %v6253_v41  ;;  %4625 = vmatprep.subr.bf16.mxu1 %v6258_v42 }
 0x4c7   : > { %4666 = vmatprep.subr.bf16.mxu0 %v6261_v43 }
 0x4c9   : > { %4626 = vmatpush2.bf16.msra.mxu1 %v6256_v49 }
 0x4ca   : > { %4667 = vmatpush2.bf16.msra.mxu0 %v6259_v60  ;;  %4627 = vmatprep.subr.bf16.mxu1 %v6264_v39 }
 0x4cb   : > { %4668 = vmatprep.subr.bf16.mxu0 %v6267_v51 }
 0x4cd   : > { %4628 = vmatpush2.bf16.msra.mxu1 %v6262_v10 }
 0x4ce   : > { %4669 = vmatpush2.bf16.msra.mxu0 %v6265_v54  ;;  %4629 = vmatprep.subr.bf16.mxu1 %v6270_v57 }
 0x4cf   : > { %4670 = vmatprep.subr.bf16.mxu0 %v6273_v55 }
 0x4d1   : > { %4630 = vmatpush2.bf16.msra.mxu1 %v6268_v56 }
 0x4d2   : > { %4671 = vmatpush2.bf16.msra.mxu0 %v6271_v58  ;;  %4631 = vmatprep.subr.bf16.mxu1 %v6276_v59 }
 0x4d3   : > { %4672 = vmatprep.subr.bf16.mxu0 %v6279_v62 }
 0x4d5   : > { %4632 = vmatpush2.bf16.msra.mxu1 %v6274_v11 }
 0x4d6   : > { %4673 = vmatpush2.bf16.msra.mxu0 %v6277_v29  ;;  %4633 = vmatprep.subr.bf16.mxu1 %v6282_v0 }
 0x4d7   : > { %4674 = vmatprep.subr.bf16.mxu0 %v6285_v4 }
 0x4d9   : > { %4634 = vmatpush2.bf16.msra.mxu1 %v6280_v14 }
 0x4da   : > { %4675 = vmatpush2.bf16.msra.mxu0 %v6283_v32 }
 0x4dc   : > { %v4391_v50 = vpop.f32.mrf.mxu1  ;;  %4636 = vmatmul.mubr.bf16.vlgmr.msra.gmra.mxu1 %v2806_v8 }
 0x4dd   : > { %v4392_v12 = vadd.f32 %v4391_v50, %v3070_v48  ;;  %v4432_v13 = vpop.f32.mrf.mxu0  ;;  %4677 = vmatmul.mubr.bf16.vlgmr.msra.gmra.mxu0 %v2808_v46 }
 0x4de   : > { %v4393_v36 = vpop.f32.mrf.mxu1 }
 0x4df   : > { %v4433_v15 = vadd.f32 %v4432_v13, %v4392_v12  ;;  %v4394_v16 = vadd.f32 %v4393_v36, %v3074_v9  ;;  %v4434_v18 = vpop.f32.mrf.mxu0 }
 0x4e0   : > { %v4395_v19 = vpop.f32.mrf.mxu1 }
 0x4e1   : > { %v4435_v20 = vadd.f32 %v4434_v18, %v4394_v16  ;;  %v4436_v21 = vpop.f32.mrf.mxu0 }
 0x4e2   : > { %v4396_v23 = vpop.f32.mrf.mxu1  ;;  %v451_v21 = vld [vmem:[%s6877_s8 + $0x18] sm:$0x3] }
 0x4e3   : > { %v4437_v24 = vpop.f32.mrf.mxu0  ;;  %v452_v23 = vld [vmem:[%s6877_s8 + $0x1a] sm:$0x3] }
 0x4e4   : > { %v4758_v24 = vrot.slane %v451_v21, %v6924_v44 }
 0x51c   : > { %v4473_v25 = vpop.f32.mrf.mxu1 }
 0x51d   : > { %v4474_v26 = vadd.f32 %v4473_v25, %v4433_v15  ;;  %v4514_v27 = vpop.f32.mrf.mxu0  ;;  %v4762_v25 = vrot.slane %v451_v21, %v6927_v45 }
 0x51e   : > { %v4475_v28 = vpop.f32.mrf.mxu1 }
 0x51f   : > { %v4515_v30 = vadd.f32 %v4514_v27, %v4474_v26  ;;  %v4476_v53 = vadd.f32 %v4475_v28, %v4435_v20  ;;  %v4516_v31 = vpop.f32.mrf.mxu0  ;;  %v4777_v26 = vrot.slane %v452_v23, %v6924_v44  ;;  %v4781_v27 = vrot.slane %v452_v23, %v6927_v45 }
 0x520   : > { %v4477_v33 = vpop.f32.mrf.mxu1  ;;  %v4763_v28 = vcombine.low %v4758_v24, %v4762_v25 }
 0x521   : > { %v4517_v1 = vadd.f32 %v4516_v31, %v4476_v53  ;;  %v4518_v34 = vpop.f32.mrf.mxu0 }
 0x522   : > { %v4478_v35 = vpop.f32.mrf.mxu1  ;;  %v4770_v31 = vrot.slane %v4763_v28, %v6899_v17 }
 0x523   : > { %v4519_v37 = vpop.f32.mrf.mxu0 }
 0x55c   : > { %v4555_v38 = vpop.f32.mrf.mxu1 }
 0x55d   : > { %v4596_v3 = vpop.f32.mrf.mxu0  ;;  %v4556_v39 = vadd.f32 %v4555_v38, %v4515_v30  ;;  %v4782_v30 = vcombine.low %v4777_v26, %v4781_v27 }
 0x55e   : > { %v4557_v40 = vpop.f32.mrf.mxu1 }
 0x55f   : > { %v4598_v41 = vpop.f32.mrf.mxu0  ;;  %v4558_v51 = vadd.f32 %v4557_v40, %v4517_v1  ;;  %v4597_v10 = vadd.f32 %v4596_v3, %v4556_v39  ;;  %v4789_v1 = vrot.slane %v4782_v30, %v6899_v17 }
 0x560   : > { %v4559_v42 = vpop.f32.mrf.mxu1 }
 0x561   : > { %v4600_v43 = vpop.f32.mrf.mxu0  ;;  %v4599_v57 = vadd.f32 %v4598_v41, %v4558_v51 }
 0x562   : > { %v4560_v49 = vpop.f32.mrf.mxu1 }
 0x563   : > { %v4601_v60 = vpop.f32.mrf.mxu0 }
 0x59c   : > { %v4637_v54 = vpop.f32.mrf.mxu1 }
 0x59d   : > { %v4638_v55 = vadd.f32 %v4637_v54, %v4597_v10  ;;  %v4678_v56 = vpop.f32.mrf.mxu0 }
 0x59e   : > { %v4639_v47 = vpop.f32.mrf.mxu1 }
 0x59f   : > { %v4640_v58 = vadd.f32 %v4639_v47, %v4599_v57  ;;  %v4680_v59 = vpop.f32.mrf.mxu0  ;;  %v4679_v62 = vadd.f32 %v4678_v56, %v4638_v55 }
 0x5a0   : > { %v4641_v61 = vpop.f32.mrf.mxu1 }
 0x5a1   : > { %v4681_v11 = vadd.f32 %v4680_v59, %v4640_v58  ;;  %v4682_v63 = vpop.f32.mrf.mxu0 }
 0x5a2   : > { %v4642_v29 = vpop.f32.mrf.mxu1 }
 0x5a3   : > { %v4687_v0 = vcombine.low %v4679_v62, %v4681_v11  ;;  %v4683_v2 = vpop.f32.mrf.mxu0 }
 0x5a5   : > { %v4694_v4 = vrot.slane %v4687_v0, %v6899_v17 }
 0x5a7   : > { %v4696_v14 = vadd.f32 %v4694_v4, %v7029_v52 }
 0x5a9   : > { %v4704_v5 = vrot.slane %v4696_v14, %v6899_v17 }
 0x5ab   : > { %v4705_v32 = vcombine.high %v4704_v5, %v4704_v5  ;;  %v4708_v22 = vsel %vm733_vm0, %v4704_v5, 0.0 }
 0x5ad   : > { %v4709_v6 = vsel %vm733_vm0, %v4705_v32, 0.0 }
 0x5ae   : > { %v4710_v48 = vadd.f32 %v4709_v6, %v4708_v22 }
 0x5b0   : > { %4711 = vadd.xlane.f32.xlu1 %v4710_v48 }
 0x639   : > { %v4712_v8 = vpop.xlane.xlu1 %4711 }
 0x63a   : > { %v4713_v46 = vmul.f32 0.00390625, %v4712_v8 }
 0x63c   : > { %v4721_v9 = vrot.slane %v4713_v46, %v6972_v7 }
 0x63e   : > { %v4723_v50 = vsub.f32 %v4696_v14, %v4721_v9 }
 0x640   : > { %v4724_v12 = vmul.f32 %v4723_v50, %v4723_v50 }
 0x642   : > { %v4732_v13 = vrot.slane %v4724_v12, %v6899_v17 }
 0x644   : > { %v4733_v52 = vcombine.high %v4732_v13, %v4732_v13  ;;  %v4736_v36 = vsel %vm733_vm0, %v4732_v13, 0.0 }
 0x646   : > { %v4737_v15 = vsel %vm733_vm0, %v4733_v52, 0.0 }
 0x647   : > { %v4738_v16 = vadd.f32 %v4737_v15, %v4736_v36 }
 0x649   : > { %4739 = vadd.xlane.f32.xlu1 %v4738_v16 }
 0x6d2   : > { %v4740_v18 = vpop.xlane.xlu1 %4739 }
 0x6d3   : > { %v4741_v19 = vmul.f32 0.00390625, %v4740_v18 }
 0x6d5   : > { %v4742_v20 = vadd.f32 1e-05, %v4741_v19 }
 0x6d7   : > { %6288 = vrsqrt.f32 %v4742_v20 }
 0x6e4   : > { %v6289_v53 = vpop.eup %6288 }
 0x6e5   : > { %v4751_v33 = vrot.slane %v6289_v53, %v6972_v7 }
 0x6e7   : > { %v4753_v34 = vmul.f32 %v4751_v33, %v4723_v50 }
 0x6e9   : > { %v4772_v35 = vmul.f32 %v4770_v31, %v4753_v34  ;;  %4796 = sbr.rel (%p5705_p4) target bundleno = 2007 (0x7d7), region = 84 }
 0x6eb   : > { %v4791_v37 = vadd.f32 %v4789_v1, %v4772_v35 }
 0x6ed   : > { %4792 = vst [vmem:[#allocation2] sm:$0xf] %v4791_v37 }
 0x6ee   : > { %v6290_v38 = vld [vmem:[#allocation12 + $0x78] sm:$0xff]   ;;  %v4804_v44 = vrot.slane %v4791_v37, %v6899_v17  ;;  %v6292_v3 = vld [vmem:[#allocation12 + $0x70] sm:$0xff]   ;;  %v6294_v7 = vld [vmem:[#allocation12 + $0x68] sm:$0xff]  }
 0x6ef   : > { %v6291_v45 = vld [vmem:[#allocation12 + $0x38] sm:$0xff]   ;;  %5730 = vmatprep.subr.bf16.mxu0 %v6290_v38  ;;  %v6293_v41 = vld [vmem:[#allocation12 + $0x30] sm:$0xff]   ;;  %v6295_v43 = vld [vmem:[#allocation12 + $0x28] sm:$0xff]  }
 0x6f0   : > { %v4805_v40 = vcombine.high %v4804_v44, %v4804_v44  ;;  %5731 = vmatpush3.bf16.msra.mxu0 %v6291_v45  ;;  %v6296_v49 = vld [vmem:[#allocation12 + $0x60] sm:$0xff]   ;;  %v6298_v39 = vld [vmem:[#allocation12 + $0x58] sm:$0xff]   ;;  %v6300_v51 = vld [vmem:[#allocation12 + $0x50] sm:$0xff]   ;;  %v4808_v47 = vpack.c.bf16 %v4804_v44, %v4804_v44 }
 0x6f1   : > { %5732 = vmatprep.subr.bf16.mxu0 %v6292_v3  ;;  %v6297_v60 = vld [vmem:[#allocation12 + $0x20] sm:$0xff]   ;;  %v6299_v17 = vld [vmem:[#allocation12 + $0x18] sm:$0xff]   ;;  %v6301_v10 = vld [vmem:[#allocation12 + $0x10] sm:$0xff]  }
 0x6f2   : > { %v4809_v42 = vpack.c.bf16 %v4805_v40, %v4805_v40  ;;  %v6302_v54 = vld [vmem:[#allocation12 + $0x48] sm:$0xff]   ;;  %v6304_v55 = vld [vmem:[#allocation12 + $0x40] sm:$0xff]  }
 0x6f3   : > { %v6303_v57 = vld [vmem:[#allocation12 + $0x8] sm:$0xff]   ;;  %v6305_v56 = vld [vmem:[#allocation12] sm:$0xff]  }
 0x6f4   : > { %4977 = vmatprep.mubr.bf16.mxu0 %v4809_v42  ;;  %5733 = vmatpush3.bf16.msra.mxu0 %v6293_v41  ;;  %v5706_v59 = vld [vmem:[#allocation14] ss:$0 sm:$0xff] }
 0x6f5   : > { %5734 = vmatprep.subr.bf16.mxu0 %v6294_v7 }
 0x6f8   : > { %5735 = vmatpush3.bf16.msra.mxu0 %v6295_v43 }
 0x6f9   : > { %5736 = vmatprep.subr.bf16.mxu0 %v6296_v49 }
 0x6fc   : > { %5737 = vmatpush3.bf16.msra.mxu0 %v6297_v60 }
 0x6fd   : > { %5738 = vmatprep.subr.bf16.mxu0 %v6298_v39 }
 0x700   : > { %5739 = vmatpush3.bf16.msra.mxu0 %v6299_v17 }
 0x701   : > { %5740 = vmatprep.subr.bf16.mxu0 %v6300_v51 }
 0x704   : > { %5741 = vmatpush3.bf16.msra.mxu0 %v6301_v10 }
 0x705   : > { %5742 = vmatprep.subr.bf16.mxu0 %v6302_v54 }
 0x708   : > { %5743 = vmatpush3.bf16.msra.mxu0 %v6303_v57 }
 0x709   : > { %5744 = vmatprep.subr.bf16.mxu0 %v6304_v55 }
 0x70c   : > { %5745 = vmatpush3.bf16.msra.mxu0 %v6305_v56 }
 0x70f   : > { %4978 = vmatmul.mubr.bf16.vlgmr.msra.gmra.mxu0 %v4808_v47 }
 0x7cf   : > { %v5746_v58 = vpop.f32.mrf.mxu0 }
 0x7d1   : > { %v5747_v61 = vpop.f32.mrf.mxu0 }
 0x7d2   : > { %v5748_v62 = vadd.f32 %v5747_v61, %v5746_v58 }
 0x7d3   : > { %v5749_v11 = vpop.f32.mrf.mxu0 }
 0x7d4   : > { %v4980_v63 = vadd.f32 %v5748_v62, %v5706_v59 }
 0x7d5   : > { %v5750_v29 = vpop.f32.mrf.mxu0 }
 0x7d6   : > { %4985 = vst [vmem:[#allocation15] sm:$0x3] %v4980_v63 }
 0x7d7 PF: > { %p5809_p6 = scmp.eq.s32.totalorder %s6646_s28, 1  ;;  %s6586_s11 = smov [#allocation15]  }
 0x7d8   : > { %s4993_s24 = sshll.u32 %s6586_s11, 4  ;;  %s4994_s24 = int_to_ptr.vmem [resolvable:$true] %s4993_s24 }
 0x7d9   : > { %s6496_s21 = scalar_lea.vmem %s4994_s24, 32  ;;  %p6503_p1 = scmp.lt.s32.totalorder %s4994_s24, %s4994_s24 }
 0x7da   : > { %p6497_p13 = scmp.ne.s32.totalorder %s4994_s24, %s6496_s21  ;;  %p6504_p3 = scmp.lt.s32.totalorder %s6496_s21, %s6496_s21 }
 0x7dc   : > { %p6498_p7 = pnand %p6497_p13, %p5809_p6  ;;  %p6505_p5 = por %p6504_p3, %p6503_p1 }
 0x7de   : > { %p6499_p11 = pneg %p6498_p7 }
 0x7e0   : > { %p6506_p8 = pnand %p6505_p5, %p6499_p11 }
 0x7e2   : > { %6509 = shalt.err (!%p6506_p8)
}
 0x7e3   : > { %5776 = dma.vmem_to_hbm [thread:$0]  (%p5809_p6), %s4994_s24, 32, %s7632_s7, [#allocation5]  }
 0x7e4   : > { %6553 = dma.done.wait (%p5809_p6), [#allocation5], 32  }
 0x7e5   : > { %6555 = vsyncadd (%p5809_p6), [#allocation5], 4294967264 }
 0x7e6 PF: > { %s7674_s30 = sld [smem:[#allocation21_spill]]  ;;  %p23_p2 = scmp.ge.s32.totalorder %s6649_s29, 4  }
 0x7e7   : > { %s7675_s26 = sld [smem:[#allocation22_spill]]  ;;  %s7676_s24 = smov %s6562_s25 }
 0x7e8   : > { %s7678_s27 = smov %s6649_s29  ;;  %25 = sbr.rel (!%p23_p2) target bundleno = 13 (0xd), region = 141 }
 0x7ec   : > { %s7677_s25 = smov %s7674_s30 }
 0x7ed   :  { %5006 = vsyncpa [#allocation4], 1 }
 0x7ee   :  { %5008 = vsyncpa [#allocation4 + $0x1], 1 }
 0x7ef   :  { %5009 = vsyncpa [#allocation7], 1 }
 0x7f0   :  { %5011 = vsyncpa [#allocation7 + $0x1], 1 }
 0x7f1   :  { %5012 = vsyncpa [#allocation10], 1 }
 0x7f2   :  { %5014 = vsyncpa [#allocation10 + $0x1], 1 }
 0x7f3   :  { %5015 = vsyncpa [#allocation13], 1 }
 0x7f4   :  { %5016 = vsyncpa [#allocation5], 1 }
 0x7f5   :  { %5018 = vsyncpa [#allocation5 + $0x1], 1 }

</bundles_post_ra>
